<compile_context>
chip_gen: v7x
topology: tpu7x:2x2x1
jax: 0.10.0
libtpu: 0.0.40
codegen_flags: <defaults>
</compile_context>

<pallas_src>
import jax
import jax.numpy as jnp
from jax.experimental import pallas as pl
from jax.experimental.pallas import tpu as pltpu


def _round_up(x, m):
    return ((x + m - 1) // m) * m


def cnn_block_kernel(tok_ref, emb_ref,
                     w1_ref, b1_ref,
                     w2_ref, b2_ref,
                     w3_ref, b3_ref,
                     out_ref):
    """Processes TB batch elements (one grid step) end to end."""
    f32 = jnp.float32
    TB, L = tok_ref.shape                      # (TB, L) int32 tokens
    Vp, E = emb_ref.shape                      # (vocab_padded, 128)
    C1 = w1_ref.shape[1]
    K1 = w1_ref.shape[0] // E
    K2 = w2_ref.shape[0]
    K3 = w3_ref.shape[0]
    L1 = L - K1 + 1
    L2 = L1 - K2 + 1
    L3 = L2 - K3 + 1

    # ---- Embedding: one-hot (lane axis = vocab) x table, one matmul over all
    # TB*L tokens.  Activations are produced sequence-major (L, TB, C) so the
    # later conv shifts slice the untiled leading axis.
    tok_t = jnp.transpose(tok_ref[...], (1, 0))                   # (L, TB) int32
    vocab = jax.lax.broadcasted_iota(jnp.int32, (L, TB, Vp), 2)
    onehot = (tok_t[:, :, None] == vocab).astype(f32)             # (L, TB, Vp)
    x = jnp.dot(onehot.reshape(L * TB, Vp), emb_ref[...],
                preferred_element_type=f32).reshape(L, TB, E)     # (L, TB, 128)

    # ---- Conv1: single im2col matmul, contraction = K1*E = 512. ----
    # Lane-aligned concat (each piece is a full 128-lane tile).
    u1 = jnp.concatenate([x[k:k + L1] for k in range(K1)], axis=-1)  # (L1,TB,K1*E)
    h1 = jnp.dot(u1.reshape(L1 * TB, K1 * E), w1_ref[...],
                 preferred_element_type=f32) + b1_ref[...]
    h1 = jnp.maximum(h1, 0.0).reshape(L1, TB, C1)                 # (L1, TB, 32)

    # ---- Conv2 / conv3: per-tap matmuls with batch folded into M.  Shifts are
    # on the (untiled) leading sequence axis -> aligned, cheap slices.
    def conv_taps(h, w_ref, b_ref, K, Lout):
        Cin = h.shape[-1]
        Cout = w_ref.shape[-1]
        acc = jnp.dot(h[0:Lout].reshape(Lout * TB, Cin), w_ref[0],
                      preferred_element_type=f32) + b_ref[...]
        for k in range(1, K):                     # static unroll (K in {8, 12})
            acc = acc + jnp.dot(h[k:k + Lout].reshape(Lout * TB, Cin), w_ref[k],
                                preferred_element_type=f32)
        return jnp.maximum(acc, 0.0).reshape(Lout, TB, Cout)

    h2 = conv_taps(h1, w2_ref, b2_ref, K2, L2)    # (L2, TB, 64)
    h3 = conv_taps(h2, w3_ref, b3_ref, K3, L3)    # (L3, TB, 128)  (Cout padded)

    # ---- Global max over the sequence (leading) axis; lane-dense store. ----
    out_ref[...] = jnp.max(h3, axis=0)            # (TB, 128)


def _choose_batch_tile(B, L, vocab_p, emb_dim, tb_max=64,
                       vmem_budget_bytes=24 * 1024 * 1024):
    """Multiple-of-8 batch tile, bounded by a rough VMEM estimate of the big
    in-kernel intermediates; prefers >=2 grid steps (2 TensorCores on v7x)."""
    # f32 bytes per batch element: one-hot + embedded x + conv1 im2col buffer.
    per_elem = 4 * L * (vocab_p + 5 * emb_dim)
    cap = max(8, (vmem_budget_bytes // max(per_elem, 1)) // 8 * 8)
    tb = min(tb_max, cap, _round_up(B, 8))
    if B > 8 and _round_up(B, tb) == tb:          # would be a single grid step
        tb = min(tb, max(8, _round_up(pl.cdiv(B, 2), 8)))
    return max(8, tb)


def cnn_block_forward(fasta, params, *, tb_max=64):
    """fasta: (B, L) int tokens.  Returns (B, 96) float32."""
    B, L = fasta.shape
    V, E = params["embed"].shape                  # (char_set_len, 128)
    C1, _, K1 = params["w1"].shape                # (32, 128, 4)
    C2, _, K2 = params["w2"].shape                # (64, 32, 8)
    C3, _, K3 = params["w3"].shape                # (96, 64, 12)
    assert L - (K1 + K2 + K3 - 3) >= 1, "sequence too short for the conv stack"

    # --- Host-side weight prep. ---
    Vp = _round_up(V, 128)                        # lane-dense one-hot compare
    emb = jnp.pad(params["embed"], ((0, Vp - V), (0, 0)))
    # Conv1 prepacked for im2col: (K1*Cin, Cout), row index = k*Cin + ci.
    w1 = jnp.transpose(params["w1"], (2, 1, 0)).reshape(K1 * E, C1)
    b1 = params["b1"].reshape(1, C1)
    # Conv2/3 in (K, Cin, Cout); pad conv3's Cout 96 -> 128 for lane-dense store.
    C3p = _round_up(C3, 128)
    w2 = jnp.transpose(params["w2"], (2, 1, 0))
    b2 = params["b2"].reshape(1, C2)
    w3 = jnp.pad(jnp.transpose(params["w3"], (2, 1, 0)),
                 ((0, 0), (0, 0), (0, C3p - C3)))
    b3 = jnp.pad(params["b3"], (0, C3p - C3)).reshape(1, C3p)

    # --- Batch tiling (pad B to a multiple of TB; padded rows sliced off). ---
    TB = _choose_batch_tile(B, L, Vp, E, tb_max=tb_max)
    B_pad = _round_up(B, TB)
    tok = jnp.pad(fasta.astype(jnp.int32), ((0, B_pad - B), (0, 0)))  # (B_pad, L)

    def resident(shape):
        # Whole array, same block every step -> fetched once, stays in VMEM.
        return pl.BlockSpec(shape, lambda b: (0,) * len(shape))

    out = pl.pallas_call(
        cnn_block_kernel,
        out_shape=jax.ShapeDtypeStruct((B_pad, C3p), jnp.float32),
        grid=(B_pad // TB,),
        in_specs=[
            pl.BlockSpec((TB, L), lambda b: (b, 0)),          # per-tile tokens
            resident(emb.shape),
            resident(w1.shape), resident(b1.shape),
            resident(w2.shape), resident(b2.shape),
            resident(w3.shape), resident(b3.shape),
        ],
        out_specs=pl.BlockSpec((TB, C3p), lambda b: (b, 0)),
        compiler_params=pltpu.CompilerParams(
            dimension_semantics=("parallel",),
            vmem_limit_bytes=48 * 1024 * 1024),
    )(tok, emb, w1, b1, w2, b2, w3, b3)

    return out[:B, :C3]


def init_params(key, char_set_len):
    ks = jax.random.split(key, 7)
    return dict(
        embed=jax.random.normal(ks[0], (char_set_len, 128), jnp.float32) * 0.1,
        w1=jax.random.normal(ks[1], (32, 128, 4), jnp.float32) * 0.05,
        b1=jax.random.normal(ks[2], (32,), jnp.float32) * 0.05,
        w2=jax.random.normal(ks[3], (64, 32, 8), jnp.float32) * 0.05,
        b2=jax.random.normal(ks[4], (64,), jnp.float32) * 0.05,
        w3=jax.random.normal(ks[5], (96, 64, 12), jnp.float32) * 0.05,
        b3=jax.random.normal(ks[6], (96,), jnp.float32) * 0.05,
    )


def reference_forward(fasta, params):
    """Pure-JAX reference replicating the PyTorch forward."""
    emb = jnp.take(params["embed"], fasta, axis=0)          # (B, L, 128)
    x = jnp.transpose(emb, (0, 2, 1))                       # (B, 128, L)

    def conv1d_relu(x, w, b):
        y = jax.lax.conv_general_dilated(
            x, w, window_strides=(1,), padding="VALID",
            dimension_numbers=("NCH", "OIH", "NCH"))
        return jax.nn.relu(y + b[None, :, None])

    x = conv1d_relu(x, params["w1"], params["b1"])
    x = conv1d_relu(x, params["w2"], params["b2"])
    x = conv1d_relu(x, params["w3"], params["b3"])
    return jnp.max(x, axis=-1)                              # (B, 96)


if __name__ == "__main__":
    key = jax.random.PRNGKey(0)
    k_tok, k_par = jax.random.split(key)

    B, L, char_set_len = 2, 48, 25     # L must be > 21 (total kernel shrink)
    fasta = jax.random.randint(k_tok, (B, L), 0, char_set_len, dtype=jnp.int32)
    params = init_params(k_par, char_set_len)

    out = cnn_block_forward(fasta, params)
    jax.block_until_ready(out)

    ref = reference_forward(fasta, params)
    assert out.shape == (B, 96), f"bad output shape {out.shape}"
    assert jnp.allclose(out, ref, atol=1e-4, rtol=1e-4), "output mismatch"

    print("KERNEL_OK")
</pallas_src>

<mosaic_0001>
module attributes {stable_mosaic.version = 11 : i64} {
  func.func @cnn_block_kernel(%arg0: i32, %arg1: memref<8x48xi32, #tpu.memory_space<vmem>>, %arg2: memref<128x128xf32, #tpu.memory_space<vmem>>, %arg3: memref<512x32xf32, #tpu.memory_space<vmem>>, %arg4: memref<1x32xf32, #tpu.memory_space<vmem>>, %arg5: memref<8x32x64xf32, #tpu.memory_space<vmem>>, %arg6: memref<1x64xf32, #tpu.memory_space<vmem>>, %arg7: memref<12x64x128xf32, #tpu.memory_space<vmem>>, %arg8: memref<1x128xf32, #tpu.memory_space<vmem>>, %arg9: memref<8x128xf32, #tpu.memory_space<vmem>>) attributes {dimension_semantics = [#tpu.dimension_semantics<parallel>], iteration_bounds = array<i64: 1>, scalar_prefetch = 0 : i64, scratch_operands = 0 : i64, tpu.core_type = #tpu.core_type<tc>, window_params = [{transform_indices = @transform_0, window_bounds = array<i64: 8, 48>}, {pipeline_mode = #tpu.pipeline_mode<synchronous>, transform_indices = @transform_1, window_bounds = array<i64: 128, 128>}, {pipeline_mode = #tpu.pipeline_mode<synchronous>, transform_indices = @transform_2, window_bounds = array<i64: 512, 32>}, {pipeline_mode = #tpu.pipeline_mode<synchronous>, transform_indices = @transform_3, window_bounds = array<i64: 1, 32>}, {pipeline_mode = #tpu.pipeline_mode<synchronous>, transform_indices = @transform_4, window_bounds = array<i64: 8, 32, 64>}, {pipeline_mode = #tpu.pipeline_mode<synchronous>, transform_indices = @transform_5, window_bounds = array<i64: 1, 64>}, {pipeline_mode = #tpu.pipeline_mode<synchronous>, transform_indices = @transform_6, window_bounds = array<i64: 12, 64, 128>}, {pipeline_mode = #tpu.pipeline_mode<synchronous>, transform_indices = @transform_7, window_bounds = array<i64: 1, 128>}, {transform_indices = @transform_8, window_bounds = array<i64: 8, 128>}]} {
    %c0 = arith.constant 0 : index
    %c0_0 = arith.constant 0 : index
    %0 = vector.load %arg1[%c0, %c0_0] : memref<8x48xi32, #tpu.memory_space<vmem>>, vector<8x48xi32>
    %1 = tpu.transpose %0, [1, 0] : vector<8x48xi32> -> vector<48x8xi32>
    %2 = tpu.iota {dimensions = array<i32: 2>} : vector<48x8x128xi32>
    %3 = vector.shape_cast %1 : vector<48x8xi32> to vector<48x8x1xi32>
    %4 = vector.broadcast %3 : vector<48x8x1xi32> to vector<48x8x128xi32>
    %5 = arith.cmpi eq, %4, %2 : vector<48x8x128xi32>
    %6 = arith.extui %5 : vector<48x8x128xi1> to vector<48x8x128xi32>
    %7 = arith.sitofp %6 : vector<48x8x128xi32> to vector<48x8x128xf32>
    %8 = vector.shape_cast %7 : vector<48x8x128xf32> to vector<384x128xf32>
    %c0_1 = arith.constant 0 : index
    %c0_2 = arith.constant 0 : index
    %9 = vector.load %arg2[%c0_1, %c0_2] : memref<128x128xf32, #tpu.memory_space<vmem>>, vector<128x128xf32>
    %cst = arith.constant dense<0.000000e+00> : vector<384x128xf32>
    %10 = tpu.matmul %8, %9, %cst {dimension_numbers = #tpu.dot_dimension_numbers<[1], [0], [0], [1], [0, 0, 1, 1], [], []>} : vector<384x128xf32>, vector<128x128xf32>, vector<384x128xf32> -> vector<384x128xf32>
    %11 = vector.shape_cast %10 : vector<384x128xf32> to vector<48x8x128xf32>
    %12 = vector.extract_strided_slice %11 {offsets = [0, 0, 0], sizes = [45, 8, 128], strides = [1, 1, 1]} : vector<48x8x128xf32> to vector<45x8x128xf32>
    %13 = vector.extract_strided_slice %11 {offsets = [1, 0, 0], sizes = [45, 8, 128], strides = [1, 1, 1]} : vector<48x8x128xf32> to vector<45x8x128xf32>
    %14 = vector.extract_strided_slice %11 {offsets = [2, 0, 0], sizes = [45, 8, 128], strides = [1, 1, 1]} : vector<48x8x128xf32> to vector<45x8x128xf32>
    %15 = vector.extract_strided_slice %11 {offsets = [3, 0, 0], sizes = [45, 8, 128], strides = [1, 1, 1]} : vector<48x8x128xf32> to vector<45x8x128xf32>
    %16 = tpu.concatenate %12, %13, %14, %15 in 2 : vector<45x8x128xf32>, vector<45x8x128xf32>, vector<45x8x128xf32>, vector<45x8x128xf32> -> vector<45x8x512xf32>
    %17 = vector.shape_cast %16 : vector<45x8x512xf32> to vector<360x512xf32>
    %c0_3 = arith.constant 0 : index
    %c0_4 = arith.constant 0 : index
    %18 = vector.load %arg3[%c0_3, %c0_4] : memref<512x32xf32, #tpu.memory_space<vmem>>, vector<512x32xf32>
    %cst_5 = arith.constant dense<0.000000e+00> : vector<360x32xf32>
    %19 = tpu.matmul %17, %18, %cst_5 {dimension_numbers = #tpu.dot_dimension_numbers<[1], [0], [0], [1], [0, 0, 1, 1], [], []>} : vector<360x512xf32>, vector<512x32xf32>, vector<360x32xf32> -> vector<360x32xf32>
    %c0_6 = arith.constant 0 : index
    %c0_7 = arith.constant 0 : index
    %20 = vector.load %arg4[%c0_6, %c0_7] : memref<1x32xf32, #tpu.memory_space<vmem>>, vector<1x32xf32>
    %21 = vector.broadcast %20 : vector<1x32xf32> to vector<360x32xf32>
    %22 = arith.addf %19, %21 : vector<360x32xf32>
    %cst_8 = arith.constant 0.000000e+00 : f32
    %23 = vector.broadcast %cst_8 : f32 to vector<360x32xf32>
    %24 = arith.maximumf %22, %23 : vector<360x32xf32>
    %25 = vector.shape_cast %24 : vector<360x32xf32> to vector<45x8x32xf32>
    %26 = vector.extract_strided_slice %25 {offsets = [0, 0, 0], sizes = [38, 8, 32], strides = [1, 1, 1]} : vector<45x8x32xf32> to vector<38x8x32xf32>
    %27 = vector.shape_cast %26 : vector<38x8x32xf32> to vector<304x32xf32>
    %c0_9 = arith.constant 0 : index
    %c0_10 = arith.constant 0 : index
    %c0_11 = arith.constant 0 : index
    %28 = vector.load %arg5[%c0_9, %c0_10, %c0_11] : memref<8x32x64xf32, #tpu.memory_space<vmem>>, vector<1x32x64xf32>
    %29 = vector.shape_cast %28 : vector<1x32x64xf32> to vector<32x64xf32>
    %cst_12 = arith.constant dense<0.000000e+00> : vector<304x64xf32>
    %30 = tpu.matmul %27, %29, %cst_12 {dimension_numbers = #tpu.dot_dimension_numbers<[1], [0], [0], [1], [0, 0, 1, 1], [], []>} : vector<304x32xf32>, vector<32x64xf32>, vector<304x64xf32> -> vector<304x64xf32>
    %c0_13 = arith.constant 0 : index
    %c0_14 = arith.constant 0 : index
    %31 = vector.load %arg6[%c0_13, %c0_14] : memref<1x64xf32, #tpu.memory_space<vmem>>, vector<1x64xf32>
    %32 = vector.broadcast %31 : vector<1x64xf32> to vector<304x64xf32>
    %33 = arith.addf %30, %32 : vector<304x64xf32>
    %34 = vector.extract_strided_slice %25 {offsets = [1, 0, 0], sizes = [38, 8, 32], strides = [1, 1, 1]} : vector<45x8x32xf32> to vector<38x8x32xf32>
    %35 = vector.shape_cast %34 : vector<38x8x32xf32> to vector<304x32xf32>
    %c1 = arith.constant 1 : index
    %c0_15 = arith.constant 0 : index
    %c0_16 = arith.constant 0 : index
    %36 = vector.load %arg5[%c1, %c0_15, %c0_16] : memref<8x32x64xf32, #tpu.memory_space<vmem>>, vector<1x32x64xf32>
    %37 = vector.shape_cast %36 : vector<1x32x64xf32> to vector<32x64xf32>
    %cst_17 = arith.constant dense<0.000000e+00> : vector<304x64xf32>
    %38 = tpu.matmul %35, %37, %cst_17 {dimension_numbers = #tpu.dot_dimension_numbers<[1], [0], [0], [1], [0, 0, 1, 1], [], []>} : vector<304x32xf32>, vector<32x64xf32>, vector<304x64xf32> -> vector<304x64xf32>
    %39 = arith.addf %33, %38 : vector<304x64xf32>
    %40 = vector.extract_strided_slice %25 {offsets = [2, 0, 0], sizes = [38, 8, 32], strides = [1, 1, 1]} : vector<45x8x32xf32> to vector<38x8x32xf32>
    %41 = vector.shape_cast %40 : vector<38x8x32xf32> to vector<304x32xf32>
    %c2 = arith.constant 2 : index
    %c0_18 = arith.constant 0 : index
    %c0_19 = arith.constant 0 : index
    %42 = vector.load %arg5[%c2, %c0_18, %c0_19] : memref<8x32x64xf32, #tpu.memory_space<vmem>>, vector<1x32x64xf32>
    %43 = vector.shape_cast %42 : vector<1x32x64xf32> to vector<32x64xf32>
    %cst_20 = arith.constant dense<0.000000e+00> : vector<304x64xf32>
    %44 = tpu.matmul %41, %43, %cst_20 {dimension_numbers = #tpu.dot_dimension_numbers<[1], [0], [0], [1], [0, 0, 1, 1], [], []>} : vector<304x32xf32>, vector<32x64xf32>, vector<304x64xf32> -> vector<304x64xf32>
    %45 = arith.addf %39, %44 : vector<304x64xf32>
    %46 = vector.extract_strided_slice %25 {offsets = [3, 0, 0], sizes = [38, 8, 32], strides = [1, 1, 1]} : vector<45x8x32xf32> to vector<38x8x32xf32>
    %47 = vector.shape_cast %46 : vector<38x8x32xf32> to vector<304x32xf32>
    %c3 = arith.constant 3 : index
    %c0_21 = arith.constant 0 : index
    %c0_22 = arith.constant 0 : index
    %48 = vector.load %arg5[%c3, %c0_21, %c0_22] : memref<8x32x64xf32, #tpu.memory_space<vmem>>, vector<1x32x64xf32>
    %49 = vector.shape_cast %48 : vector<1x32x64xf32> to vector<32x64xf32>
    %cst_23 = arith.constant dense<0.000000e+00> : vector<304x64xf32>
    %50 = tpu.matmul %47, %49, %cst_23 {dimension_numbers = #tpu.dot_dimension_numbers<[1], [0], [0], [1], [0, 0, 1, 1], [], []>} : vector<304x32xf32>, vector<32x64xf32>, vector<304x64xf32> -> vector<304x64xf32>
    %51 = arith.addf %45, %50 : vector<304x64xf32>
    %52 = vector.extract_strided_slice %25 {offsets = [4, 0, 0], sizes = [38, 8, 32], strides = [1, 1, 1]} : vector<45x8x32xf32> to vector<38x8x32xf32>
    %53 = vector.shape_cast %52 : vector<38x8x32xf32> to vector<304x32xf32>
    %c4 = arith.constant 4 : index
    %c0_24 = arith.constant 0 : index
    %c0_25 = arith.constant 0 : index
    %54 = vector.load %arg5[%c4, %c0_24, %c0_25] : memref<8x32x64xf32, #tpu.memory_space<vmem>>, vector<1x32x64xf32>
    %55 = vector.shape_cast %54 : vector<1x32x64xf32> to vector<32x64xf32>
    %cst_26 = arith.constant dense<0.000000e+00> : vector<304x64xf32>
    %56 = tpu.matmul %53, %55, %cst_26 {dimension_numbers = #tpu.dot_dimension_numbers<[1], [0], [0], [1], [0, 0, 1, 1], [], []>} : vector<304x32xf32>, vector<32x64xf32>, vector<304x64xf32> -> vector<304x64xf32>
    %57 = arith.addf %51, %56 : vector<304x64xf32>
    %58 = vector.extract_strided_slice %25 {offsets = [5, 0, 0], sizes = [38, 8, 32], strides = [1, 1, 1]} : vector<45x8x32xf32> to vector<38x8x32xf32>
    %59 = vector.shape_cast %58 : vector<38x8x32xf32> to vector<304x32xf32>
    %c5 = arith.constant 5 : index
    %c0_27 = arith.constant 0 : index
    %c0_28 = arith.constant 0 : index
    %60 = vector.load %arg5[%c5, %c0_27, %c0_28] : memref<8x32x64xf32, #tpu.memory_space<vmem>>, vector<1x32x64xf32>
    %61 = vector.shape_cast %60 : vector<1x32x64xf32> to vector<32x64xf32>
    %cst_29 = arith.constant dense<0.000000e+00> : vector<304x64xf32>
    %62 = tpu.matmul %59, %61, %cst_29 {dimension_numbers = #tpu.dot_dimension_numbers<[1], [0], [0], [1], [0, 0, 1, 1], [], []>} : vector<304x32xf32>, vector<32x64xf32>, vector<304x64xf32> -> vector<304x64xf32>
    %63 = arith.addf %57, %62 : vector<304x64xf32>
    %64 = vector.extract_strided_slice %25 {offsets = [6, 0, 0], sizes = [38, 8, 32], strides = [1, 1, 1]} : vector<45x8x32xf32> to vector<38x8x32xf32>
    %65 = vector.shape_cast %64 : vector<38x8x32xf32> to vector<304x32xf32>
    %c6 = arith.constant 6 : index
    %c0_30 = arith.constant 0 : index
    %c0_31 = arith.constant 0 : index
    %66 = vector.load %arg5[%c6, %c0_30, %c0_31] : memref<8x32x64xf32, #tpu.memory_space<vmem>>, vector<1x32x64xf32>
    %67 = vector.shape_cast %66 : vector<1x32x64xf32> to vector<32x64xf32>
    %cst_32 = arith.constant dense<0.000000e+00> : vector<304x64xf32>
    %68 = tpu.matmul %65, %67, %cst_32 {dimension_numbers = #tpu.dot_dimension_numbers<[1], [0], [0], [1], [0, 0, 1, 1], [], []>} : vector<304x32xf32>, vector<32x64xf32>, vector<304x64xf32> -> vector<304x64xf32>
    %69 = arith.addf %63, %68 : vector<304x64xf32>
    %70 = vector.extract_strided_slice %25 {offsets = [7, 0, 0], sizes = [38, 8, 32], strides = [1, 1, 1]} : vector<45x8x32xf32> to vector<38x8x32xf32>
    %71 = vector.shape_cast %70 : vector<38x8x32xf32> to vector<304x32xf32>
    %c7 = arith.constant 7 : index
    %c0_33 = arith.constant 0 : index
    %c0_34 = arith.constant 0 : index
    %72 = vector.load %arg5[%c7, %c0_33, %c0_34] : memref<8x32x64xf32, #tpu.memory_space<vmem>>, vector<1x32x64xf32>
    %73 = vector.shape_cast %72 : vector<1x32x64xf32> to vector<32x64xf32>
    %cst_35 = arith.constant dense<0.000000e+00> : vector<304x64xf32>
    %74 = tpu.matmul %71, %73, %cst_35 {dimension_numbers = #tpu.dot_dimension_numbers<[1], [0], [0], [1], [0, 0, 1, 1], [], []>} : vector<304x32xf32>, vector<32x64xf32>, vector<304x64xf32> -> vector<304x64xf32>
    %75 = arith.addf %69, %74 : vector<304x64xf32>
    %cst_36 = arith.constant 0.000000e+00 : f32
    %76 = vector.broadcast %cst_36 : f32 to vector<304x64xf32>
    %77 = arith.maximumf %75, %76 : vector<304x64xf32>
    %78 = vector.shape_cast %77 : vector<304x64xf32> to vector<38x8x64xf32>
    %79 = vector.extract_strided_slice %78 {offsets = [0, 0, 0], sizes = [27, 8, 64], strides = [1, 1, 1]} : vector<38x8x64xf32> to vector<27x8x64xf32>
    %80 = vector.shape_cast %79 : vector<27x8x64xf32> to vector<216x64xf32>
    %c0_37 = arith.constant 0 : index
    %c0_38 = arith.constant 0 : index
    %c0_39 = arith.constant 0 : index
    %81 = vector.load %arg7[%c0_37, %c0_38, %c0_39] : memref<12x64x128xf32, #tpu.memory_space<vmem>>, vector<1x64x128xf32>
    %82 = vector.shape_cast %81 : vector<1x64x128xf32> to vector<64x128xf32>
    %cst_40 = arith.constant dense<0.000000e+00> : vector<216x128xf32>
    %83 = tpu.matmul %80, %82, %cst_40 {dimension_numbers = #tpu.dot_dimension_numbers<[1], [0], [0], [1], [0, 0, 1, 1], [], []>} : vector<216x64xf32>, vector<64x128xf32>, vector<216x128xf32> -> vector<216x128xf32>
    %c0_41 = arith.constant 0 : index
    %c0_42 = arith.constant 0 : index
    %84 = vector.load %arg8[%c0_41, %c0_42] : memref<1x128xf32, #tpu.memory_space<vmem>>, vector<1x128xf32>
    %85 = vector.broadcast %84 : vector<1x128xf32> to vector<216x128xf32>
    %86 = arith.addf %83, %85 : vector<216x128xf32>
    %87 = vector.extract_strided_slice %78 {offsets = [1, 0, 0], sizes = [27, 8, 64], strides = [1, 1, 1]} : vector<38x8x64xf32> to vector<27x8x64xf32>
    %88 = vector.shape_cast %87 : vector<27x8x64xf32> to vector<216x64xf32>
    %c1_43 = arith.constant 1 : index
    %c0_44 = arith.constant 0 : index
    %c0_45 = arith.constant 0 : index
    %89 = vector.load %arg7[%c1_43, %c0_44, %c0_45] : memref<12x64x128xf32, #tpu.memory_space<vmem>>, vector<1x64x128xf32>
    %90 = vector.shape_cast %89 : vector<1x64x128xf32> to vector<64x128xf32>
    %cst_46 = arith.constant dense<0.000000e+00> : vector<216x128xf32>
    %91 = tpu.matmul %88, %90, %cst_46 {dimension_numbers = #tpu.dot_dimension_numbers<[1], [0], [0], [1], [0, 0, 1, 1], [], []>} : vector<216x64xf32>, vector<64x128xf32>, vector<216x128xf32> -> vector<216x128xf32>
    %92 = arith.addf %86, %91 : vector<216x128xf32>
    %93 = vector.extract_strided_slice %78 {offsets = [2, 0, 0], sizes = [27, 8, 64], strides = [1, 1, 1]} : vector<38x8x64xf32> to vector<27x8x64xf32>
    %94 = vector.shape_cast %93 : vector<27x8x64xf32> to vector<216x64xf32>
    %c2_47 = arith.constant 2 : index
    %c0_48 = arith.constant 0 : index
    %c0_49 = arith.constant 0 : index
    %95 = vector.load %arg7[%c2_47, %c0_48, %c0_49] : memref<12x64x128xf32, #tpu.memory_space<vmem>>, vector<1x64x128xf32>
    %96 = vector.shape_cast %95 : vector<1x64x128xf32> to vector<64x128xf32>
    %cst_50 = arith.constant dense<0.000000e+00> : vector<216x128xf32>
    %97 = tpu.matmul %94, %96, %cst_50 {dimension_numbers = #tpu.dot_dimension_numbers<[1], [0], [0], [1], [0, 0, 1, 1], [], []>} : vector<216x64xf32>, vector<64x128xf32>, vector<216x128xf32> -> vector<216x128xf32>
    %98 = arith.addf %92, %97 : vector<216x128xf32>
    %99 = vector.extract_strided_slice %78 {offsets = [3, 0, 0], sizes = [27, 8, 64], strides = [1, 1, 1]} : vector<38x8x64xf32> to vector<27x8x64xf32>
    %100 = vector.shape_cast %99 : vector<27x8x64xf32> to vector<216x64xf32>
    %c3_51 = arith.constant 3 : index
    %c0_52 = arith.constant 0 : index
    %c0_53 = arith.constant 0 : index
    %101 = vector.load %arg7[%c3_51, %c0_52, %c0_53] : memref<12x64x128xf32, #tpu.memory_space<vmem>>, vector<1x64x128xf32>
    %102 = vector.shape_cast %101 : vector<1x64x128xf32> to vector<64x128xf32>
    %cst_54 = arith.constant dense<0.000000e+00> : vector<216x128xf32>
    %103 = tpu.matmul %100, %102, %cst_54 {dimension_numbers = #tpu.dot_dimension_numbers<[1], [0], [0], [1], [0, 0, 1, 1], [], []>} : vector<216x64xf32>, vector<64x128xf32>, vector<216x128xf32> -> vector<216x128xf32>
    %104 = arith.addf %98, %103 : vector<216x128xf32>
    %105 = vector.extract_strided_slice %78 {offsets = [4, 0, 0], sizes = [27, 8, 64], strides = [1, 1, 1]} : vector<38x8x64xf32> to vector<27x8x64xf32>
    %106 = vector.shape_cast %105 : vector<27x8x64xf32> to vector<216x64xf32>
    %c4_55 = arith.constant 4 : index
    %c0_56 = arith.constant 0 : index
    %c0_57 = arith.constant 0 : index
    %107 = vector.load %arg7[%c4_55, %c0_56, %c0_57] : memref<12x64x128xf32, #tpu.memory_space<vmem>>, vector<1x64x128xf32>
    %108 = vector.shape_cast %107 : vector<1x64x128xf32> to vector<64x128xf32>
    %cst_58 = arith.constant dense<0.000000e+00> : vector<216x128xf32>
    %109 = tpu.matmul %106, %108, %cst_58 {dimension_numbers = #tpu.dot_dimension_numbers<[1], [0], [0], [1], [0, 0, 1, 1], [], []>} : vector<216x64xf32>, vector<64x128xf32>, vector<216x128xf32> -> vector<216x128xf32>
    %110 = arith.addf %104, %109 : vector<216x128xf32>
    %111 = vector.extract_strided_slice %78 {offsets = [5, 0, 0], sizes = [27, 8, 64], strides = [1, 1, 1]} : vector<38x8x64xf32> to vector<27x8x64xf32>
    %112 = vector.shape_cast %111 : vector<27x8x64xf32> to vector<216x64xf32>
    %c5_59 = arith.constant 5 : index
    %c0_60 = arith.constant 0 : index
    %c0_61 = arith.constant 0 : index
    %113 = vector.load %arg7[%c5_59, %c0_60, %c0_61] : memref<12x64x128xf32, #tpu.memory_space<vmem>>, vector<1x64x128xf32>
    %114 = vector.shape_cast %113 : vector<1x64x128xf32> to vector<64x128xf32>
    %cst_62 = arith.constant dense<0.000000e+00> : vector<216x128xf32>
    %115 = tpu.matmul %112, %114, %cst_62 {dimension_numbers = #tpu.dot_dimension_numbers<[1], [0], [0], [1], [0, 0, 1, 1], [], []>} : vector<216x64xf32>, vector<64x128xf32>, vector<216x128xf32> -> vector<216x128xf32>
    %116 = arith.addf %110, %115 : vector<216x128xf32>
    %117 = vector.extract_strided_slice %78 {offsets = [6, 0, 0], sizes = [27, 8, 64], strides = [1, 1, 1]} : vector<38x8x64xf32> to vector<27x8x64xf32>
    %118 = vector.shape_cast %117 : vector<27x8x64xf32> to vector<216x64xf32>
    %c6_63 = arith.constant 6 : index
    %c0_64 = arith.constant 0 : index
    %c0_65 = arith.constant 0 : index
    %119 = vector.load %arg7[%c6_63, %c0_64, %c0_65] : memref<12x64x128xf32, #tpu.memory_space<vmem>>, vector<1x64x128xf32>
    %120 = vector.shape_cast %119 : vector<1x64x128xf32> to vector<64x128xf32>
    %cst_66 = arith.constant dense<0.000000e+00> : vector<216x128xf32>
    %121 = tpu.matmul %118, %120, %cst_66 {dimension_numbers = #tpu.dot_dimension_numbers<[1], [0], [0], [1], [0, 0, 1, 1], [], []>} : vector<216x64xf32>, vector<64x128xf32>, vector<216x128xf32> -> vector<216x128xf32>
    %122 = arith.addf %116, %121 : vector<216x128xf32>
    %123 = vector.extract_strided_slice %78 {offsets = [7, 0, 0], sizes = [27, 8, 64], strides = [1, 1, 1]} : vector<38x8x64xf32> to vector<27x8x64xf32>
    %124 = vector.shape_cast %123 : vector<27x8x64xf32> to vector<216x64xf32>
    %c7_67 = arith.constant 7 : index
    %c0_68 = arith.constant 0 : index
    %c0_69 = arith.constant 0 : index
    %125 = vector.load %arg7[%c7_67, %c0_68, %c0_69] : memref<12x64x128xf32, #tpu.memory_space<vmem>>, vector<1x64x128xf32>
    %126 = vector.shape_cast %125 : vector<1x64x128xf32> to vector<64x128xf32>
    %cst_70 = arith.constant dense<0.000000e+00> : vector<216x128xf32>
    %127 = tpu.matmul %124, %126, %cst_70 {dimension_numbers = #tpu.dot_dimension_numbers<[1], [0], [0], [1], [0, 0, 1, 1], [], []>} : vector<216x64xf32>, vector<64x128xf32>, vector<216x128xf32> -> vector<216x128xf32>
    %128 = arith.addf %122, %127 : vector<216x128xf32>
    %129 = vector.extract_strided_slice %78 {offsets = [8, 0, 0], sizes = [27, 8, 64], strides = [1, 1, 1]} : vector<38x8x64xf32> to vector<27x8x64xf32>
    %130 = vector.shape_cast %129 : vector<27x8x64xf32> to vector<216x64xf32>
    %c8 = arith.constant 8 : index
    %c0_71 = arith.constant 0 : index
    %c0_72 = arith.constant 0 : index
    %131 = vector.load %arg7[%c8, %c0_71, %c0_72] : memref<12x64x128xf32, #tpu.memory_space<vmem>>, vector<1x64x128xf32>
    %132 = vector.shape_cast %131 : vector<1x64x128xf32> to vector<64x128xf32>
    %cst_73 = arith.constant dense<0.000000e+00> : vector<216x128xf32>
    %133 = tpu.matmul %130, %132, %cst_73 {dimension_numbers = #tpu.dot_dimension_numbers<[1], [0], [0], [1], [0, 0, 1, 1], [], []>} : vector<216x64xf32>, vector<64x128xf32>, vector<216x128xf32> -> vector<216x128xf32>
    %134 = arith.addf %128, %133 : vector<216x128xf32>
    %135 = vector.extract_strided_slice %78 {offsets = [9, 0, 0], sizes = [27, 8, 64], strides = [1, 1, 1]} : vector<38x8x64xf32> to vector<27x8x64xf32>
    %136 = vector.shape_cast %135 : vector<27x8x64xf32> to vector<216x64xf32>
    %c9 = arith.constant 9 : index
    %c0_74 = arith.constant 0 : index
    %c0_75 = arith.constant 0 : index
    %137 = vector.load %arg7[%c9, %c0_74, %c0_75] : memref<12x64x128xf32, #tpu.memory_space<vmem>>, vector<1x64x128xf32>
    %138 = vector.shape_cast %137 : vector<1x64x128xf32> to vector<64x128xf32>
    %cst_76 = arith.constant dense<0.000000e+00> : vector<216x128xf32>
    %139 = tpu.matmul %136, %138, %cst_76 {dimension_numbers = #tpu.dot_dimension_numbers<[1], [0], [0], [1], [0, 0, 1, 1], [], []>} : vector<216x64xf32>, vector<64x128xf32>, vector<216x128xf32> -> vector<216x128xf32>
    %140 = arith.addf %134, %139 : vector<216x128xf32>
    %141 = vector.extract_strided_slice %78 {offsets = [10, 0, 0], sizes = [27, 8, 64], strides = [1, 1, 1]} : vector<38x8x64xf32> to vector<27x8x64xf32>
    %142 = vector.shape_cast %141 : vector<27x8x64xf32> to vector<216x64xf32>
    %c10 = arith.constant 10 : index
    %c0_77 = arith.constant 0 : index
    %c0_78 = arith.constant 0 : index
    %143 = vector.load %arg7[%c10, %c0_77, %c0_78] : memref<12x64x128xf32, #tpu.memory_space<vmem>>, vector<1x64x128xf32>
    %144 = vector.shape_cast %143 : vector<1x64x128xf32> to vector<64x128xf32>
    %cst_79 = arith.constant dense<0.000000e+00> : vector<216x128xf32>
    %145 = tpu.matmul %142, %144, %cst_79 {dimension_numbers = #tpu.dot_dimension_numbers<[1], [0], [0], [1], [0, 0, 1, 1], [], []>} : vector<216x64xf32>, vector<64x128xf32>, vector<216x128xf32> -> vector<216x128xf32>
    %146 = arith.addf %140, %145 : vector<216x128xf32>
    %147 = vector.extract_strided_slice %78 {offsets = [11, 0, 0], sizes = [27, 8, 64], strides = [1, 1, 1]} : vector<38x8x64xf32> to vector<27x8x64xf32>
    %148 = vector.shape_cast %147 : vector<27x8x64xf32> to vector<216x64xf32>
    %c11 = arith.constant 11 : index
    %c0_80 = arith.constant 0 : index
    %c0_81 = arith.constant 0 : index
    %149 = vector.load %arg7[%c11, %c0_80, %c0_81] : memref<12x64x128xf32, #tpu.memory_space<vmem>>, vector<1x64x128xf32>
    %150 = vector.shape_cast %149 : vector<1x64x128xf32> to vector<64x128xf32>
    %cst_82 = arith.constant dense<0.000000e+00> : vector<216x128xf32>
    %151 = tpu.matmul %148, %150, %cst_82 {dimension_numbers = #tpu.dot_dimension_numbers<[1], [0], [0], [1], [0, 0, 1, 1], [], []>} : vector<216x64xf32>, vector<64x128xf32>, vector<216x128xf32> -> vector<216x128xf32>
    %152 = arith.addf %146, %151 : vector<216x128xf32>
    %cst_83 = arith.constant 0.000000e+00 : f32
    %153 = vector.broadcast %cst_83 : f32 to vector<216x128xf32>
    %154 = arith.maximumf %152, %153 : vector<216x128xf32>
    %155 = vector.shape_cast %154 : vector<216x128xf32> to vector<27x8x128xf32>
    %cst_84 = arith.constant dense<0xFF800000> : vector<8x128xf32>
    %156 = vector.multi_reduction <maximumf>, %155, %cst_84 [0] : vector<27x8x128xf32> to vector<8x128xf32>
    %c0_85 = arith.constant 0 : index
    %c0_86 = arith.constant 0 : index
    %157 = vector.load %arg9[%c0_85, %c0_86] : memref<8x128xf32, #tpu.memory_space<vmem>>, vector<8x128xf32>
    tpu.vector_store %arg9[%c0_85, %c0_86], %156 {strides = array<i32>} : memref<8x128xf32, #tpu.memory_space<vmem>>, vector<8x128xf32>,
    return
  }
  func.func @transform_0(%arg0: i32) -> (i32, i32) {
    %c0_i32 = arith.constant 0 : i32
    %c0_i32_0 = arith.constant 0 : i32
    return %arg0, %c0_i32 : i32, i32
  }
  func.func @transform_1(%arg0: i32) -> (i32, i32) {
    %c0_i32 = arith.constant 0 : i32
    %c0_i32_0 = arith.constant 0 : i32
    %c0_i32_1 = arith.constant 0 : i32
    return %c0_i32, %c0_i32_0 : i32, i32
  }
  func.func @transform_2(%arg0: i32) -> (i32, i32) {
    %c0_i32 = arith.constant 0 : i32
    %c0_i32_0 = arith.constant 0 : i32
    %c0_i32_1 = arith.constant 0 : i32
    return %c0_i32, %c0_i32_0 : i32, i32
  }
  func.func @transform_3(%arg0: i32) -> (i32, i32) {
    %c0_i32 = arith.constant 0 : i32
    %c0_i32_0 = arith.constant 0 : i32
    %c0_i32_1 = arith.constant 0 : i32
    return %c0_i32, %c0_i32_0 : i32, i32
  }
  func.func @transform_4(%arg0: i32) -> (i32, i32, i32) {
    %c0_i32 = arith.constant 0 : i32
    %c0_i32_0 = arith.constant 0 : i32
    %c0_i32_1 = arith.constant 0 : i32
    %c0_i32_2 = arith.constant 0 : i32
    return %c0_i32, %c0_i32_0, %c0_i32_1 : i32, i32, i32
  }
  func.func @transform_5(%arg0: i32) -> (i32, i32) {
    %c0_i32 = arith.constant 0 : i32
    %c0_i32_0 = arith.constant 0 : i32
    %c0_i32_1 = arith.constant 0 : i32
    return %c0_i32, %c0_i32_0 : i32, i32
  }
  func.func @transform_6(%arg0: i32) -> (i32, i32, i32) {
    %c0_i32 = arith.constant 0 : i32
    %c0_i32_0 = arith.constant 0 : i32
    %c0_i32_1 = arith.constant 0 : i32
    %c0_i32_2 = arith.constant 0 : i32
    return %c0_i32, %c0_i32_0, %c0_i32_1 : i32, i32, i32
  }
  func.func @transform_7(%arg0: i32) -> (i32, i32) {
    %c0_i32 = arith.constant 0 : i32
    %c0_i32_0 = arith.constant 0 : i32
    %c0_i32_1 = arith.constant 0 : i32
    return %c0_i32, %c0_i32_0 : i32, i32
  }
  func.func @transform_8(%arg0: i32) -> (i32, i32) {
    %c0_i32 = arith.constant 0 : i32
    %c0_i32_0 = arith.constant 0 : i32
    return %arg0, %c0_i32 : i32, i32
  }
}

</mosaic_0001>

<bundles_post_ra>
// kernel: tpu_custom_call.1
= control target key start
LH: loop header
LB: loop body
LE: loop exit
PB: predicated region body
PF: predicated region fallthrough
CT: control target
= control target key end

     0   :  { %13 = vsyncpa [#allocation3], 0  ;;  %s15228_s0 = inlined_call_operand.vmem [shape: s32[8,48], index: 0, kind: input, shape index: {}]   ;;  %s15229_s1 = inlined_call_operand.vmem [shape: f32[128,128], index: 1, kind: input, shape index: {}]   ;;  %s15230_s2 = inlined_call_operand.vmem [shape: f32[512,32], index: 2, kind: input, shape index: {}]   ;;  %s15231_s3 = inlined_call_operand.vmem [shape: f32[1,32], index: 3, kind: input, shape index: {}]   ;;  %s15232_s4 = inlined_call_operand.vmem [shape: f32[8,32,64], index: 4, kind: input, shape index: {}]   ;;  %s15233_s5 = inlined_call_operand.vmem [shape: f32[1,64], index: 5, kind: input, shape index: {}]   ;;  %s15234_s6 = inlined_call_operand.hbm [shape: f32[12,64,128], index: 6, kind: input, shape index: {}]   ;;  %s15235_s7 = inlined_call_operand.vmem [shape: f32[1,128], index: 7, kind: input, shape index: {}]   ;;  %s15236_s8 = inlined_call_operand.hbm [shape: f32[8,128], index: 8, kind: output, shape index: {}]  }
   0x1   :  { %14 = vsyncpa [#allocation4], 0  ;;  %s11888_s27 = smov [#allocation2]   ;;  %s11840_s9 = scalar_lea.hbm %s15234_s6, 12288 }
   0x2   :  { %s32_s28 = sshll.u32 %s11888_s27, 4  ;;  %p11841_p0 = scmp.ne.s32.totalorder %s15234_s6, %s11840_s9  ;;  %s33_s28 = int_to_ptr.vmem [resolvable:$true] %s32_s28 }
   0x3   :  { %p11844_p1 = scmp.lt.u32.totalorder %s11840_s9, %s15234_s6 }
   0x5   :  { %p11846_p2 = pnand %p11844_p1, %p11841_p0 }
   0x7   :  { %11849 = shalt.err (!%p11846_p2)
}
   0x8   :  { %s11850_s14 = scalar_lea.vmem %s33_s28, 12288  ;;  %p11855_p4 = scmp.lt.s32.totalorder %s33_s28, %s33_s28 }
   0x9   :  { %p11851_p3 = scmp.ne.s32.totalorder %s33_s28, %s11850_s14  ;;  %p11856_p5 = scmp.lt.s32.totalorder %s11850_s14, %s11850_s14 }
   0xb   :  { %p11857_p6 = por %p11856_p5, %p11855_p4 }
   0xd   :  { %p11858_p7 = pnand %p11857_p6, %p11851_p3 }
   0xf   :  { %11861 = shalt.err (!%p11858_p7)
}
  0x10   :  { %s11889_s15 = smov 128   ;;  %s11890_s16 = smov 8  }
  0x11   :  { %38 = dma.hbm_to_vmem [thread:$0]  %s15234_s6, 12288, %s33_s28, [#allocation3], %s11889_s15, %s11889_s15, %s11890_s16  }
  0x12   :  { %11884 = dma.done.wait [#allocation3], 12288  }
  0x13   :  { %11885 = vsyncadd [#allocation3], 4294955008  ;;  %v44_v0 = vld [vmem:[%s15228_s0] sm:$0xff]  ;;  %v560_v2 = vld [vmem:[%s15229_s1 + $0x8] sm:$0xff]  ;;  %v77_v25 = vlaneseq }
  0x14   :  { %45 = vxpose.xlu0.b32.start.end [1/1] (short) (narrow) %v44_v0, 48  ;;  %v559_v1 = vld [vmem:[%s15229_s1] sm:$0xff]  ;;  %v561_v4 = vld [vmem:[%s15229_s1 + $0x10] sm:$0xff]  ;;  %v562_v5 = vld [vmem:[%s15229_s1 + $0x18] sm:$0xff] }
  0x15   :  { %v10460_v3 = vpack.c.bf16 %v560_v2, %v559_v1  ;;  %v10464_v6 = vpack.c.bf16 %v562_v5, %v561_v4  ;;  %v563_v7 = vld [vmem:[%s15229_s1 + $0x20] sm:$0xff]  ;;  %v564_v8 = vld [vmem:[%s15229_s1 + $0x28] sm:$0xff]  ;;  %v565_v10 = vld [vmem:[%s15229_s1 + $0x30] sm:$0xff]  ;;  %v80_v26 = vshrl.u32 %v77_v25, 7 }
  0x16   :  { %v10468_v9 = vpack.c.bf16 %v564_v8, %v563_v7  ;;  %v566_v11 = vld [vmem:[%s15229_s1 + $0x38] sm:$0xff]  ;;  %v567_v13 = vld [vmem:[%s15229_s1 + $0x40] sm:$0xff]  ;;  %v568_v14 = vld [vmem:[%s15229_s1 + $0x48] sm:$0xff] }
  0x17   :  { %10461 = vmatprep.subr.bf16.mxu0 %v10460_v3  ;;  %v10472_v12 = vpack.c.bf16 %v566_v11, %v565_v10  ;;  %v10476_v15 = vpack.c.bf16 %v568_v14, %v567_v13  ;;  %v569_v16 = vld [vmem:[%s15229_s1 + $0x50] sm:$0xff]  ;;  %v570_v17 = vld [vmem:[%s15229_s1 + $0x58] sm:$0xff]  ;;  %v571_v19 = vld [vmem:[%s15229_s1 + $0x60] sm:$0xff]  ;;  %v12005_v27 = vsub.s32 1, %v80_v26  ;;  %v12007_v28 = vsub.s32 0, %v80_v26 }
  0x18   :  { %10463 = vmatpush3.bf16.msra.mxu0 %v10460_v3  ;;  %v10480_v18 = vpack.c.bf16 %v570_v17, %v569_v16  ;;  %v572_v20 = vld [vmem:[%s15229_s1 + $0x68] sm:$0xff]  ;;  %v573_v22 = vld [vmem:[%s15229_s1 + $0x70] sm:$0xff]  ;;  %v574_v23 = vld [vmem:[%s15229_s1 + $0x78] sm:$0xff]  ;;  %v12011_v32 = vsub.s32 2, %v80_v26  ;;  %v12016_v35 = vsub.s32 3, %v80_v26  ;;  %v12021_v38 = vsub.s32 4, %v80_v26 }
  0x19   :  { %10465 = vmatprep.subr.bf16.mxu0 %v10464_v6  ;;  %v10484_v21 = vpack.c.bf16 %v572_v20, %v571_v19  ;;  %v10488_v24 = vpack.c.bf16 %v574_v23, %v573_v22  ;;  %v12027_v41 = vsub.s32 5, %v80_v26  ;;  %v12029_v42 = vsub.s32 7, %v80_v26 }
  0x1a   :  { %v12032_v44 = vsub.s32 6, %v80_v26  ;;  %v15237_v22 = vmov 0.0|0.0   ;;  %v12134_v23 = vand.u32 127, %v77_v25  ;;  %v881_v26 = vld [vmem:[%s15230_s2 + $0x8] sm:$0xff]  ;;  %v882_v25 = vld [vmem:[%s15230_s2 + $0x10] sm:$0xff] }
  0x1b   :  { %10664 = vmatprep.subr.bf16.mxu1 %v15237_v22 }
  0x1c   :  { %10467 = vmatpush3.bf16.msra.mxu0 %v10464_v6 }
  0x1d   :  { %10469 = vmatprep.subr.bf16.mxu0 %v10468_v9 }
  0x20   :  { %10471 = vmatpush3.bf16.msra.mxu0 %v10468_v9 }
  0x21   :  { %10473 = vmatprep.subr.bf16.mxu0 %v10472_v12 }
  0x24   :  { %10475 = vmatpush3.bf16.msra.mxu0 %v10472_v12 }
  0x25   :  { %10477 = vmatprep.subr.bf16.mxu0 %v10476_v15 }
  0x28   :  { %10479 = vmatpush3.bf16.msra.mxu0 %v10476_v15 }
  0x29   :  { %10481 = vmatprep.subr.bf16.mxu0 %v10480_v18 }
  0x2c   :  { %10483 = vmatpush3.bf16.msra.mxu0 %v10480_v18 }
  0x2d   :  { %10485 = vmatprep.subr.bf16.mxu0 %v10484_v21 }
  0x30   :  { %10487 = vmatpush3.bf16.msra.mxu0 %v10484_v21 }
  0x31   :  { %10489 = vmatprep.subr.bf16.mxu0 %v10488_v24 }
  0x34   :  { %10491 = vmatpush3.bf16.msra.mxu0 %v10488_v24  ;;  %v880_v24 = vld [vmem:[%s15230_s2] sm:$0xff] }
  0x35   :  { %10492 = vmatprep.subr.bf16.mxu0 %v15237_v22 }
  0x94   :  { %v61_v29 = vpop.trf.xlu0 }
  0x95   :  { %v89_v30 = vrot.slane %v61_v29, %v12005_v27  ;;  %v82_v31 = vrot.slane %v61_v29, %v12007_v28  ;;  %v96_v34 = vrot.slane %v61_v29, %v12011_v32  ;;  %v103_v37 = vrot.slane %v61_v29, %v12016_v35 }
  0x96   :  { %v110_v43 = vrot.slane %v61_v29, %v12021_v38  ;;  %v117_v50 = vrot.slane %v61_v29, %v12027_v41  ;;  %v124_v56 = vrot.slane %v61_v29, %v12032_v44  ;;  %v131_v58 = vrot.slane %v61_v29, %v12029_v42 }
  0x97   :  { %91 = vbcast.lane.b32.xlu1 %v89_v30, 256  ;;  %84 = vbcast.lane.b32.xlu0 %v82_v31, 256  ;;  %v10493_v30 = vpack.c.bf16 %v881_v26, %v880_v24  ;;  %v883_v31 = vld [vmem:[%s15230_s2 + $0x18] sm:$0xff] }
  0x98   :  { %v12013_v33 = vpop.trf.xlu0 }
  0x99   :  { %v138_v59 = vrot.slane %v12013_v33, %v12007_v28  ;;  %v145_v62 = vrot.slane %v12013_v33, %v12005_v27  ;;  %v152_v0 = vrot.slane %v12013_v33, %v12011_v32  ;;  %v159_v2 = vrot.slane %v12013_v33, %v12016_v35 }
  0x9a   :  { %v166_v4 = vrot.slane %v12013_v33, %v12021_v38  ;;  %v173_v7 = vrot.slane %v12013_v33, %v12027_v41  ;;  %v180_v9 = vrot.slane %v12013_v33, %v12032_v44  ;;  %v187_v11 = vrot.slane %v12013_v33, %v12029_v42 }
  0x9b   :  { %98 = vbcast.lane.b32.xlu1 %v96_v34, 256 }
  0x9c   :  { %v12018_v36 = vpop.trf.xlu0 }
  0x9d   :  { %v208_v39 = vrot.slane %v12018_v36, %v12011_v32  ;;  %v222_v40 = vrot.slane %v12018_v36, %v12021_v38  ;;  %v236_v49 = vrot.slane %v12018_v36, %v12032_v44  ;;  %v194_v12 = vrot.slane %v12018_v36, %v12007_v28 }
  0x9e   :  { %v201_v15 = vrot.slane %v12018_v36, %v12005_v27  ;;  %v215_v16 = vrot.slane %v12018_v36, %v12016_v35  ;;  %v229_v17 = vrot.slane %v12018_v36, %v12027_v41  ;;  %v243_v18 = vrot.slane %v12018_v36, %v12029_v42  ;;  %v884_v36 = vld [vmem:[%s15230_s2 + $0x20] sm:$0xff] }
  0x9f   :  { %105 = vbcast.lane.b32.xlu1 %v103_v37, 256  ;;  %210 = vbcast.lane.b32.xlu0 %v208_v39, 256  ;;  %v885_v37 = vld [vmem:[%s15230_s2 + $0x28] sm:$0xff] }
  0xa0   :  { %v12034_v45 = vpop.trf.xlu0 }
  0xa1   :  { %v271_v46 = vrot.slane %v12034_v45, %v12016_v35  ;;  %v285_v47 = vrot.slane %v12034_v45, %v12027_v41  ;;  %v299_v48 = vrot.slane %v12034_v45, %v12029_v42  ;;  %v250_v55 = vrot.slane %v12034_v45, %v12007_v28 }
  0xa2   :  { %v264_v57 = vrot.slane %v12034_v45, %v12011_v32  ;;  %v278_v60 = vrot.slane %v12034_v45, %v12021_v38  ;;  %v292_v61 = vrot.slane %v12034_v45, %v12032_v44  ;;  %v257_v19 = vrot.slane %v12034_v45, %v12005_v27  ;;  %v888_v45 = vld [vmem:[%s15230_s2 + $0x40] sm:$0xff] }
  0xa3   :  { %112 = vbcast.lane.b32.xlu1 %v110_v43, 256  ;;  %224 = vbcast.lane.b32.xlu0 %v222_v40, 256  ;;  %v10499_v40 = vpack.c.bf16 %v885_v37, %v884_v36  ;;  %v887_v43 = vld [vmem:[%s15230_s2 + $0x38] sm:$0xff] }
  0xa4   :  { %v12045_v51 = vpop.trf.xlu0 }
  0xa5   :  { %v327_v52 = vrot.slane %v12045_v51, %v12016_v35  ;;  %v341_v53 = vrot.slane %v12045_v51, %v12027_v41  ;;  %v355_v54 = vrot.slane %v12045_v51, %v12029_v42  ;;  %v306_v63 = vrot.slane %v12045_v51, %v12007_v28 }
  0xa6   :  { %v320_v1 = vrot.slane %v12045_v51, %v12011_v32  ;;  %v334_v3 = vrot.slane %v12045_v51, %v12021_v38  ;;  %v348_v5 = vrot.slane %v12045_v51, %v12032_v44  ;;  %v313_v20 = vrot.slane %v12045_v51, %v12005_v27 }
  0xa7   :  { %119 = vbcast.lane.b32.xlu1 %v117_v50, 256  ;;  %238 = vbcast.lane.b32.xlu0 %v236_v49, 256  ;;  %v890_v49 = vld [vmem:[%s15230_s2 + $0x50] sm:$0xff]  ;;  %v891_v50 = vld [vmem:[%s15230_s2 + $0x58] sm:$0xff] }
  0xa8   :  { %v12081_v6 = vpop.trf.xlu0 }
  0xa9   :  { %v362_v8 = vrot.slane %v12081_v6, %v12007_v28  ;;  %v376_v10 = vrot.slane %v12081_v6, %v12011_v32  ;;  %v390_v13 = vrot.slane %v12081_v6, %v12021_v38  ;;  %v404_v14 = vrot.slane %v12081_v6, %v12032_v44 }
  0xaa   :  { %v369_v21 = vrot.slane %v12081_v6, %v12005_v27  ;;  %v383_v27 = vrot.slane %v12081_v6, %v12016_v35  ;;  %v11892_v32 = vmov 1.0   ;;  %v397_v34 = vrot.slane %v12081_v6, %v12027_v41  ;;  %v886_v41 = vld [vmem:[%s15230_s2 + $0x30] sm:$0xff] }
  0xab   :  { %126 = vbcast.lane.b32.xlu1 %v124_v56, 256  ;;  %252 = vbcast.lane.b32.xlu0 %v250_v55, 256  ;;  %v10496_v35 = vpack.c.bf16 %v883_v31, %v882_v25  ;;  %v411_v39 = vrot.slane %v12081_v6, %v12029_v42  ;;  %v10502_v42 = vpack.c.bf16 %v887_v43, %v886_v41  ;;  %v900_v6 = vld [vmem:[%s15230_s2 + $0xa0] sm:$0xff]  ;;  %v910_v31 = vld [vmem:[%s15230_s2 + $0xf0] sm:$0xff] }
  0xaf   :  { %133 = vbcast.lane.b32.xlu1 %v131_v58, 256  ;;  %266 = vbcast.lane.b32.xlu0 %v264_v57, 256  ;;  %v894_v57 = vld [vmem:[%s15230_s2 + $0x70] sm:$0xff]  ;;  %v895_v58 = vld [vmem:[%s15230_s2 + $0x78] sm:$0xff] }
  0xb3   :  { %140 = vbcast.lane.b32.xlu1 %v138_v59, 256  ;;  %280 = vbcast.lane.b32.xlu0 %v278_v60, 256  ;;  %v10514_v60 = vpack.c.bf16 %v895_v58, %v894_v57 }
  0xb7   :  { %147 = vbcast.lane.b32.xlu1 %v145_v62, 256  ;;  %294 = vbcast.lane.b32.xlu0 %v292_v61, 256  ;;  %v896_v61 = vld [vmem:[%s15230_s2 + $0x80] sm:$0xff]  ;;  %v897_v62 = vld [vmem:[%s15230_s2 + $0x88] sm:$0xff] }
  0xbb   :  { %154 = vbcast.lane.b32.xlu1 %v152_v0, 256  ;;  %308 = vbcast.lane.b32.xlu0 %v306_v63, 256  ;;  %v10517_v0 = vpack.c.bf16 %v897_v62, %v896_v61 }
  0xbf   :  { %161 = vbcast.lane.b32.xlu1 %v159_v2, 256  ;;  %322 = vbcast.lane.b32.xlu0 %v320_v1, 256  ;;  %v898_v1 = vld [vmem:[%s15230_s2 + $0x90] sm:$0xff]  ;;  %v899_v2 = vld [vmem:[%s15230_s2 + $0x98] sm:$0xff] }
  0xc3   :  { %168 = vbcast.lane.b32.xlu1 %v166_v4, 256  ;;  %336 = vbcast.lane.b32.xlu0 %v334_v3, 256  ;;  %v10520_v4 = vpack.c.bf16 %v899_v2, %v898_v1 }
  0xc7   :  { %175 = vbcast.lane.b32.xlu1 %v173_v7, 256  ;;  %350 = vbcast.lane.b32.xlu0 %v348_v5, 256  ;;  %v901_v7 = vld [vmem:[%s15230_s2 + $0xa8] sm:$0xff] }
  0xcb   :  { %182 = vbcast.lane.b32.xlu1 %v180_v9, 256  ;;  %364 = vbcast.lane.b32.xlu0 %v362_v8, 256  ;;  %v10523_v9 = vpack.c.bf16 %v901_v7, %v900_v6  ;;  %v917_v6 = vld [vmem:[%s15230_s2 + $0x128] sm:$0xff] }
  0xcf   :  { %189 = vbcast.lane.b32.xlu1 %v187_v11, 256  ;;  %378 = vbcast.lane.b32.xlu0 %v376_v10, 256  ;;  %v902_v10 = vld [vmem:[%s15230_s2 + $0xb0] sm:$0xff]  ;;  %v903_v11 = vld [vmem:[%s15230_s2 + $0xb8] sm:$0xff] }
  0xd3   :  { %196 = vbcast.lane.b32.xlu1 %v194_v12, 256  ;;  %392 = vbcast.lane.b32.xlu0 %v390_v13, 256 }
  0xd7   :  { %203 = vbcast.lane.b32.xlu1 %v201_v15, 256  ;;  %406 = vbcast.lane.b32.xlu0 %v404_v14, 256  ;;  %v10526_v14 = vpack.c.bf16 %v903_v11, %v902_v10  ;;  %v904_v15 = vld [vmem:[%s15230_s2 + $0xc0] sm:$0xff]  ;;  %v918_v10 = vld [vmem:[%s15230_s2 + $0x130] sm:$0xff]  ;;  %v919_v11 = vld [vmem:[%s15230_s2 + $0x138] sm:$0xff] }
  0xdb   :  { %217 = vbcast.lane.b32.xlu1 %v215_v16, 256  ;;  %v905_v16 = vld [vmem:[%s15230_s2 + $0xc8] sm:$0xff] }
  0xdf   :  { %231 = vbcast.lane.b32.xlu1 %v229_v17, 256 }
  0xe3   :  { %245 = vbcast.lane.b32.xlu1 %v243_v18, 256  ;;  %v10529_v18 = vpack.c.bf16 %v905_v16, %v904_v15 }
  0xe7   :  { %259 = vbcast.lane.b32.xlu1 %v257_v19, 256 }
  0xeb   :  { %273 = vbcast.lane.b32.xlu1 %v271_v46, 256  ;;  %v889_v46 = vld [vmem:[%s15230_s2 + $0x48] sm:$0xff] }
  0xef   :  { %287 = vbcast.lane.b32.xlu1 %v285_v47, 256 }
  0xf3   :  { %301 = vbcast.lane.b32.xlu1 %v299_v48, 256  ;;  %v10505_v48 = vpack.c.bf16 %v889_v46, %v888_v45 }
  0xf7   :  { %315 = vbcast.lane.b32.xlu1 %v313_v20, 256  ;;  %v906_v20 = vld [vmem:[%s15230_s2 + $0xd0] sm:$0xff] }
  0xfb   :  { %329 = vbcast.lane.b32.xlu1 %v327_v52, 256  ;;  %v10508_v52 = vpack.c.bf16 %v891_v50, %v890_v49 }
  0xff   :  { %343 = vbcast.lane.b32.xlu1 %v341_v53, 256  ;;  %v892_v53 = vld [vmem:[%s15230_s2 + $0x60] sm:$0xff] }
 0x103   :  { %357 = vbcast.lane.b32.xlu1 %v355_v54, 256  ;;  %v893_v54 = vld [vmem:[%s15230_s2 + $0x68] sm:$0xff] }
 0x104   :  { %v10511_v56 = vpack.c.bf16 %v893_v54, %v892_v53 }
 0x107   :  { %371 = vbcast.lane.b32.xlu1 %v369_v21, 256  ;;  %v907_v21 = vld [vmem:[%s15230_s2 + $0xd8] sm:$0xff] }
 0x108   :  { %v10532_v26 = vpack.c.bf16 %v907_v21, %v906_v20  ;;  %v924_v21 = vld [vmem:[%s15230_s2 + $0x160] sm:$0xff] }
 0x109   :  { %v92_v28 = vpop.permute.xlu1 %91  ;;  %v85_v29 = vpop.permute.xlu0 %84 }
 0x10a   :  { %vm416_vm0 = vcmp.eq.s32.totalorder %v92_v28, %v12134_v23  ;;  %vm415_vm1 = vcmp.eq.s32.totalorder %v85_v29, %v12134_v23  ;;  %v908_v28 = vld [vmem:[%s15230_s2 + $0xe0] sm:$0xff]  ;;  %v909_v29 = vld [vmem:[%s15230_s2 + $0xe8] sm:$0xff] }
 0x10b   :  { %385 = vbcast.lane.b32.xlu1 %v383_v27, 256  ;;  %8704 = vmatprep.mubr.msk.f32.mxu0 %vm415_vm1, %v11892_v32  ;;  %v10535_v25 = vpack.c.bf16 %v909_v29, %v908_v28  ;;  %v926_v29 = vld [vmem:[%s15230_s2 + $0x170] sm:$0xff] }
 0x10c   :  { %8705 = vmatmul.mubr.msk.f32.vlgmr.msra.gmra.mrb[0].mxu0 %vm416_vm0, %v11892_v32 }
 0x10d   :  { %v99_v33 = vpop.permute.xlu1 %98  ;;  %10494 = vmatpush1.bf16.msra.mxu0 %v10493_v30 }
 0x10e   :  { %vm417_vm2 = vcmp.eq.s32.totalorder %v99_v33, %v12134_v23  ;;  %10495 = vmatprep.subr.bf16.mxu0 %v15237_v22  ;;  %v911_v33 = vld [vmem:[%s15230_s2 + $0xf8] sm:$0xff] }
 0x10f   :  { %399 = vbcast.lane.b32.xlu1 %v397_v34, 256  ;;  %8707 = vmatprep.mubr.msk.f32.mxu0 %vm417_vm2, %v11892_v32  ;;  %v10538_v36 = vpack.c.bf16 %v911_v33, %v910_v31  ;;  %v928_v31 = vld [vmem:[%s15230_s2 + $0x180] sm:$0xff]  ;;  %v929_v33 = vld [vmem:[%s15230_s2 + $0x188] sm:$0xff] }
 0x111   :  { %v106_v38 = vpop.permute.xlu1 %105  ;;  %10497 = vmatpush1.bf16.msra.mxu0 %v10496_v35  ;;  %v12231_v5 = vpop.permute.xlu0 %210 }
 0x112   :  { %vm418_vm3 = vcmp.eq.s32.totalorder %v106_v38, %v12134_v23  ;;  %10498 = vmatprep.subr.bf16.mxu0 %v15237_v22  ;;  %vm433_vm2 = vcmp.eq.s32.totalorder %v12231_v5, %v12134_v23  ;;  %v916_v5 = vld [vmem:[%s15230_s2 + $0x120] sm:$0xff] }
 0x113   :  { %413 = vbcast.lane.b32.xlu1 %v411_v39, 256  ;;  %8708 = vmatmul.mubr.msk.f32.gmra.mrb[2].mxu0 %vm418_vm3, %v11892_v32 }
 0x115   :  { %v113_v44 = vpop.permute.xlu1 %112  ;;  %10500 = vmatpush1.bf16.msra.mxu0 %v10499_v40  ;;  %v225_v12 = vpop.permute.xlu0 %224 }
 0x116   :  { %vm419_vm4 = vcmp.eq.s32.totalorder %v113_v44, %v12134_v23  ;;  %10501 = vmatprep.subr.bf16.mxu0 %v15237_v22 }
 0x117   :  { %8710 = vmatprep.mubr.msk.f32.mxu0 %vm419_vm4, %v11892_v32  ;;  %vm435_vm4 = vcmp.eq.s32.totalorder %v225_v12, %v12134_v23  ;;  %v10550_v12 = vpack.c.bf16 %v919_v11, %v918_v10 }
 0x119   :  { %v120_v47 = vpop.permute.xlu1 %119  ;;  %10503 = vmatpush1.bf16.msra.mxu0 %v10502_v42  ;;  %v239_v19 = vpop.permute.xlu0 %238 }
 0x11a   :  { %vm420_vm5 = vcmp.eq.s32.totalorder %v120_v47, %v12134_v23  ;;  %10504 = vmatprep.subr.bf16.mxu0 %v15237_v22 }
 0x11b   :  { %8711 = vmatmul.mubr.msk.f32.gmra.mrb[4].mxu0 %vm420_vm5, %v11892_v32 }
 0x11d   :  { %v127_v51 = vpop.permute.xlu1 %126  ;;  %10506 = vmatpush1.bf16.msra.mxu0 %v10505_v48  ;;  %v253_v27 = vpop.permute.xlu0 %252 }
 0x11e   :  { %vm421_vm6 = vcmp.eq.s32.totalorder %v127_v51, %v12134_v23  ;;  %10507 = vmatprep.subr.bf16.mxu0 %v15237_v22 }
 0x11f   :  { %8713 = vmatprep.mubr.msk.f32.mxu0 %vm421_vm6, %v11892_v32  ;;  %vm437_vm6 = vcmp.eq.s32.totalorder %v239_v19, %v12134_v23  ;;  %v923_v19 = vld [vmem:[%s15230_s2 + $0x158] sm:$0xff] }
 0x121   :  { %v134_v55 = vpop.permute.xlu1 %133  ;;  %10509 = vmatpush1.bf16.msra.mxu0 %v10508_v52  ;;  %v267_v34 = vpop.permute.xlu0 %266 }
 0x122   :  { %vm422_vm7 = vcmp.eq.s32.totalorder %v134_v55, %v12134_v23  ;;  %10510 = vmatprep.subr.bf16.mxu0 %v15237_v22 }
 0x123   :  { %8714 = vmatmul.mubr.msk.f32.gmra.mrb[6].mxu0 %vm422_vm7, %v11892_v32  ;;  %vm439_vm7 = vcmp.eq.s32.totalorder %v253_v27, %v12134_v23 }
 0x125   :  { %v141_v59 = vpop.permute.xlu1 %140  ;;  %10512 = vmatpush1.bf16.msra.mxu0 %v10511_v56  ;;  %v281_v38 = vpop.permute.xlu0 %280 }
 0x126   :  { %vm423_vm8 = vcmp.eq.s32.totalorder %v141_v59, %v12134_v23  ;;  %10513 = vmatprep.subr.bf16.mxu0 %v15237_v22 }
 0x127   :  { %8716 = vmatprep.mubr.msk.f32.mxu0 %vm423_vm8, %v11892_v32 }
 0x129   :  { %v148_v63 = vpop.permute.xlu1 %147  ;;  %10515 = vmatpush1.bf16.msra.mxu0 %v10514_v60  ;;  %v295_v40 = vpop.permute.xlu0 %294 }
 0x12a   :  { %vm424_vm9 = vcmp.eq.s32.totalorder %v148_v63, %v12134_v23  ;;  %10516 = vmatprep.subr.bf16.mxu0 %v15237_v22  ;;  %v912_v63 = vld [vmem:[%s15230_s2 + $0x100] sm:$0xff] }
 0x12b   :  { %8717 = vmatmul.mubr.msk.f32.gmra.mrb[8].mxu0 %vm424_vm9, %v11892_v32  ;;  %vm441_vm9 = vcmp.eq.s32.totalorder %v267_v34, %v12134_v23 }
 0x12d   :  { %v155_v3 = vpop.permute.xlu1 %154  ;;  %10518 = vmatpush1.bf16.msra.mxu0 %v10517_v0  ;;  %v309_v44 = vpop.permute.xlu0 %308  ;;  %v913_v0 = vld [vmem:[%s15230_s2 + $0x108] sm:$0xff] }
 0x12e   :  { %vm425_vm10 = vcmp.eq.s32.totalorder %v155_v3, %v12134_v23  ;;  %10519 = vmatprep.subr.bf16.mxu0 %v15237_v22  ;;  %v10541_v1 = vpack.c.bf16 %v913_v0, %v912_v63  ;;  %v914_v3 = vld [vmem:[%s15230_s2 + $0x110] sm:$0xff] }
 0x12f   :  { %8719 = vmatprep.mubr.msk.f32.mxu0 %vm425_vm10, %v11892_v32 }
 0x131   :  { %v162_v8 = vpop.permute.xlu1 %161  ;;  %10521 = vmatpush1.bf16.msra.mxu0 %v10520_v4  ;;  %v323_v45 = vpop.permute.xlu0 %322 }
 0x132   :  { %vm426_vm11 = vcmp.eq.s32.totalorder %v162_v8, %v12134_v23  ;;  %10522 = vmatprep.subr.bf16.mxu0 %v15237_v22  ;;  %v10547_v8 = vpack.c.bf16 %v917_v6, %v916_v5 }
 0x133   :  { %8720 = vmatmul.mubr.msk.f32.gmra.mrb[10].mxu0 %vm426_vm11, %v11892_v32  ;;  %vm443_vm11 = vcmp.eq.s32.totalorder %v281_v38, %v12134_v23  ;;  %v931_v38 = vld [vmem:[%s15230_s2 + $0x198] sm:$0xff] }
 0x135   :  { %v169_v13 = vpop.permute.xlu1 %168  ;;  %10524 = vmatpush1.bf16.msra.mxu0 %v10523_v9  ;;  %v337_v48 = vpop.permute.xlu0 %336 }
 0x136   :  { %vm427_vm12 = vcmp.eq.s32.totalorder %v169_v13, %v12134_v23  ;;  %10525 = vmatprep.subr.bf16.mxu0 %v15237_v22  ;;  %v920_v13 = vld [vmem:[%s15230_s2 + $0x140] sm:$0xff] }
 0x137   :  { %8722 = vmatprep.mubr.msk.f32.mxu0 %vm427_vm12, %v11892_v32 }
 0x139   :  { %v176_v17 = vpop.permute.xlu1 %175  ;;  %10527 = vmatpush1.bf16.msra.mxu0 %v10526_v14  ;;  %v351_v50 = vpop.permute.xlu0 %350  ;;  %v921_v14 = vld [vmem:[%s15230_s2 + $0x148] sm:$0xff] }
 0x13a   :  { %vm428_vm13 = vcmp.eq.s32.totalorder %v176_v17, %v12134_v23  ;;  %10528 = vmatprep.subr.bf16.mxu0 %v15237_v22  ;;  %v10553_v16 = vpack.c.bf16 %v921_v14, %v920_v13 }
 0x13b   :  { %8723 = vmatmul.mubr.msk.f32.gmra.mrb[12].mxu0 %vm428_vm13, %v11892_v32  ;;  %vm445_vm13 = vcmp.eq.s32.totalorder %v295_v40, %v12134_v23  ;;  %v932_v40 = vld [vmem:[%s15230_s2 + $0x1a0] sm:$0xff] }
 0x13d   :  { %v183_v24 = vpop.permute.xlu1 %182  ;;  %10530 = vmatpush1.bf16.msra.mxu0 %v10529_v18  ;;  %v365_v53 = vpop.permute.xlu0 %364  ;;  %v922_v18 = vld [vmem:[%s15230_s2 + $0x150] sm:$0xff] }
 0x13e   :  { %vm429_vm14 = vcmp.eq.s32.totalorder %v183_v24, %v12134_v23  ;;  %10531 = vmatprep.subr.bf16.mxu0 %v15237_v22  ;;  %v10556_v20 = vpack.c.bf16 %v923_v19, %v922_v18  ;;  %v925_v24 = vld [vmem:[%s15230_s2 + $0x168] sm:$0xff] }
 0x13f   :  { %8725 = vmatprep.mubr.msk.f32.mxu0 %vm429_vm14, %v11892_v32  ;;  %v10559_v27 = vpack.c.bf16 %v925_v24, %v924_v21 }
 0x141   :  { %v190_v30 = vpop.permute.xlu1 %189  ;;  %10533 = vmatpush1.bf16.msra.mxu0 %v10532_v26  ;;  %v379_v55 = vpop.permute.xlu0 %378 }
 0x142   :  { %vm430_vm15 = vcmp.eq.s32.totalorder %v190_v30, %v12134_v23  ;;  %10534 = vmatprep.subr.bf16.mxu0 %v15237_v22  ;;  %v927_v30 = vld [vmem:[%s15230_s2 + $0x178] sm:$0xff] }
 0x143   :  { %8726 = vmatmul.mubr.msk.f32.gmra.mrb[14].mxu0 %vm430_vm15, %v11892_v32  ;;  %vm447_vm15 = vcmp.eq.s32.totalorder %v309_v44, %v12134_v23 }
 0x145   :  { %v197_v35 = vpop.permute.xlu1 %196  ;;  %10536 = vmatpush1.bf16.msra.mxu0 %v10535_v25  ;;  %v393_v58 = vpop.permute.xlu0 %392  ;;  %v10562_v25 = vpack.c.bf16 %v927_v30, %v926_v29 }
 0x146   :  { %vm431_vm0 = vcmp.eq.s32.totalorder %v197_v35, %v12134_v23  ;;  %10537 = vmatprep.subr.bf16.mxu0 %v15237_v22  ;;  %v10565_v35 = vpack.c.bf16 %v929_v33, %v928_v31 }
 0x147   :  { %8728 = vmatprep.mubr.msk.f32.mxu0 %vm431_vm0, %v11892_v32 }
 0x149   :  { %v204_v37 = vpop.permute.xlu1 %203  ;;  %10539 = vmatpush1.bf16.msra.mxu0 %v10538_v36  ;;  %v407_v60 = vpop.permute.xlu0 %406 }
 0x14a   :  { %vm432_vm1 = vcmp.eq.s32.totalorder %v204_v37, %v12134_v23  ;;  %10540 = vmatprep.subr.bf16.mxu0 %v15237_v22  ;;  %v930_v37 = vld [vmem:[%s15230_s2 + $0x190] sm:$0xff] }
 0x14b   :  { %8729 = vmatmul.mubr.msk.f32.gmra.mrb[16].mxu0 %vm432_vm1, %v11892_v32  ;;  %vm449_vm1 = vcmp.eq.s32.totalorder %v323_v45, %v12134_v23  ;;  %v934_v45 = vld [vmem:[%s15230_s2 + $0x1b0] sm:$0xff] }
 0x14c   :  { %8731 = vmatprep.mubr.msk.f32.mxu0 %vm433_vm2, %v11892_v32 }
 0x14d   :  { %v218_v39 = vpop.permute.xlu1 %217 }
 0x14e   :  { %vm434_vm3 = vcmp.eq.s32.totalorder %v218_v39, %v12134_v23  ;;  %v10568_v39 = vpack.c.bf16 %v931_v38, %v930_v37 }
 0x14f   :  { %8732 = vmatmul.mubr.msk.f32.gmra.mrb[18].mxu0 %vm434_vm3, %v11892_v32  ;;  %vm451_vm3 = vcmp.eq.s32.totalorder %v337_v48, %v12134_v23  ;;  %v936_v48 = vld [vmem:[%s15230_s2 + $0x1c0] sm:$0xff] }
 0x150   :  { %8734 = vmatprep.mubr.msk.f32.mxu0 %vm435_vm4, %v11892_v32 }
 0x151   :  { %v232_v41 = vpop.permute.xlu1 %231 }
 0x152   :  { %vm436_vm5 = vcmp.eq.s32.totalorder %v232_v41, %v12134_v23  ;;  %v933_v41 = vld [vmem:[%s15230_s2 + $0x1a8] sm:$0xff] }
 0x153   :  { %8735 = vmatmul.mubr.msk.f32.gmra.mrb[20].mxu0 %vm436_vm5, %v11892_v32  ;;  %vm453_vm5 = vcmp.eq.s32.totalorder %v351_v50, %v12134_v23  ;;  %v10571_v44 = vpack.c.bf16 %v933_v41, %v932_v40  ;;  %v1576_v41 = vld [vmem:[%s15232_s4] sm:$0xff] }
 0x154   :  { %8737 = vmatprep.mubr.msk.f32.mxu0 %vm437_vm6, %v11892_v32 }
 0x155   :  { %v246_v43 = vpop.permute.xlu1 %245 }
 0x156   :  { %vm438_vm8 = vcmp.eq.s32.totalorder %v246_v43, %v12134_v23 }
 0x157   :  { %8738 = vmatmul.mubr.msk.f32.gmra.mrb[22].mxu0 %vm438_vm8, %v11892_v32 }
 0x158   :  { %8740 = vmatprep.mubr.msk.f32.mxu0 %vm439_vm7, %v11892_v32  ;;  %vm455_vm7 = vcmp.eq.s32.totalorder %v365_v53, %v12134_v23  ;;  %v938_v53 = vld [vmem:[%s15230_s2 + $0x1d0] sm:$0xff] }
 0x159   :  { %v260_v42 = vpop.permute.xlu1 %259 }
 0x15a   :  { %vm440_vm10 = vcmp.eq.s32.totalorder %v260_v42, %v12134_v23 }
 0x15b   :  { %8741 = vmatmul.mubr.msk.f32.gmra.mrb[24].mxu0 %vm440_vm10, %v11892_v32 }
 0x15c   :  { %8743 = vmatprep.mubr.msk.f32.mxu0 %vm441_vm9, %v11892_v32  ;;  %vm457_vm9 = vcmp.eq.s32.totalorder %v379_v55, %v12134_v23 }
 0x15d   :  { %v274_v46 = vpop.permute.xlu1 %273 }
 0x15e   :  { %vm442_vm12 = vcmp.eq.s32.totalorder %v274_v46, %v12134_v23  ;;  %v935_v46 = vld [vmem:[%s15230_s2 + $0x1b8] sm:$0xff] }
 0x15f   :  { %8744 = vmatmul.mubr.msk.f32.gmra.mrb[26].mxu0 %vm442_vm12, %v11892_v32 }
 0x160   :  { %8746 = vmatprep.mubr.msk.f32.mxu0 %vm443_vm11, %v11892_v32  ;;  %vm459_vm11 = vcmp.eq.s32.totalorder %v393_v58, %v12134_v23 }
 0x161   :  { %v288_v47 = vpop.permute.xlu1 %287 }
 0x162   :  { %vm444_vm14 = vcmp.eq.s32.totalorder %v288_v47, %v12134_v23  ;;  %v10574_v47 = vpack.c.bf16 %v935_v46, %v934_v45 }
 0x163   :  { %8747 = vmatmul.mubr.msk.f32.gmra.mrb[28].mxu0 %vm444_vm14, %v11892_v32  ;;  %vm461_vm14 = vcmp.eq.s32.totalorder %v407_v60, %v12134_v23 }
 0x164   :  { %8749 = vmatprep.mubr.msk.f32.mxu0 %vm445_vm13, %v11892_v32 }
 0x165   :  { %v302_v49 = vpop.permute.xlu1 %301 }
 0x166   :  { %vm446_vm0 = vcmp.eq.s32.totalorder %v302_v49, %v12134_v23  ;;  %v937_v49 = vld [vmem:[%s15230_s2 + $0x1c8] sm:$0xff] }
 0x167   :  { %8750 = vmatmul.mubr.msk.f32.gmra.mrb[30].mxu0 %vm446_vm0, %v11892_v32  ;;  %vm1587_vm0 = vcmask 261120  }
 0x168   :  { %8752 = vmatprep.mubr.msk.f32.mxu0 %vm447_vm15, %v11892_v32 }
 0x169   :  { %v316_v51 = vpop.permute.xlu1 %315 }
 0x16a   :  { %vm448_vm2 = vcmp.eq.s32.totalorder %v316_v51, %v12134_v23  ;;  %v10577_v51 = vpack.c.bf16 %v937_v49, %v936_v48  ;;  %v7235_v48 = vld [vmem:[%s15232_s4 + $0x30] sm:$0xff]  ;;  %v7236_v49 = vld [vmem:[%s15232_s4 + $0x38] sm:$0xff] }
 0x16b   :  { %8753 = vmatmul.mubr.msk.f32.gmra.mrb[32].mxu0 %vm448_vm2, %v11892_v32  ;;  %vm4117_vm2 = vcmask 523264  }
 0x16c   :  { %8755 = vmatprep.mubr.msk.f32.mxu0 %vm449_vm1, %v11892_v32  ;;  %vm11893_vm1 = vmmov 0  }
 0x16d   :  { %v330_v52 = vpop.permute.xlu1 %329 }
 0x16e   :  { %vm450_vm4 = vcmp.eq.s32.totalorder %v330_v52, %v12134_v23 }
 0x16f   :  { %8756 = vmatmul.mubr.msk.f32.gmra.mrb[34].mxu0 %vm450_vm4, %v11892_v32 }
 0x170   :  { %8758 = vmatprep.mubr.msk.f32.mxu0 %vm451_vm3, %v11892_v32 }
 0x171   :  { %v344_v54 = vpop.permute.xlu1 %343 }
 0x172   :  { %vm452_vm6 = vcmp.eq.s32.totalorder %v344_v54, %v12134_v23  ;;  %v939_v54 = vld [vmem:[%s15230_s2 + $0x1d8] sm:$0xff] }
 0x173   :  { %8759 = vmatmul.mubr.msk.f32.gmra.mrb[36].mxu0 %vm452_vm6, %v11892_v32  ;;  %v10580_v55 = vpack.c.bf16 %v939_v54, %v938_v53  ;;  %v10600_v53 = vpack.c.bf16 %v7236_v49, %v7235_v48 }
 0x174   :  { %8761 = vmatprep.mubr.msk.f32.mxu0 %vm453_vm5, %v11892_v32 }
 0x175   :  { %v358_v56 = vpop.permute.xlu1 %357 }
 0x176   :  { %vm454_vm8 = vcmp.eq.s32.totalorder %v358_v56, %v12134_v23  ;;  %v940_v56 = vld [vmem:[%s15230_s2 + $0x1e0] sm:$0xff] }
 0x177   :  { %8762 = vmatmul.mubr.msk.f32.gmra.mrb[38].mxu0 %vm454_vm8, %v11892_v32 }
 0x178   :  { %8764 = vmatprep.mubr.msk.f32.mxu0 %vm455_vm7, %v11892_v32 }
 0x179   :  { %v372_v57 = vpop.permute.xlu1 %371 }
 0x17a   :  { %vm456_vm10 = vcmp.eq.s32.totalorder %v372_v57, %v12134_v23  ;;  %v941_v57 = vld [vmem:[%s15230_s2 + $0x1e8] sm:$0xff] }
 0x17b   :  { %8765 = vmatmul.mubr.msk.f32.gmra.mrb[40].mxu0 %vm456_vm10, %v11892_v32 }
 0x17c   :  { %8767 = vmatprep.mubr.msk.f32.mxu0 %vm457_vm9, %v11892_v32 }
 0x17d   :  { %v386_v59 = vpop.permute.xlu1 %385 }
 0x17e   :  { %vm458_vm12 = vcmp.eq.s32.totalorder %v386_v59, %v12134_v23  ;;  %v10583_v59 = vpack.c.bf16 %v941_v57, %v940_v56 }
 0x17f   :  { %8768 = vmatmul.mubr.msk.f32.gmra.mrb[42].mxu0 %vm458_vm12, %v11892_v32 }
 0x180   :  { %8770 = vmatprep.mubr.msk.f32.mxu0 %vm459_vm11, %v11892_v32 }
 0x181   :  { %v400_v61 = vpop.permute.xlu1 %399 }
 0x182   :  { %vm460_vm13 = vcmp.eq.s32.totalorder %v400_v61, %v12134_v23  ;;  %v942_v61 = vld [vmem:[%s15230_s2 + $0x1f0] sm:$0xff] }
 0x183   :  { %8771 = vmatmul.mubr.msk.f32.gmra.mrb[44].mxu0 %vm460_vm13, %v11892_v32 }
 0x184   :  { %8773 = vmatprep.mubr.msk.f32.mxu0 %vm461_vm14, %v11892_v32 }
 0x185   :  { %v414_v62 = vpop.permute.xlu1 %413 }
 0x186   :  { %vm462_vm15 = vcmp.eq.s32.totalorder %v414_v62, %v12134_v23  ;;  %v915_v23 = vld [vmem:[%s15230_s2 + $0x118] sm:$0xff] }
 0x187   :  { %8774 = vmatmul.mubr.msk.f32.gmra.mrb[46].mxu0 %vm462_vm15, %v11892_v32  ;;  %v10544_v32 = vpack.c.bf16 %v915_v23, %v914_v3  ;;  %v943_v62 = vld [vmem:[%s15230_s2 + $0x1f8] sm:$0xff] }
 0x188   :  { %v10586_v63 = vpack.c.bf16 %v943_v62, %v942_v61 }
 0x1df   :  { %v8706_v2 = vpop.f32.mrb[0].mxu0 }
 0x1e0   :  { %v641_v4 = vpop.f32.mrb[1].mxu0  ;;  %1015 = vmatprep.mubr.f32.mxu0 %v8706_v2 }
 0x1e1   :  { %1016 = vmatmul.mubr.f32.vlgmr.msra.gmra.mrb[48].mxu0 %v641_v4 }
 0x1e2   :  { %10542 = vmatpush1.bf16.msra.mxu0 %v10541_v1 }
 0x1e3   :  { %10543 = vmatprep.subr.bf16.mxu0 %v15237_v22 }
 0x1e6   :  { %v12372_v7 = vpop.f32.mrb[2].mxu0  ;;  %10545 = vmatpush1.bf16.msra.mxu0 %v10544_v32 }
 0x1e7   :  { %v12374_v9 = vpop.f32.mrb[3].mxu0  ;;  %10546 = vmatprep.subr.bf16.mxu0 %v15237_v22 }
 0x1e8   :  { %1020 = vmatprep.mubr.f32.mxu0 %v12374_v9 }
 0x1e9   :  { %1021 = vmatmul.mubr.f32.gmra.mrb[50].mxu0 %v8706_v2 }
 0x1ea   :  { %1025 = vmatprep.mubr.f32.mxu0 %v12372_v7  ;;  %10548 = vmatpush1.bf16.msra.mxu0 %v10547_v8 }
 0x1eb   :  { %10549 = vmatprep.subr.bf16.mxu0 %v15237_v22 }
 0x1ed   :  { %1026 = vmatmul.mubr.f32.gmra.mrb[52].mxu0 %v12374_v9 }
 0x1ee   :  { %v12393_v15 = vpop.f32.mrb[4].mxu0  ;;  %10551 = vmatpush1.bf16.msra.mxu0 %v10550_v12 }
 0x1ef   :  { %v12395_v17 = vpop.f32.mrb[5].mxu0  ;;  %10552 = vmatprep.subr.bf16.mxu0 %v15237_v22 }
 0x1f0   :  { %1030 = vmatprep.mubr.f32.mxu0 %v12395_v17 }
 0x1f1   :  { %1031 = vmatmul.mubr.f32.gmra.mrb[54].mxu0 %v12372_v7 }
 0x1f2   :  { %1035 = vmatprep.mubr.f32.mxu0 %v12393_v15  ;;  %10554 = vmatpush1.bf16.msra.mxu0 %v10553_v16 }
 0x1f3   :  { %10555 = vmatprep.subr.bf16.mxu0 %v15237_v22 }
 0x1f5   :  { %1036 = vmatmul.mubr.f32.gmra.mrb[56].mxu0 %v12395_v17 }
 0x1f6   :  { %v12415_v26 = vpop.f32.mrb[6].mxu0  ;;  %10557 = vmatpush1.bf16.msra.mxu0 %v10556_v20 }
 0x1f7   :  { %v12417_v28 = vpop.f32.mrb[7].mxu0  ;;  %10558 = vmatprep.subr.bf16.mxu0 %v15237_v22 }
 0x1f8   :  { %1040 = vmatprep.mubr.f32.mxu0 %v12417_v28 }
 0x1f9   :  { %1041 = vmatmul.mubr.f32.gmra.mrb[58].mxu0 %v12393_v15 }
 0x1fa   :  { %1045 = vmatprep.mubr.f32.mxu0 %v12415_v26  ;;  %10560 = vmatpush1.bf16.msra.mxu0 %v10559_v27 }
 0x1fb   :  { %10561 = vmatprep.subr.bf16.mxu0 %v15237_v22 }
 0x1fd   :  { %1046 = vmatmul.mubr.f32.gmra.mrb[60].mxu0 %v12417_v28 }
 0x1fe   :  { %v12437_v34 = vpop.f32.mrb[8].mxu0  ;;  %10563 = vmatpush1.bf16.msra.mxu0 %v10562_v25 }
 0x1ff   :  { %v12439_v36 = vpop.f32.mrb[9].mxu0  ;;  %10564 = vmatprep.subr.bf16.mxu0 %v15237_v22 }
 0x200   :  { %1050 = vmatprep.mubr.f32.mxu0 %v12439_v36 }
 0x201   :  { %1051 = vmatmul.mubr.f32.gmra.mrb[62].mxu0 %v12415_v26 }
 0x202   :  { %1055 = vmatprep.mubr.f32.mxu0 %v12437_v34  ;;  %10566 = vmatpush1.bf16.msra.mxu0 %v10565_v35 }
 0x203   :  { %10567 = vmatprep.subr.bf16.mxu0 %v15237_v22 }
 0x205   :  { %1056 = vmatmul.mubr.f32.gmra.mrb[64].mxu0 %v12439_v36 }
 0x206   :  { %v12459_v43 = vpop.f32.mrb[10].mxu0  ;;  %10569 = vmatpush1.bf16.msra.mxu0 %v10568_v39 }
 0x207   :  { %v12461_v42 = vpop.f32.mrb[11].mxu0  ;;  %10570 = vmatprep.subr.bf16.mxu0 %v15237_v22 }
 0x208   :  { %1060 = vmatprep.mubr.f32.mxu0 %v12461_v42 }
 0x209   :  { %1061 = vmatmul.mubr.f32.gmra.mrb[66].mxu0 %v12437_v34 }
 0x20a   :  { %1065 = vmatprep.mubr.f32.mxu0 %v12459_v43  ;;  %10572 = vmatpush1.bf16.msra.mxu0 %v10571_v44  ;;  %v1577_v44 = vld [vmem:[%s15232_s4 + $0x8] sm:$0xff] }
 0x20b   :  { %10573 = vmatprep.subr.bf16.mxu0 %v15237_v22  ;;  %v10588_v45 = vpack.c.bf16 %v1577_v44, %v1576_v41 }
 0x20d   :  { %1066 = vmatmul.mubr.f32.gmra.mrb[68].mxu0 %v12461_v42 }
 0x20e   :  { %v12481_v50 = vpop.f32.mrb[12].mxu0  ;;  %10575 = vmatpush1.bf16.msra.mxu0 %v10574_v47 }
 0x20f   :  { %v12483_v52 = vpop.f32.mrb[13].mxu0  ;;  %10576 = vmatprep.subr.bf16.mxu0 %v15237_v22 }
 0x210   :  { %1070 = vmatprep.mubr.f32.mxu0 %v12483_v52 }
 0x211   :  { %1071 = vmatmul.mubr.f32.gmra.mrb[70].mxu0 %v12459_v43 }
 0x212   :  { %1075 = vmatprep.mubr.f32.mxu0 %v12481_v50  ;;  %10578 = vmatpush1.bf16.msra.mxu0 %v10577_v51 }
 0x213   :  { %10579 = vmatprep.subr.bf16.mxu0 %v15237_v22 }
 0x215   :  { %1076 = vmatmul.mubr.f32.gmra.mrb[72].mxu0 %v12483_v52 }
 0x216   :  { %v12503_v58 = vpop.f32.mrb[14].mxu0  ;;  %10581 = vmatpush1.bf16.msra.mxu0 %v10580_v55 }
 0x217   :  { %v12505_v60 = vpop.f32.mrb[15].mxu0  ;;  %10582 = vmatprep.subr.bf16.mxu0 %v15237_v22 }
 0x218   :  { %1080 = vmatprep.mubr.f32.mxu0 %v12505_v60 }
 0x219   :  { %1081 = vmatmul.mubr.f32.gmra.mrb[74].mxu0 %v12481_v50 }
 0x21a   :  { %1085 = vmatprep.mubr.f32.mxu0 %v12503_v58  ;;  %10584 = vmatpush1.bf16.msra.mxu0 %v10583_v59 }
 0x21b   :  { %10585 = vmatprep.subr.bf16.mxu0 %v15237_v22 }
 0x21d   :  { %1086 = vmatmul.mubr.f32.gmra.mrb[76].mxu0 %v12505_v60 }
 0x21e   :  { %v12519_v0 = vpop.f32.mrb[16].mxu0  ;;  %10587 = vmatpush1.bf16.msra.mxu0 %v10586_v63 }
 0x21f   :  { %v12521_v1 = vpop.f32.mrb[17].mxu0  ;;  %10589 = vmatprep.subr.bf16.mxu0 %v10588_v45 }
 0x220   :  { %1090 = vmatprep.mubr.f32.mxu0 %v12521_v1 }
 0x221   :  { %1091 = vmatmul.mubr.f32.gmra.mrb[78].mxu0 %v12503_v58 }
 0x222   :  { %v12525_v2 = vpop.f32.mrb[18].mxu0  ;;  %1095 = vmatprep.mubr.f32.mxu0 %v12519_v0 }
 0x223   :  { %v12528_v3 = vpop.f32.mrb[19].mxu0 }
 0x225   :  { %1096 = vmatmul.mubr.f32.gmra.mrb[80].mxu0 %v12521_v1 }
 0x226   :  { %v12531_v23 = vpop.f32.mrb[20].mxu0  ;;  %1100 = vmatprep.mubr.f32.mxu0 %v12528_v3 }
 0x227   :  { %v12534_v4 = vpop.f32.mrb[21].mxu0 }
 0x229   :  { %1101 = vmatmul.mubr.f32.gmra.mrb[82].mxu0 %v12519_v0 }
 0x22a   :  { %v12537_v32 = vpop.f32.mrb[22].mxu0  ;;  %1105 = vmatprep.mubr.f32.mxu0 %v12525_v2 }
 0x22b   :  { %v12540_v5 = vpop.f32.mrb[23].mxu0 }
 0x22d   :  { %1106 = vmatmul.mubr.f32.gmra.mrb[84].mxu0 %v12528_v3 }
 0x22e   :  { %1110 = vmatprep.mubr.f32.mxu0 %v12534_v4  ;;  %v12544_v6 = vpop.f32.mrb[24].mxu0 }
 0x22f   :  { %v12546_v8 = vpop.f32.mrb[25].mxu0 }
 0x231   :  { %1111 = vmatmul.mubr.f32.gmra.mrb[86].mxu0 %v12525_v2 }
 0x232   :  { %1115 = vmatprep.mubr.f32.mxu0 %v12531_v23  ;;  %v12550_v10 = vpop.f32.mrb[26].mxu0 }
 0x233   :  { %v12552_v11 = vpop.f32.mrb[27].mxu0 }
 0x235   :  { %1116 = vmatmul.mubr.f32.gmra.mrb[88].mxu0 %v12534_v4 }
 0x236   :  { %1120 = vmatprep.mubr.f32.mxu0 %v12540_v5  ;;  %v12556_v12 = vpop.f32.mrb[28].mxu0 }
 0x237   :  { %v12558_v13 = vpop.f32.mrb[29].mxu0 }
 0x239   :  { %1121 = vmatmul.mubr.f32.gmra.mrb[90].mxu0 %v12531_v23 }
 0x23a   :  { %1125 = vmatprep.mubr.f32.mxu0 %v12537_v32  ;;  %v12562_v14 = vpop.f32.mrb[30].mxu0 }
 0x23b   :  { %v12564_v16 = vpop.f32.mrb[31].mxu0 }
 0x23d   :  { %1126 = vmatmul.mubr.f32.gmra.mrb[92].mxu0 %v12540_v5 }
 0x23e   :  { %1130 = vmatprep.mubr.f32.mxu0 %v12546_v8  ;;  %v12568_v18 = vpop.f32.mrb[32].mxu0 }
 0x23f   :  { %v12570_v19 = vpop.f32.mrb[33].mxu0 }
 0x241   :  { %1131 = vmatmul.mubr.f32.gmra.mrb[94].mxu0 %v12537_v32 }
 0x242   :  { %1135 = vmatprep.mubr.f32.mxu0 %v12544_v6  ;;  %v12574_v20 = vpop.f32.mrb[34].mxu0 }
 0x243   :  { %v12576_v21 = vpop.f32.mrb[35].mxu0 }
 0x245   :  { %1136 = vmatmul.mubr.f32.gmra.mrb[96].mxu0 %v12546_v8 }
 0x246   :  { %1140 = vmatprep.mubr.f32.mxu0 %v12552_v11  ;;  %v12580_v24 = vpop.f32.mrb[36].mxu0 }
 0x247   :  { %v12582_v27 = vpop.f32.mrb[37].mxu0 }
 0x249   :  { %1141 = vmatmul.mubr.f32.gmra.mrb[98].mxu0 %v12544_v6 }
 0x24a   :  { %1145 = vmatprep.mubr.f32.mxu0 %v12550_v10  ;;  %v12586_v29 = vpop.f32.mrb[38].mxu0 }
 0x24b   :  { %v12588_v30 = vpop.f32.mrb[39].mxu0 }
 0x24d   :  { %1146 = vmatmul.mubr.f32.gmra.mrb[100].mxu0 %v12552_v11 }
 0x24e   :  { %1150 = vmatprep.mubr.f32.mxu0 %v12558_v13  ;;  %v12592_v25 = vpop.f32.mrb[40].mxu0 }
 0x24f   :  { %v12594_v31 = vpop.f32.mrb[41].mxu0 }
 0x251   :  { %1151 = vmatmul.mubr.f32.gmra.mrb[102].mxu0 %v12550_v10 }
 0x252   :  { %v12597_v33 = vpop.f32.mrb[42].mxu0  ;;  %1155 = vmatprep.mubr.f32.mxu0 %v12556_v12 }
 0x253   :  { %v12600_v35 = vpop.f32.mrb[43].mxu0 }
 0x255   :  { %1156 = vmatmul.mubr.f32.gmra.mrb[104].mxu0 %v12558_v13 }
 0x256   :  { %v12603_v37 = vpop.f32.mrb[44].mxu0  ;;  %1160 = vmatprep.mubr.f32.mxu0 %v12564_v16 }
 0x257   :  { %v12606_v38 = vpop.f32.mrb[45].mxu0 }
 0x259   :  { %1161 = vmatmul.mubr.f32.gmra.mrb[106].mxu0 %v12556_v12 }
 0x25a   :  { %v12609_v39 = vpop.f32.mrb[46].mxu0  ;;  %1165 = vmatprep.mubr.f32.mxu0 %v12562_v14 }
 0x25b   :  { %v12612_v40 = vpop.f32.mrb[47].mxu0 }
 0x25d   :  { %1166 = vmatmul.mubr.f32.gmra.mrb[108].mxu0 %v12564_v16 }
 0x25e   :  { %1170 = vmatprep.mubr.f32.mxu0 %v12570_v19 }
 0x261   :  { %1171 = vmatmul.mubr.f32.gmra.mrb[110].mxu0 %v12562_v14 }
 0x262   :  { %1175 = vmatprep.mubr.f32.mxu0 %v12568_v18 }
 0x265   :  { %1176 = vmatmul.mubr.f32.gmra.mrb[112].mxu0 %v12570_v19 }
 0x266   :  { %1180 = vmatprep.mubr.f32.mxu0 %v12576_v21 }
 0x269   :  { %1181 = vmatmul.mubr.f32.gmra.mrb[114].mxu0 %v12568_v18 }
 0x26a   :  { %1185 = vmatprep.mubr.f32.mxu0 %v12574_v20 }
 0x26d   :  { %1186 = vmatmul.mubr.f32.gmra.mrb[116].mxu0 %v12576_v21 }
 0x26e   :  { %1190 = vmatprep.mubr.f32.mxu0 %v12582_v27 }
 0x271   :  { %1191 = vmatmul.mubr.f32.gmra.mrb[118].mxu0 %v12574_v20 }
 0x272   :  { %1195 = vmatprep.mubr.f32.mxu0 %v12580_v24 }
 0x275   :  { %1196 = vmatmul.mubr.f32.gmra.mrb[120].mxu0 %v12582_v27 }
 0x276   :  { %1200 = vmatprep.mubr.f32.mxu0 %v12588_v30 }
 0x279   :  { %1201 = vmatmul.mubr.f32.gmra.mrb[122].mxu0 %v12580_v24 }
 0x27a   :  { %1205 = vmatprep.mubr.f32.mxu0 %v12586_v29 }
 0x27d   :  { %1206 = vmatmul.mubr.f32.gmra.mrb[124].mxu0 %v12588_v30 }
 0x27e   :  { %1210 = vmatprep.mubr.f32.mxu0 %v12594_v31 }
 0x281   :  { %1211 = vmatmul.mubr.f32.gmra.mrb[126].mxu0 %v12586_v29 }
 0x282   :  { %1215 = vmatprep.mubr.f32.mxu0 %v12592_v25 }
 0x285   :  { %1216 = vmatmul.mubr.f32.gmra.mrb[128].mxu0 %v12594_v31 }
 0x286   :  { %1220 = vmatprep.mubr.f32.mxu0 %v12600_v35 }
 0x289   :  { %1221 = vmatmul.mubr.f32.gmra.mrb[130].mxu0 %v12592_v25 }
 0x28a   :  { %1225 = vmatprep.mubr.f32.mxu0 %v12597_v33 }
 0x28d   :  { %1226 = vmatmul.mubr.f32.gmra.mrb[132].mxu0 %v12600_v35 }
 0x28e   :  { %1230 = vmatprep.mubr.f32.mxu0 %v12606_v38 }
 0x291   :  { %1231 = vmatmul.mubr.f32.gmra.mrb[134].mxu0 %v12597_v33 }
 0x292   :  { %1235 = vmatprep.mubr.f32.mxu0 %v12603_v37 }
 0x295   :  { %1236 = vmatmul.mubr.f32.gmra.mrb[136].mxu0 %v12606_v38 }
 0x296   :  { %1305 = vmatprep.mubr.f32.mxu0 %v12372_v7 }
 0x299   :  { %1306 = vmatmul.mubr.f32.vlgmr.msra.gmra.mrb[48].mxu0 %v12374_v9  ;;  %v1579_v9 = vld [vmem:[%s15232_s4 + $0x18] sm:$0xff] }
 0x29a   :  { %1310 = vmatprep.mubr.f32.mxu0 %v12395_v17  ;;  %10591 = vmatpush3.bf16.msra.mxu0 %v10588_v45 }
 0x29d   :  { %1311 = vmatmul.mubr.f32.gmra.mrb[50].mxu0 %v12372_v7  ;;  %v1578_v7 = vld [vmem:[%s15232_s4 + $0x10] sm:$0xff] }
 0x29e   :  { %1315 = vmatprep.mubr.f32.mxu0 %v12393_v15 }
 0x2a1   :  { %1316 = vmatmul.mubr.f32.gmra.mrb[52].mxu0 %v12395_v17  ;;  %v7233_v17 = vld [vmem:[%s15232_s4 + $0x20] sm:$0xff] }
 0x2a2   :  { %1320 = vmatprep.mubr.f32.mxu0 %v12417_v28 }
 0x2a5   :  { %1321 = vmatmul.mubr.f32.gmra.mrb[54].mxu0 %v12393_v15  ;;  %v10592_v15 = vpack.c.bf16 %v1579_v9, %v1578_v7 }
 0x2a6   :  { %1325 = vmatprep.mubr.f32.mxu0 %v12415_v26 }
 0x2a7   :  { %10593 = vmatprep.subr.bf16.mxu0 %v10592_v15 }
 0x2a8   :  { %10595 = vmatpush3.bf16.msra.mxu0 %v10592_v15 }
 0x2a9   :  { %1326 = vmatmul.mubr.f32.gmra.mrb[56].mxu0 %v12417_v28 }
 0x2aa   :  { %1330 = vmatprep.mubr.f32.mxu0 %v12439_v36 }
 0x2ad   :  { %1331 = vmatmul.mubr.f32.gmra.mrb[58].mxu0 %v12415_v26  ;;  %v7234_v26 = vld [vmem:[%s15232_s4 + $0x28] sm:$0xff] }
 0x2ae   :  { %1335 = vmatprep.mubr.f32.mxu0 %v12437_v34  ;;  %v10596_v28 = vpack.c.bf16 %v7234_v26, %v7233_v17 }
 0x2b0   :  { %10597 = vmatprep.subr.bf16.mxu0 %v10596_v28 }
 0x2b1   :  { %1336 = vmatmul.mubr.f32.gmra.mrb[60].mxu0 %v12439_v36 }
 0x2b2   :  { %1340 = vmatprep.mubr.f32.mxu0 %v12461_v42 }
 0x2b5   :  { %1341 = vmatmul.mubr.f32.gmra.mrb[62].mxu0 %v12437_v34  ;;  %v12754_v34 = vld [vmem:[%s15231_s3] ss:$0 sm:$0xff] }
 0x2b6   :  { %1345 = vmatprep.mubr.f32.mxu0 %v12459_v43 }
 0x2b9   :  { %1346 = vmatmul.mubr.f32.gmra.mrb[64].mxu0 %v12461_v42 }
 0x2ba   :  { %1350 = vmatprep.mubr.f32.mxu0 %v12483_v52 }
 0x2bd   :  { %1351 = vmatmul.mubr.f32.gmra.mrb[66].mxu0 %v12459_v43 }
 0x2be   :  { %1355 = vmatprep.mubr.f32.mxu0 %v12481_v50 }
 0x2c1   :  { %1356 = vmatmul.mubr.f32.gmra.mrb[68].mxu0 %v12483_v52 }
 0x2c2   :  { %1360 = vmatprep.mubr.f32.mxu0 %v12505_v60 }
 0x2c5   :  { %1361 = vmatmul.mubr.f32.gmra.mrb[70].mxu0 %v12481_v50 }
 0x2c6   :  { %1365 = vmatprep.mubr.f32.mxu0 %v12503_v58 }
 0x2c9   :  { %1366 = vmatmul.mubr.f32.gmra.mrb[72].mxu0 %v12505_v60 }
 0x2ca   :  { %1370 = vmatprep.mubr.f32.mxu0 %v12521_v1 }
 0x2cd   :  { %1371 = vmatmul.mubr.f32.gmra.mrb[74].mxu0 %v12503_v58 }
 0x2ce   :  { %1375 = vmatprep.mubr.f32.mxu0 %v12519_v0 }
 0x2d1   :  { %1376 = vmatmul.mubr.f32.gmra.mrb[76].mxu0 %v12521_v1 }
 0x2d2   :  { %1380 = vmatprep.mubr.f32.mxu0 %v12528_v3 }
 0x2d5   :  { %1381 = vmatmul.mubr.f32.gmra.mrb[78].mxu0 %v12519_v0 }
 0x2d6   :  { %1385 = vmatprep.mubr.f32.mxu0 %v12525_v2 }
 0x2d9   :  { %1386 = vmatmul.mubr.f32.gmra.mrb[80].mxu0 %v12528_v3 }
 0x2da   :  { %1390 = vmatprep.mubr.f32.mxu0 %v12534_v4 }
 0x2dd   :  { %1391 = vmatmul.mubr.f32.gmra.mrb[82].mxu0 %v12525_v2 }
 0x2de   :  { %1395 = vmatprep.mubr.f32.mxu0 %v12531_v23 }
 0x2e1   :  { %1396 = vmatmul.mubr.f32.gmra.mrb[84].mxu0 %v12534_v4 }
 0x2e2   :  { %1400 = vmatprep.mubr.f32.mxu0 %v12540_v5 }
 0x2e5   :  { %1401 = vmatmul.mubr.f32.gmra.mrb[86].mxu0 %v12531_v23 }
 0x2e6   :  { %1405 = vmatprep.mubr.f32.mxu0 %v12537_v32 }
 0x2e9   :  { %1406 = vmatmul.mubr.f32.gmra.mrb[88].mxu0 %v12540_v5 }
 0x2ea   :  { %1410 = vmatprep.mubr.f32.mxu0 %v12546_v8 }
 0x2ed   :  { %1411 = vmatmul.mubr.f32.gmra.mrb[90].mxu0 %v12537_v32 }
 0x2ee   :  { %1415 = vmatprep.mubr.f32.mxu0 %v12544_v6 }
 0x2f1   :  { %1416 = vmatmul.mubr.f32.gmra.mrb[92].mxu0 %v12546_v8 }
 0x2f2   :  { %1420 = vmatprep.mubr.f32.mxu0 %v12552_v11 }
 0x2f5   :  { %1421 = vmatmul.mubr.f32.gmra.mrb[94].mxu0 %v12544_v6 }
 0x2f6   :  { %1425 = vmatprep.mubr.f32.mxu0 %v12550_v10 }
 0x2f9   :  { %1426 = vmatmul.mubr.f32.gmra.mrb[96].mxu0 %v12552_v11 }
 0x2fa   :  { %1430 = vmatprep.mubr.f32.mxu0 %v12558_v13 }
 0x2fd   :  { %1431 = vmatmul.mubr.f32.gmra.mrb[98].mxu0 %v12550_v10 }
 0x2fe   :  { %1435 = vmatprep.mubr.f32.mxu0 %v12556_v12 }
 0x301   :  { %1436 = vmatmul.mubr.f32.gmra.mrb[100].mxu0 %v12558_v13 }
 0x302   :  { %1440 = vmatprep.mubr.f32.mxu0 %v12564_v16 }
 0x305   :  { %1441 = vmatmul.mubr.f32.gmra.mrb[102].mxu0 %v12556_v12 }
 0x306   :  { %1445 = vmatprep.mubr.f32.mxu0 %v12562_v14 }
 0x309   :  { %1446 = vmatmul.mubr.f32.gmra.mrb[104].mxu0 %v12564_v16  ;;  %v7276_v16 = vld [vmem:[%s15232_s4 + $0x48] sm:$0xff] }
 0x30a   :  { %1450 = vmatprep.mubr.f32.mxu0 %v12570_v19 }
 0x30d   :  { %1451 = vmatmul.mubr.f32.gmra.mrb[106].mxu0 %v12562_v14  ;;  %v7275_v14 = vld [vmem:[%s15232_s4 + $0x40] sm:$0xff] }
 0x30e   :  { %1455 = vmatprep.mubr.f32.mxu0 %v12568_v18 }
 0x311   :  { %1456 = vmatmul.mubr.f32.gmra.mrb[108].mxu0 %v12570_v19  ;;  %v12805_v19 = vpack.c.bf16 %v7276_v16, %v7275_v14 }
 0x312   :  { %1460 = vmatprep.mubr.f32.mxu0 %v12576_v21 }
 0x315   :  { %1461 = vmatmul.mubr.f32.gmra.mrb[110].mxu0 %v12568_v18 }
 0x316   :  { %1465 = vmatprep.mubr.f32.mxu0 %v12574_v20 }
 0x319   :  { %1466 = vmatmul.mubr.f32.gmra.mrb[112].mxu0 %v12576_v21 }
 0x31a   :  { %1470 = vmatprep.mubr.f32.mxu0 %v12582_v27 }
 0x31d   :  { %1471 = vmatmul.mubr.f32.gmra.mrb[114].mxu0 %v12574_v20 }
 0x31e   :  { %1475 = vmatprep.mubr.f32.mxu0 %v12580_v24 }
 0x321   :  { %1476 = vmatmul.mubr.f32.gmra.mrb[116].mxu0 %v12582_v27 }
 0x322   :  { %1480 = vmatprep.mubr.f32.mxu0 %v12588_v30 }
 0x325   :  { %1481 = vmatmul.mubr.f32.gmra.mrb[118].mxu0 %v12580_v24 }
 0x326   :  { %1485 = vmatprep.mubr.f32.mxu0 %v12586_v29 }
 0x329   :  { %1486 = vmatmul.mubr.f32.gmra.mrb[120].mxu0 %v12588_v30 }
 0x32a   :  { %1490 = vmatprep.mubr.f32.mxu0 %v12594_v31 }
 0x32d   :  { %1491 = vmatmul.mubr.f32.gmra.mrb[122].mxu0 %v12586_v29 }
 0x32e   :  { %1495 = vmatprep.mubr.f32.mxu0 %v12592_v25 }
 0x331   :  { %1496 = vmatmul.mubr.f32.gmra.mrb[124].mxu0 %v12594_v31 }
 0x332   :  { %1500 = vmatprep.mubr.f32.mxu0 %v12600_v35 }
 0x335   :  { %1501 = vmatmul.mubr.f32.gmra.mrb[126].mxu0 %v12592_v25 }
 0x336   :  { %1505 = vmatprep.mubr.f32.mxu0 %v12597_v33 }
 0x339   :  { %1506 = vmatmul.mubr.f32.gmra.mrb[128].mxu0 %v12600_v35 }
 0x33a   :  { %1510 = vmatprep.mubr.f32.mxu0 %v12606_v38 }
 0x33d   :  { %1511 = vmatmul.mubr.f32.gmra.mrb[130].mxu0 %v12597_v33 }
 0x33e   :  { %1515 = vmatprep.mubr.f32.mxu0 %v12603_v37 }
 0x341   :  { %1516 = vmatmul.mubr.f32.gmra.mrb[132].mxu0 %v12606_v38 }
 0x342   :  { %1520 = vmatprep.mubr.f32.mxu0 %v12612_v40 }
 0x345   :  { %1521 = vmatmul.mubr.f32.gmra.mrb[134].mxu0 %v12603_v37 }
 0x346   :  { %1525 = vmatprep.mubr.f32.mxu0 %v12609_v39 }
 0x349   :  { %1526 = vmatmul.mubr.f32.gmra.mrb[136].mxu0 %v12612_v40 }
 0x36c   :  { %v1307_v36 = vpop.f32.mrb[48].mxu0 }
 0x36d   :  { %v10796_v43 = vadd.f32 %v12754_v34, %v1307_v36  ;;  %v1309_v42 = vpop.f32.mrb[49].mxu0 }
 0x36f   :  { %v1531_v46 = vmax.f32 %v10796_v43, 0.0 }
 0x370   :  { %v1312_v47 = vpop.f32.mrb[50].mxu0 }
 0x371   :  { %v12764_v50 = vadd.f32 %v12754_v34, %v1312_v47  ;;  %v1314_v51 = vpop.f32.mrb[51].mxu0  ;;  %8784 = vmatprep.mubr.msk.f32.mxu0 %vm1587_vm0, %v1531_v46 }
 0x373   :  { %v1532_v52 = vmax.f32 %v12764_v50, 0.0 }
 0x374   :  { %v1317_v54 = vpop.f32.mrb[52].mxu0 }
 0x375   :  { %v10798_v55 = vadd.f32 %v12754_v34, %v1317_v54  ;;  %v1319_v56 = vpop.f32.mrb[53].mxu0  ;;  %8785 = vmatmul.mubr.msk.f32.vlgmr.msra.gmra.mrb[138].mxu0 %vm1587_vm0, %v1532_v52 }
 0x376   :  { %10599 = vmatpush3.bf16.msra.mxu0 %v10596_v28 }
 0x377   :  { %v12772_v57 = vmax.f32 %v10798_v55, 0.0  ;;  %10601 = vmatprep.subr.bf16.mxu0 %v10600_v53 }
 0x378   :  { %v1322_v58 = vpop.f32.mrb[54].mxu0 }
 0x379   :  { %v10799_v59 = vadd.f32 %v12754_v34, %v1322_v58  ;;  %v1324_v60 = vpop.f32.mrb[55].mxu0  ;;  %8787 = vmatprep.mubr.msk.f32.mxu0 %vm1587_vm0, %v12772_v57 }
 0x37a   :  { %10603 = vmatpush3.bf16.msra.mxu0 %v10600_v53 }
 0x37b   :  { %v12777_v61 = vmax.f32 %v10799_v59, 0.0  ;;  %10605 = vmatprep.subr.bf16.mxu0 %v12805_v19 }
 0x37c   :  { %v1327_v62 = vpop.f32.mrb[56].mxu0 }
 0x37d   :  { %v10800_v63 = vadd.f32 %v12754_v34, %v1327_v62  ;;  %v1329_v0 = vpop.f32.mrb[57].mxu0  ;;  %8788 = vmatmul.mubr.msk.f32.gmra.mrb[140].mxu0 %vm1587_vm0, %v12777_v61 }
 0x37f   :  { %v12782_v1 = vmax.f32 %v10800_v63, 0.0 }
 0x380   :  { %v1332_v2 = vpop.f32.mrb[58].mxu0 }
 0x381   :  { %v10801_v3 = vadd.f32 %v12754_v34, %v1332_v2  ;;  %v1334_v23 = vpop.f32.mrb[59].mxu0  ;;  %8790 = vmatprep.mubr.msk.f32.mxu0 %vm1587_vm0, %v12782_v1 }
 0x383   :  { %v12787_v4 = vmax.f32 %v10801_v3, 0.0 }
 0x384   :  { %v1337_v32 = vpop.f32.mrb[60].mxu0 }
 0x385   :  { %v10802_v5 = vadd.f32 %v12754_v34, %v1337_v32  ;;  %v1339_v6 = vpop.f32.mrb[61].mxu0  ;;  %8791 = vmatmul.mubr.msk.f32.gmra.mrb[142].mxu0 %vm1587_vm0, %v12787_v4 }
 0x387   :  { %v12792_v8 = vmax.f32 %v10802_v5, 0.0 }
 0x388   :  { %v1342_v10 = vpop.f32.mrb[62].mxu0 }
 0x389   :  { %v10803_v11 = vadd.f32 %v12754_v34, %v1342_v10  ;;  %v1344_v12 = vpop.f32.mrb[63].mxu0  ;;  %8793 = vmatprep.mubr.msk.f32.mxu0 %vm1587_vm0, %v12792_v8 }
 0x38b   :  { %v12797_v13 = vmax.f32 %v10803_v11, 0.0 }
 0x38c   :  { %v1347_v18 = vpop.f32.mrb[64].mxu0 }
 0x38d   :  { %v10804_v20 = vadd.f32 %v12754_v34, %v1347_v18  ;;  %v1349_v21 = vpop.f32.mrb[65].mxu0  ;;  %8794 = vmatmul.mubr.msk.f32.gmra.mrb[144].mxu0 %vm1587_vm0, %v12797_v13 }
 0x38f   :  { %v12811_v24 = vmax.f32 %v10804_v20, 0.0 }
 0x390   :  { %v1352_v27 = vpop.f32.mrb[66].mxu0 }
 0x391   :  { %v10805_v29 = vadd.f32 %v12754_v34, %v1352_v27  ;;  %v1354_v30 = vpop.f32.mrb[67].mxu0  ;;  %8796 = vmatprep.mubr.msk.f32.mxu0 %vm1587_vm0, %v12811_v24 }
 0x393   :  { %v12816_v25 = vmax.f32 %v10805_v29, 0.0 }
 0x394   :  { %v1357_v31 = vpop.f32.mrb[68].mxu0 }
 0x395   :  { %v10806_v33 = vadd.f32 %v12754_v34, %v1357_v31  ;;  %v1359_v35 = vpop.f32.mrb[69].mxu0  ;;  %8797 = vmatmul.mubr.msk.f32.gmra.mrb[146].mxu0 %vm1587_vm0, %v12816_v25 }
 0x397   :  { %v12821_v37 = vmax.f32 %v10806_v33, 0.0 }
 0x398   :  { %v1362_v38 = vpop.f32.mrb[70].mxu0 }
 0x399   :  { %v10807_v39 = vadd.f32 %v12754_v34, %v1362_v38  ;;  %v1364_v40 = vpop.f32.mrb[71].mxu0  ;;  %8799 = vmatprep.mubr.msk.f32.mxu0 %vm1587_vm0, %v12821_v37 }
 0x39b   :  { %v12826_v41 = vmax.f32 %v10807_v39, 0.0 }
 0x39c   :  { %v1367_v44 = vpop.f32.mrb[72].mxu0 }
 0x39d   :  { %v10808_v45 = vadd.f32 %v12754_v34, %v1367_v44  ;;  %v1369_v7 = vpop.f32.mrb[73].mxu0  ;;  %8800 = vmatmul.mubr.msk.f32.gmra.mrb[148].mxu0 %vm1587_vm0, %v12826_v41 }
 0x39f   :  { %v12831_v9 = vmax.f32 %v10808_v45, 0.0 }
 0x3a0   :  { %v1372_v15 = vpop.f32.mrb[74].mxu0 }
 0x3a1   :  { %v10809_v17 = vadd.f32 %v12754_v34, %v1372_v15  ;;  %v1374_v26 = vpop.f32.mrb[75].mxu0  ;;  %8802 = vmatprep.mubr.msk.f32.mxu0 %vm1587_vm0, %v12831_v9 }
 0x3a3   :  { %v12836_v28 = vmax.f32 %v10809_v17, 0.0 }
 0x3a4   :  { %v1377_v36 = vpop.f32.mrb[76].mxu0 }
 0x3a5   :  { %v10810_v43 = vadd.f32 %v12754_v34, %v1377_v36  ;;  %v1379_v42 = vpop.f32.mrb[77].mxu0  ;;  %8803 = vmatmul.mubr.msk.f32.gmra.mrb[150].mxu0 %vm1587_vm0, %v12836_v28 }
 0x3a7   :  { %v12841_v46 = vmax.f32 %v10810_v43, 0.0 }
 0x3a8   :  { %v1382_v47 = vpop.f32.mrb[78].mxu0 }
 0x3a9   :  { %v10811_v48 = vadd.f32 %v12754_v34, %v1382_v47  ;;  %v1384_v49 = vpop.f32.mrb[79].mxu0  ;;  %8805 = vmatprep.mubr.msk.f32.mxu0 %vm1587_vm0, %v12841_v46 }
 0x3ab   :  { %v12846_v51 = vmax.f32 %v10811_v48, 0.0 }
 0x3ac   :  { %v1387_v53 = vpop.f32.mrb[80].mxu0 }
 0x3ad   :  { %v10812_v54 = vadd.f32 %v12754_v34, %v1387_v53  ;;  %v1389_v55 = vpop.f32.mrb[81].mxu0  ;;  %8806 = vmatmul.mubr.msk.f32.gmra.mrb[152].mxu0 %vm1587_vm0, %v12846_v51 }
 0x3af   :  { %v12851_v56 = vmax.f32 %v10812_v54, 0.0 }
 0x3b0   :  { %v1392_v58 = vpop.f32.mrb[82].mxu0 }
 0x3b1   :  { %v10813_v59 = vadd.f32 %v12754_v34, %v1392_v58  ;;  %v1394_v60 = vpop.f32.mrb[83].mxu0  ;;  %8808 = vmatprep.mubr.msk.f32.mxu0 %vm1587_vm0, %v12851_v56 }
 0x3b3   :  { %v12856_v62 = vmax.f32 %v10813_v59, 0.0 }
 0x3b4   :  { %v1397_v63 = vpop.f32.mrb[84].mxu0 }
 0x3b5   :  { %v10814_v0 = vadd.f32 %v12754_v34, %v1397_v63  ;;  %v1399_v2 = vpop.f32.mrb[85].mxu0  ;;  %8809 = vmatmul.mubr.msk.f32.gmra.mrb[154].mxu0 %vm1587_vm0, %v12856_v62 }
 0x3b7   :  { %v12861_v3 = vmax.f32 %v10814_v0, 0.0 }
 0x3b8   :  { %v1402_v23 = vpop.f32.mrb[86].mxu0 }
 0x3b9   :  { %v10815_v32 = vadd.f32 %v12754_v34, %v1402_v23  ;;  %v1404_v5 = vpop.f32.mrb[87].mxu0  ;;  %8811 = vmatprep.mubr.msk.f32.mxu0 %vm1587_vm0, %v12861_v3 }
 0x3bb   :  { %v12866_v6 = vmax.f32 %v10815_v32, 0.0 }
 0x3bc   :  { %v1407_v10 = vpop.f32.mrb[88].mxu0 }
 0x3bd   :  { %v10816_v11 = vadd.f32 %v12754_v34, %v1407_v10  ;;  %v1409_v12 = vpop.f32.mrb[89].mxu0  ;;  %8812 = vmatmul.mubr.msk.f32.gmra.mrb[156].mxu0 %vm1587_vm0, %v12866_v6 }
 0x3bf   :  { %v12871_v14 = vmax.f32 %v10816_v11, 0.0 }
 0x3c0   :  { %v1412_v16 = vpop.f32.mrb[90].mxu0 }
 0x3c1   :  { %v10817_v18 = vadd.f32 %v12754_v34, %v1412_v16  ;;  %v1414_v20 = vpop.f32.mrb[91].mxu0  ;;  %8814 = vmatprep.mubr.msk.f32.mxu0 %vm1587_vm0, %v12871_v14 }
 0x3c3   :  { %v12876_v21 = vmax.f32 %v10817_v18, 0.0 }
 0x3c4   :  { %v1417_v27 = vpop.f32.mrb[92].mxu0 }
 0x3c5   :  { %v10818_v29 = vadd.f32 %v12754_v34, %v1417_v27  ;;  %v1419_v30 = vpop.f32.mrb[93].mxu0  ;;  %8815 = vmatmul.mubr.msk.f32.gmra.mrb[158].mxu0 %vm1587_vm0, %v12876_v21 }
 0x3c7   :  { %v12881_v31 = vmax.f32 %v10818_v29, 0.0 }
 0x3c8   :  { %v1422_v33 = vpop.f32.mrb[94].mxu0 }
 0x3c9   :  { %v10819_v35 = vadd.f32 %v12754_v34, %v1422_v33  ;;  %v1424_v38 = vpop.f32.mrb[95].mxu0  ;;  %8817 = vmatprep.mubr.msk.f32.mxu0 %vm1587_vm0, %v12881_v31 }
 0x3cb   :  { %v12886_v39 = vmax.f32 %v10819_v35, 0.0 }
 0x3cc   :  { %v1427_v40 = vpop.f32.mrb[96].mxu0 }
 0x3cd   :  { %v10820_v44 = vadd.f32 %v12754_v34, %v1427_v40  ;;  %v1429_v45 = vpop.f32.mrb[97].mxu0  ;;  %8818 = vmatmul.mubr.msk.f32.gmra.mrb[160].mxu0 %vm1587_vm0, %v12886_v39 }
 0x3cf   :  { %v12891_v7 = vmax.f32 %v10820_v44, 0.0 }
 0x3d0   :  { %v1432_v15 = vpop.f32.mrb[98].mxu0 }
 0x3d1   :  { %v10821_v17 = vadd.f32 %v12754_v34, %v1432_v15  ;;  %v1434_v26 = vpop.f32.mrb[99].mxu0  ;;  %8820 = vmatprep.mubr.msk.f32.mxu0 %vm1587_vm0, %v12891_v7 }
 0x3d3   :  { %v12896_v36 = vmax.f32 %v10821_v17, 0.0 }
 0x3d4   :  { %v1437_v43 = vpop.f32.mrb[100].mxu0 }
 0x3d5   :  { %v10822_v42 = vadd.f32 %v12754_v34, %v1437_v43  ;;  %v1439_v47 = vpop.f32.mrb[101].mxu0  ;;  %8821 = vmatmul.mubr.msk.f32.gmra.mrb[162].mxu0 %vm1587_vm0, %v12896_v36 }
 0x3d7   :  { %v12901_v48 = vmax.f32 %v10822_v42, 0.0 }
 0x3d8   :  { %v1442_v49 = vpop.f32.mrb[102].mxu0 }
 0x3d9   :  { %v10823_v53 = vadd.f32 %v12754_v34, %v1442_v49  ;;  %v1444_v54 = vpop.f32.mrb[103].mxu0  ;;  %8823 = vmatprep.mubr.msk.f32.mxu0 %vm1587_vm0, %v12901_v48 }
 0x3db   :  { %v12906_v55 = vmax.f32 %v10823_v53, 0.0 }
 0x3dc   :  { %v1447_v58 = vpop.f32.mrb[104].mxu0 }
 0x3dd   :  { %v10824_v59 = vadd.f32 %v12754_v34, %v1447_v58  ;;  %v1449_v60 = vpop.f32.mrb[105].mxu0  ;;  %8824 = vmatmul.mubr.msk.f32.gmra.mrb[164].mxu0 %vm1587_vm0, %v12906_v55 }
 0x3df   :  { %v12911_v63 = vmax.f32 %v10824_v59, 0.0 }
 0x3e0   :  { %v1452_v0 = vpop.f32.mrb[106].mxu0 }
 0x3e1   :  { %v10825_v2 = vadd.f32 %v12754_v34, %v1452_v0  ;;  %v1454_v23 = vpop.f32.mrb[107].mxu0  ;;  %8826 = vmatprep.mubr.msk.f32.mxu0 %vm1587_vm0, %v12911_v63 }
 0x3e3   :  { %v12916_v32 = vmax.f32 %v10825_v2, 0.0 }
 0x3e4   :  { %v1457_v5 = vpop.f32.mrb[108].mxu0 }
 0x3e5   :  { %v10826_v10 = vadd.f32 %v12754_v34, %v1457_v5  ;;  %v1459_v11 = vpop.f32.mrb[109].mxu0  ;;  %8827 = vmatmul.mubr.msk.f32.gmra.mrb[166].mxu0 %vm1587_vm0, %v12916_v32 }
 0x3e6   :  { %v7277_v11 = vld [vmem:[%s15232_s4 + $0x50] sm:$0xff] }
 0x3e7   :  { %v12921_v12 = vmax.f32 %v10826_v10, 0.0 }
 0x3e8   :  { %v1462_v16 = vpop.f32.mrb[110].mxu0 }
 0x3e9   :  { %v10827_v18 = vadd.f32 %v12754_v34, %v1462_v16  ;;  %v1464_v20 = vpop.f32.mrb[111].mxu0  ;;  %8829 = vmatprep.mubr.msk.f32.mxu0 %vm1587_vm0, %v12921_v12  ;;  %v7278_v16 = vld [vmem:[%s15232_s4 + $0x58] sm:$0xff] }
 0x3ea   :  { %v10608_v20 = vpack.c.bf16 %v7278_v16, %v7277_v11 }
 0x3eb   :  { %v12926_v27 = vmax.f32 %v10827_v18, 0.0 }
 0x3ec   :  { %v1467_v29 = vpop.f32.mrb[112].mxu0 }
 0x3ed   :  { %v10828_v30 = vadd.f32 %v12754_v34, %v1467_v29  ;;  %v1469_v33 = vpop.f32.mrb[113].mxu0  ;;  %8830 = vmatmul.mubr.msk.f32.gmra.mrb[168].mxu0 %vm1587_vm0, %v12926_v27 }
 0x3ee   :  { %v7318_v33 = vld [vmem:[%s15232_s4 + $0x68] sm:$0xff] }
 0x3ef   :  { %v12931_v35 = vmax.f32 %v10828_v30, 0.0  ;;  %v7317_v30 = vld [vmem:[%s15232_s4 + $0x60] sm:$0xff] }
 0x3f0   :  { %v1472_v38 = vpop.f32.mrb[114].mxu0  ;;  %v10612_v50 = vpack.c.bf16 %v7318_v33, %v7317_v30  ;;  %v7401_v30 = vld [vmem:[%s15232_s4 + $0xa0] sm:$0xff]  ;;  %v7402_v33 = vld [vmem:[%s15232_s4 + $0xa8] sm:$0xff] }
 0x3f1   :  { %v10829_v40 = vadd.f32 %v12754_v34, %v1472_v38  ;;  %v1474_v44 = vpop.f32.mrb[115].mxu0  ;;  %8832 = vmatprep.mubr.msk.f32.mxu0 %vm1587_vm0, %v12931_v35 }
 0x3f3   :  { %v12936_v45 = vmax.f32 %v10829_v40, 0.0 }
 0x3f4   :  { %v1477_v15 = vpop.f32.mrb[116].mxu0 }
 0x3f5   :  { %v10830_v17 = vadd.f32 %v12754_v34, %v1477_v15  ;;  %v1479_v26 = vpop.f32.mrb[117].mxu0  ;;  %8833 = vmatmul.mubr.msk.f32.gmra.mrb[170].mxu0 %vm1587_vm0, %v12936_v45 }
 0x3f7   :  { %v12941_v43 = vmax.f32 %v10830_v17, 0.0 }
 0x3f8   :  { %v1482_v42 = vpop.f32.mrb[118].mxu0 }
 0x3f9   :  { %v10831_v47 = vadd.f32 %v12754_v34, %v1482_v42  ;;  %v1484_v49 = vpop.f32.mrb[119].mxu0  ;;  %8835 = vmatprep.mubr.msk.f32.mxu0 %vm1587_vm0, %v12941_v43 }
 0x3fb   :  { %v12946_v53 = vmax.f32 %v10831_v47, 0.0 }
 0x3fc   :  { %v1487_v54 = vpop.f32.mrb[120].mxu0 }
 0x3fd   :  { %v10832_v58 = vadd.f32 %v12754_v34, %v1487_v54  ;;  %v1489_v59 = vpop.f32.mrb[121].mxu0  ;;  %8836 = vmatmul.mubr.msk.f32.gmra.mrb[172].mxu0 %vm1587_vm0, %v12946_v53 }
 0x3fe   :  { %v7319_v59 = vld [vmem:[%s15232_s4 + $0x70] sm:$0xff] }
 0x3ff   :  { %v12951_v60 = vmax.f32 %v10832_v58, 0.0 }
 0x400   :  { %v1492_v0 = vpop.f32.mrb[122].mxu0 }
 0x401   :  { %v10833_v2 = vadd.f32 %v12754_v34, %v1492_v0  ;;  %v1494_v23 = vpop.f32.mrb[123].mxu0  ;;  %8838 = vmatprep.mubr.msk.f32.mxu0 %vm1587_vm0, %v12951_v60  ;;  %v7320_v0 = vld [vmem:[%s15232_s4 + $0x78] sm:$0xff] }
 0x402   :  { %v7359_v23 = vld [vmem:[%s15232_s4 + $0x80] sm:$0xff] }
 0x403   :  { %v12956_v5 = vmax.f32 %v10833_v2, 0.0  ;;  %v10616_v2 = vpack.c.bf16 %v7320_v0, %v7319_v59  ;;  %v7445_v59 = vld [vmem:[%s15232_s4 + $0xd0] sm:$0xff]  ;;  %v7446_v0 = vld [vmem:[%s15232_s4 + $0xd8] sm:$0xff] }
 0x404   :  { %v1497_v10 = vpop.f32.mrb[124].mxu0 }
 0x405   :  { %v1499_v18 = vpop.f32.mrb[125].mxu0  ;;  %8839 = vmatmul.mubr.msk.f32.gmra.mrb[174].mxu0 %vm1587_vm0, %v12956_v5  ;;  %v10834_v54 = vadd.f32 %v12754_v34, %v1497_v10  ;;  %v7360_v10 = vld [vmem:[%s15232_s4 + $0x88] sm:$0xff] }
 0x406   :  { %8849 = vmatprep.mubr.msk.f32.mxu0 %vm1587_vm0, %v1532_v52  ;;  %v10620_v11 = vpack.c.bf16 %v7360_v10, %v7359_v23  ;;  %v7361_v18 = vld [vmem:[%s15232_s4 + $0x90] sm:$0xff]  ;;  %v7486_v23 = vld [vmem:[%s15232_s4 + $0xe8] sm:$0xff] }
 0x407   :  { %v13061_v58 = vmax.f32 %v10834_v54, 0.0 }
 0x408   :  { %v12969_v29 = vpop.f32.mrb[126].mxu0 }
 0x409   :  { %v1504_v38 = vpop.f32.mrb[127].mxu0  ;;  %8850 = vmatmul.mubr.msk.f32.vlgmr.msra.gmra.mrb[138].mxu0 %vm1587_vm0, %v12772_v57 }
 0x40a   :  { %10607 = vmatpush3.bf16.msra.mxu0 %v12805_v19  ;;  %8852 = vmatprep.mubr.msk.f32.mxu0 %vm1587_vm0, %v12777_v61  ;;  %v10628_v38 = vpack.c.bf16 %v7402_v33, %v7401_v30  ;;  %v4403_v30 = vld [vmem:[#allocation2 + $0x58] sm:$0xff] }
 0x40b   :  { %10609 = vmatprep.subr.bf16.mxu0 %v10608_v20 }
 0x40c   :  { %v12982_v52 = vpop.f32.mrb[128].mxu0 }
 0x40d   :  { %v1509_v40 = vpop.f32.mrb[129].mxu0  ;;  %8853 = vmatmul.mubr.msk.f32.gmra.mrb[140].mxu0 %vm1587_vm0, %v12782_v1 }
 0x40e   :  { %8855 = vmatprep.mubr.msk.f32.mxu0 %vm1587_vm0, %v12787_v4  ;;  %10611 = vmatpush3.bf16.msra.mxu0 %v10608_v20  ;;  %v7362_v20 = vld [vmem:[%s15232_s4 + $0x98] sm:$0xff]  ;;  %v7403_v40 = vld [vmem:[%s15232_s4 + $0xb0] sm:$0xff] }
 0x40f   :  { %10613 = vmatprep.subr.bf16.mxu0 %v10612_v50 }
 0x410   :  { %v12988_v44 = vpop.f32.mrb[130].mxu0 }
 0x411   :  { %v1514_v15 = vpop.f32.mrb[131].mxu0  ;;  %8856 = vmatmul.mubr.msk.f32.gmra.mrb[142].mxu0 %vm1587_vm0, %v12792_v8 }
 0x412   :  { %8858 = vmatprep.mubr.msk.f32.mxu0 %vm1587_vm0, %v12797_v13  ;;  %v7404_v15 = vld [vmem:[%s15232_s4 + $0xb8] sm:$0xff] }
 0x414   :  { %v12994_v19 = vpop.f32.mrb[132].mxu0 }
 0x415   :  { %v1519_v17 = vpop.f32.mrb[133].mxu0  ;;  %8859 = vmatmul.mubr.msk.f32.gmra.mrb[144].mxu0 %vm1587_vm0, %v12811_v24 }
 0x416   :  { %8861 = vmatprep.mubr.msk.f32.mxu0 %vm1587_vm0, %v12816_v25  ;;  %v7443_v17 = vld [vmem:[%s15232_s4 + $0xc0] sm:$0xff] }
 0x418   :  { %v13000_v26 = vpop.f32.mrb[134].mxu0 }
 0x419   :  { %v1524_v42 = vpop.f32.mrb[135].mxu0  ;;  %8862 = vmatmul.mubr.msk.f32.gmra.mrb[146].mxu0 %vm1587_vm0, %v12821_v37 }
 0x41a   :  { %8864 = vmatprep.mubr.msk.f32.mxu0 %vm1587_vm0, %v12826_v41  ;;  %v7444_v42 = vld [vmem:[%s15232_s4 + $0xc8] sm:$0xff] }
 0x41c   :  { %v13006_v47 = vpop.f32.mrb[136].mxu0 }
 0x41d   :  { %v1529_v49 = vpop.f32.mrb[137].mxu0  ;;  %8865 = vmatmul.mubr.msk.f32.gmra.mrb[148].mxu0 %vm1587_vm0, %v12831_v9 }
 0x41e   :  { %8867 = vmatprep.mubr.msk.f32.mxu0 %vm1587_vm0, %v12836_v28  ;;  %v10636_v49 = vpack.c.bf16 %v7444_v42, %v7443_v17  ;;  %v4102_v42 = vld [vmem:[#allocation2] sm:$0xff] }
 0x421   :  { %8868 = vmatmul.mubr.msk.f32.gmra.mrb[150].mxu0 %vm1587_vm0, %v12841_v46 }
 0x422   :  { %8870 = vmatprep.mubr.msk.f32.mxu0 %vm1587_vm0, %v12846_v51 }
 0x425   :  { %8871 = vmatmul.mubr.msk.f32.gmra.mrb[152].mxu0 %vm1587_vm0, %v12851_v56 }
 0x426   :  { %8873 = vmatprep.mubr.msk.f32.mxu0 %vm1587_vm0, %v12856_v62 }
 0x429   :  { %8874 = vmatmul.mubr.msk.f32.gmra.mrb[154].mxu0 %vm1587_vm0, %v12861_v3 }
 0x42a   :  { %8876 = vmatprep.mubr.msk.f32.mxu0 %vm1587_vm0, %v12866_v6 }
 0x42d   :  { %8877 = vmatmul.mubr.msk.f32.gmra.mrb[156].mxu0 %vm1587_vm0, %v12871_v14 }
 0x42e   :  { %8879 = vmatprep.mubr.msk.f32.mxu0 %vm1587_vm0, %v12876_v21 }
 0x431   :  { %8880 = vmatmul.mubr.msk.f32.gmra.mrb[158].mxu0 %vm1587_vm0, %v12881_v31 }
 0x432   :  { %8882 = vmatprep.mubr.msk.f32.mxu0 %vm1587_vm0, %v12886_v39 }
 0x435   :  { %8883 = vmatmul.mubr.msk.f32.gmra.mrb[160].mxu0 %vm1587_vm0, %v12891_v7 }
 0x436   :  { %8885 = vmatprep.mubr.msk.f32.mxu0 %vm1587_vm0, %v12896_v36 }
 0x439   :  { %8886 = vmatmul.mubr.msk.f32.gmra.mrb[162].mxu0 %vm1587_vm0, %v12901_v48 }
 0x43a   :  { %8888 = vmatprep.mubr.msk.f32.mxu0 %vm1587_vm0, %v12906_v55 }
 0x43d   :  { %8889 = vmatmul.mubr.msk.f32.gmra.mrb[164].mxu0 %vm1587_vm0, %v12911_v63 }
 0x43e   :  { %8891 = vmatprep.mubr.msk.f32.mxu0 %vm1587_vm0, %v12916_v32 }
 0x441   :  { %8892 = vmatmul.mubr.msk.f32.gmra.mrb[166].mxu0 %vm1587_vm0, %v12921_v12 }
 0x442   :  { %8894 = vmatprep.mubr.msk.f32.mxu0 %vm1587_vm0, %v12926_v27 }
 0x445   :  { %8895 = vmatmul.mubr.msk.f32.gmra.mrb[168].mxu0 %vm1587_vm0, %v12931_v35 }
 0x446   :  { %8897 = vmatprep.mubr.msk.f32.mxu0 %vm1587_vm0, %v12936_v45 }
 0x449   :  { %8898 = vmatmul.mubr.msk.f32.gmra.mrb[170].mxu0 %vm1587_vm0, %v12941_v43 }
 0x44a   :  { %8900 = vmatprep.mubr.msk.f32.mxu0 %vm1587_vm0, %v12946_v53 }
 0x44d   :  { %8901 = vmatmul.mubr.msk.f32.gmra.mrb[172].mxu0 %vm1587_vm0, %v12951_v60 }
 0x44e   :  { %8903 = vmatprep.mubr.msk.f32.mxu0 %vm1587_vm0, %v12956_v5 }
 0x451   :  { %8904 = vmatmul.mubr.msk.f32.gmra.mrb[174].mxu0 %vm1587_vm0, %v13061_v58 }
 0x452   :  { %8914 = vmatprep.mubr.msk.f32.mxu0 %vm1587_vm0, %v12772_v57  ;;  %v10835_v57 = vadd.f32 %v12754_v34, %v12969_v29  ;;  %v10624_v29 = vpack.c.bf16 %v7362_v20, %v7361_v18  ;;  %v7488_v18 = vld [vmem:[%s15232_s4 + $0xf8] sm:$0xff] }
 0x454   :  { %v13153_v16 = vmax.f32 %v10835_v57, 0.0  ;;  %v7487_v57 = vld [vmem:[%s15232_s4 + $0xf0] sm:$0xff] }
 0x455   :  { %8915 = vmatmul.mubr.msk.f32.vlgmr.msra.gmra.mrb[138].mxu0 %vm1587_vm0, %v12777_v61 }
 0x456   :  { %10615 = vmatpush3.bf16.msra.mxu0 %v10612_v50  ;;  %8917 = vmatprep.mubr.msk.f32.mxu0 %vm1587_vm0, %v12782_v1 }
 0x457   :  { %10617 = vmatprep.subr.bf16.mxu0 %v10616_v2 }
 0x459   :  { %8918 = vmatmul.mubr.msk.f32.gmra.mrb[140].mxu0 %vm1587_vm0, %v12787_v4 }
 0x45a   :  { %8920 = vmatprep.mubr.msk.f32.mxu0 %vm1587_vm0, %v12792_v8  ;;  %10619 = vmatpush3.bf16.msra.mxu0 %v10616_v2  ;;  %v7485_v2 = vld [vmem:[%s15232_s4 + $0xe0] sm:$0xff] }
 0x45b   :  { %10621 = vmatprep.subr.bf16.mxu0 %v10620_v11  ;;  %v10644_v10 = vpack.c.bf16 %v7486_v23, %v7485_v2  ;;  %v4107_v2 = vld [vmem:[#allocation2 + $0x28] sm:$0xff] }
 0x45d   :  { %8921 = vmatmul.mubr.msk.f32.gmra.mrb[142].mxu0 %vm1587_vm0, %v12797_v13 }
 0x45e   :  { %8923 = vmatprep.mubr.msk.f32.mxu0 %vm1587_vm0, %v12811_v24 }
 0x461   :  { %8924 = vmatmul.mubr.msk.f32.gmra.mrb[144].mxu0 %vm1587_vm0, %v12816_v25 }
 0x462   :  { %8926 = vmatprep.mubr.msk.f32.mxu0 %vm1587_vm0, %v12821_v37 }
 0x465   :  { %8927 = vmatmul.mubr.msk.f32.gmra.mrb[146].mxu0 %vm1587_vm0, %v12826_v41 }
 0x466   :  { %8929 = vmatprep.mubr.msk.f32.mxu0 %vm1587_vm0, %v12831_v9 }
 0x469   :  { %8930 = vmatmul.mubr.msk.f32.gmra.mrb[148].mxu0 %vm1587_vm0, %v12836_v28 }
 0x46a   :  { %8932 = vmatprep.mubr.msk.f32.mxu0 %vm1587_vm0, %v12841_v46 }
 0x46d   :  { %8933 = vmatmul.mubr.msk.f32.gmra.mrb[150].mxu0 %vm1587_vm0, %v12846_v51 }
 0x46e   :  { %8935 = vmatprep.mubr.msk.f32.mxu0 %vm1587_vm0, %v12851_v56 }
 0x471   :  { %8936 = vmatmul.mubr.msk.f32.gmra.mrb[152].mxu0 %vm1587_vm0, %v12856_v62 }
 0x472   :  { %8938 = vmatprep.mubr.msk.f32.mxu0 %vm1587_vm0, %v12861_v3 }
 0x475   :  { %8939 = vmatmul.mubr.msk.f32.gmra.mrb[154].mxu0 %vm1587_vm0, %v12866_v6 }
 0x476   :  { %8941 = vmatprep.mubr.msk.f32.mxu0 %vm1587_vm0, %v12871_v14 }
 0x479   :  { %8942 = vmatmul.mubr.msk.f32.gmra.mrb[156].mxu0 %vm1587_vm0, %v12876_v21 }
 0x47a   :  { %8944 = vmatprep.mubr.msk.f32.mxu0 %vm1587_vm0, %v12881_v31 }
 0x47d   :  { %8945 = vmatmul.mubr.msk.f32.gmra.mrb[158].mxu0 %vm1587_vm0, %v12886_v39 }
 0x47e   :  { %8947 = vmatprep.mubr.msk.f32.mxu0 %vm1587_vm0, %v12891_v7 }
 0x481   :  { %8948 = vmatmul.mubr.msk.f32.gmra.mrb[160].mxu0 %vm1587_vm0, %v12896_v36 }
 0x482   :  { %8950 = vmatprep.mubr.msk.f32.mxu0 %vm1587_vm0, %v12901_v48 }
 0x485   :  { %8951 = vmatmul.mubr.msk.f32.gmra.mrb[162].mxu0 %vm1587_vm0, %v12906_v55 }
 0x486   :  { %8953 = vmatprep.mubr.msk.f32.mxu0 %vm1587_vm0, %v12911_v63 }
 0x489   :  { %8954 = vmatmul.mubr.msk.f32.gmra.mrb[164].mxu0 %vm1587_vm0, %v12916_v32 }
 0x48a   :  { %8956 = vmatprep.mubr.msk.f32.mxu0 %vm1587_vm0, %v12921_v12 }
 0x48d   :  { %8957 = vmatmul.mubr.msk.f32.gmra.mrb[166].mxu0 %vm1587_vm0, %v12926_v27 }
 0x48e   :  { %8959 = vmatprep.mubr.msk.f32.mxu0 %vm1587_vm0, %v12931_v35 }
 0x491   :  { %8960 = vmatmul.mubr.msk.f32.gmra.mrb[168].mxu0 %vm1587_vm0, %v12936_v45 }
 0x492   :  { %8962 = vmatprep.mubr.msk.f32.mxu0 %vm1587_vm0, %v12941_v43 }
 0x495   :  { %8963 = vmatmul.mubr.msk.f32.gmra.mrb[170].mxu0 %vm1587_vm0, %v12946_v53 }
 0x496   :  { %8965 = vmatprep.mubr.msk.f32.mxu0 %vm1587_vm0, %v12951_v60 }
 0x499   :  { %8966 = vmatmul.mubr.msk.f32.gmra.mrb[172].mxu0 %vm1587_vm0, %v12956_v5 }
 0x49a   :  { %8968 = vmatprep.mubr.msk.f32.mxu0 %vm1587_vm0, %v13061_v58 }
 0x49d   :  { %8969 = vmatmul.mubr.msk.f32.gmra.mrb[174].mxu0 %vm1587_vm0, %v13153_v16 }
 0x49e   :  { %8979 = vmatprep.mubr.msk.f32.mxu0 %vm1587_vm0, %v12777_v61  ;;  %v10836_v61 = vadd.f32 %v12754_v34, %v12982_v52  ;;  %v10632_v52 = vpack.c.bf16 %v7404_v15, %v7403_v40  ;;  %v11838_v15 = vld [vmem:[%s15231_s3] ss:$0 sm:$0xff] }
 0x4a0   :  { %v13245_v50 = vmax.f32 %v10836_v61, 0.0  ;;  %v4405_v61 = vld [vmem:[#allocation2 + $0x68] sm:$0xff] }
 0x4a1   :  { %8980 = vmatmul.mubr.msk.f32.vlgmr.msra.gmra.mrb[138].mxu0 %vm1587_vm0, %v12782_v1 }
 0x4a2   :  { %10623 = vmatpush3.bf16.msra.mxu0 %v10620_v11  ;;  %8982 = vmatprep.mubr.msk.f32.mxu0 %vm1587_vm0, %v12787_v4 }
 0x4a3   :  { %10625 = vmatprep.subr.bf16.mxu0 %v10624_v29 }
 0x4a5   :  { %8983 = vmatmul.mubr.msk.f32.gmra.mrb[140].mxu0 %vm1587_vm0, %v12792_v8 }
 0x4a6   :  { %8985 = vmatprep.mubr.msk.f32.mxu0 %vm1587_vm0, %v12797_v13  ;;  %10627 = vmatpush3.bf16.msra.mxu0 %v10624_v29  ;;  %v4402_v29 = vld [vmem:[#allocation2 + $0x50] sm:$0xff] }
 0x4a7   :  { %10629 = vmatprep.subr.bf16.mxu0 %v10628_v38  ;;  %v10668_v33 = vpack.c.bf16 %v4403_v30, %v4402_v29 }
 0x4a9   :  { %8986 = vmatmul.mubr.msk.f32.gmra.mrb[142].mxu0 %vm1587_vm0, %v12811_v24 }
 0x4aa   :  { %8988 = vmatprep.mubr.msk.f32.mxu0 %vm1587_vm0, %v12816_v25 }
 0x4ad   :  { %8989 = vmatmul.mubr.msk.f32.gmra.mrb[144].mxu0 %vm1587_vm0, %v12821_v37 }
 0x4ae   :  { %8991 = vmatprep.mubr.msk.f32.mxu0 %vm1587_vm0, %v12826_v41 }
 0x4b1   :  { %8992 = vmatmul.mubr.msk.f32.gmra.mrb[146].mxu0 %vm1587_vm0, %v12831_v9 }
 0x4b2   :  { %8994 = vmatprep.mubr.msk.f32.mxu0 %vm1587_vm0, %v12836_v28 }
 0x4b5   :  { %8995 = vmatmul.mubr.msk.f32.gmra.mrb[148].mxu0 %vm1587_vm0, %v12841_v46 }
 0x4b6   :  { %8997 = vmatprep.mubr.msk.f32.mxu0 %vm1587_vm0, %v12846_v51 }
 0x4b9   :  { %8998 = vmatmul.mubr.msk.f32.gmra.mrb[150].mxu0 %vm1587_vm0, %v12851_v56 }
 0x4ba   :  { %9000 = vmatprep.mubr.msk.f32.mxu0 %vm1587_vm0, %v12856_v62 }
 0x4bd   :  { %9001 = vmatmul.mubr.msk.f32.gmra.mrb[152].mxu0 %vm1587_vm0, %v12861_v3 }
 0x4be   :  { %9003 = vmatprep.mubr.msk.f32.mxu0 %vm1587_vm0, %v12866_v6 }
 0x4c1   :  { %9004 = vmatmul.mubr.msk.f32.gmra.mrb[154].mxu0 %vm1587_vm0, %v12871_v14 }
 0x4c2   :  { %9006 = vmatprep.mubr.msk.f32.mxu0 %vm1587_vm0, %v12876_v21 }
 0x4c5   :  { %9007 = vmatmul.mubr.msk.f32.gmra.mrb[156].mxu0 %vm1587_vm0, %v12881_v31 }
 0x4c6   :  { %9009 = vmatprep.mubr.msk.f32.mxu0 %vm1587_vm0, %v12886_v39 }
 0x4c9   :  { %9010 = vmatmul.mubr.msk.f32.gmra.mrb[158].mxu0 %vm1587_vm0, %v12891_v7 }
 0x4ca   :  { %9012 = vmatprep.mubr.msk.f32.mxu0 %vm1587_vm0, %v12896_v36 }
 0x4cd   :  { %9013 = vmatmul.mubr.msk.f32.gmra.mrb[160].mxu0 %vm1587_vm0, %v12901_v48 }
 0x4ce   :  { %9015 = vmatprep.mubr.msk.f32.mxu0 %vm1587_vm0, %v12906_v55 }
 0x4d1   :  { %9016 = vmatmul.mubr.msk.f32.gmra.mrb[162].mxu0 %vm1587_vm0, %v12911_v63 }
 0x4d2   :  { %9018 = vmatprep.mubr.msk.f32.mxu0 %vm1587_vm0, %v12916_v32 }
 0x4d5   :  { %9019 = vmatmul.mubr.msk.f32.gmra.mrb[164].mxu0 %vm1587_vm0, %v12921_v12 }
 0x4d6   :  { %9021 = vmatprep.mubr.msk.f32.mxu0 %vm1587_vm0, %v12926_v27 }
 0x4d9   :  { %9022 = vmatmul.mubr.msk.f32.gmra.mrb[166].mxu0 %vm1587_vm0, %v12931_v35 }
 0x4da   :  { %9024 = vmatprep.mubr.msk.f32.mxu0 %vm1587_vm0, %v12936_v45 }
 0x4dd   :  { %9025 = vmatmul.mubr.msk.f32.gmra.mrb[168].mxu0 %vm1587_vm0, %v12941_v43 }
 0x4de   :  { %9027 = vmatprep.mubr.msk.f32.mxu0 %vm1587_vm0, %v12946_v53 }
 0x4e1   :  { %9028 = vmatmul.mubr.msk.f32.gmra.mrb[170].mxu0 %vm1587_vm0, %v12951_v60 }
 0x4e2   :  { %9030 = vmatprep.mubr.msk.f32.mxu0 %vm1587_vm0, %v12956_v5 }
 0x4e5   :  { %9031 = vmatmul.mubr.msk.f32.gmra.mrb[172].mxu0 %vm1587_vm0, %v13061_v58 }
 0x4e6   :  { %9033 = vmatprep.mubr.msk.f32.mxu0 %vm1587_vm0, %v13153_v16 }
 0x4e9   :  { %9034 = vmatmul.mubr.msk.f32.gmra.mrb[174].mxu0 %vm1587_vm0, %v13245_v50 }
 0x4ea   :  { %9044 = vmatprep.mubr.msk.f32.mxu0 %vm1587_vm0, %v12782_v1  ;;  %v10837_v1 = vadd.f32 %v12754_v34, %v12988_v44  ;;  %v10640_v44 = vpack.c.bf16 %v7446_v0, %v7445_v59  ;;  %v4104_v59 = vld [vmem:[#allocation2 + $0x10] sm:$0xff]  ;;  %v4105_v0 = vld [vmem:[#allocation2 + $0x18] sm:$0xff] }
 0x4ec   :  { %v13337_v54 = vmax.f32 %v10837_v1, 0.0 }
 0x4ed   :  { %9045 = vmatmul.mubr.msk.f32.vlgmr.msra.gmra.mrb[138].mxu0 %vm1587_vm0, %v12787_v4 }
 0x4ee   :  { %10631 = vmatpush3.bf16.msra.mxu0 %v10628_v38  ;;  %9047 = vmatprep.mubr.msk.f32.mxu0 %vm1587_vm0, %v12792_v8  ;;  %v4404_v38 = vld [vmem:[#allocation2 + $0x60] sm:$0xff] }
 0x4ef   :  { %10633 = vmatprep.subr.bf16.mxu0 %v10632_v52  ;;  %v10671_v40 = vpack.c.bf16 %v4405_v61, %v4404_v38 }
 0x4f1   :  { %9048 = vmatmul.mubr.msk.f32.gmra.mrb[140].mxu0 %vm1587_vm0, %v12797_v13 }
 0x4f2   :  { %9050 = vmatprep.mubr.msk.f32.mxu0 %vm1587_vm0, %v12811_v24  ;;  %10635 = vmatpush3.bf16.msra.mxu0 %v10632_v52  ;;  %v10839_v52 = vadd.f32 %v11838_v15, %v13000_v26  ;;  %v10656_v26 = vpack.c.bf16 %v4105_v0, %v4104_v59 }
 0x4f3   :  { %10637 = vmatprep.subr.bf16.mxu0 %v10636_v49 }
 0x4f4   :  { %v1574_v17 = vmax.f32 %v10839_v52, 0.0 }
 0x4f5   :  { %9051 = vmatmul.mubr.msk.f32.gmra.mrb[142].mxu0 %vm1587_vm0, %v12816_v25 }
 0x4f6   :  { %9053 = vmatprep.mubr.msk.f32.mxu0 %vm1587_vm0, %v12821_v37 }
 0x4f9   :  { %9054 = vmatmul.mubr.msk.f32.gmra.mrb[144].mxu0 %vm1587_vm0, %v12826_v41 }
 0x4fa   :  { %9056 = vmatprep.mubr.msk.f32.mxu0 %vm1587_vm0, %v12831_v9 }
 0x4fd   :  { %9057 = vmatmul.mubr.msk.f32.gmra.mrb[146].mxu0 %vm1587_vm0, %v12836_v28 }
 0x4fe   :  { %9059 = vmatprep.mubr.msk.f32.mxu0 %vm1587_vm0, %v12841_v46 }
 0x501   :  { %9060 = vmatmul.mubr.msk.f32.gmra.mrb[148].mxu0 %vm1587_vm0, %v12846_v51 }
 0x502   :  { %9062 = vmatprep.mubr.msk.f32.mxu0 %vm1587_vm0, %v12851_v56 }
 0x505   :  { %9063 = vmatmul.mubr.msk.f32.gmra.mrb[150].mxu0 %vm1587_vm0, %v12856_v62 }
 0x506   :  { %9065 = vmatprep.mubr.msk.f32.mxu0 %vm1587_vm0, %v12861_v3 }
 0x509   :  { %9066 = vmatmul.mubr.msk.f32.gmra.mrb[152].mxu0 %vm1587_vm0, %v12866_v6 }
 0x50a   :  { %9068 = vmatprep.mubr.msk.f32.mxu0 %vm1587_vm0, %v12871_v14 }
 0x50d   :  { %9069 = vmatmul.mubr.msk.f32.gmra.mrb[154].mxu0 %vm1587_vm0, %v12876_v21 }
 0x50e   :  { %9071 = vmatprep.mubr.msk.f32.mxu0 %vm1587_vm0, %v12881_v31 }
 0x511   :  { %9072 = vmatmul.mubr.msk.f32.gmra.mrb[156].mxu0 %vm1587_vm0, %v12886_v39 }
 0x512   :  { %9074 = vmatprep.mubr.msk.f32.mxu0 %vm1587_vm0, %v12891_v7 }
 0x515   :  { %9075 = vmatmul.mubr.msk.f32.gmra.mrb[158].mxu0 %vm1587_vm0, %v12896_v36 }
 0x516   :  { %9077 = vmatprep.mubr.msk.f32.mxu0 %vm1587_vm0, %v12901_v48 }
 0x519   :  { %9078 = vmatmul.mubr.msk.f32.gmra.mrb[160].mxu0 %vm1587_vm0, %v12906_v55 }
 0x51a   :  { %9080 = vmatprep.mubr.msk.f32.mxu0 %vm1587_vm0, %v12911_v63 }
 0x51d   :  { %9081 = vmatmul.mubr.msk.f32.gmra.mrb[162].mxu0 %vm1587_vm0, %v12916_v32 }
 0x51e   :  { %9083 = vmatprep.mubr.msk.f32.mxu0 %vm1587_vm0, %v12921_v12 }
 0x521   :  { %9084 = vmatmul.mubr.msk.f32.gmra.mrb[164].mxu0 %vm1587_vm0, %v12926_v27 }
 0x522   :  { %9086 = vmatprep.mubr.msk.f32.mxu0 %vm1587_vm0, %v12931_v35 }
 0x525   :  { %9087 = vmatmul.mubr.msk.f32.gmra.mrb[166].mxu0 %vm1587_vm0, %v12936_v45 }
 0x526   :  { %9089 = vmatprep.mubr.msk.f32.mxu0 %vm1587_vm0, %v12941_v43 }
 0x529   :  { %9090 = vmatmul.mubr.msk.f32.gmra.mrb[168].mxu0 %vm1587_vm0, %v12946_v53 }
 0x52a   :  { %9092 = vmatprep.mubr.msk.f32.mxu0 %vm1587_vm0, %v12951_v60 }
 0x52d   :  { %9093 = vmatmul.mubr.msk.f32.gmra.mrb[170].mxu0 %vm1587_vm0, %v12956_v5 }
 0x52e   :  { %9095 = vmatprep.mubr.msk.f32.mxu0 %vm1587_vm0, %v13061_v58 }
 0x531   :  { %9096 = vmatmul.mubr.msk.f32.gmra.mrb[172].mxu0 %vm1587_vm0, %v13153_v16 }
 0x532   :  { %9098 = vmatprep.mubr.msk.f32.mxu0 %vm1587_vm0, %v13245_v50 }
 0x535   :  { %9099 = vmatmul.mubr.msk.f32.gmra.mrb[174].mxu0 %vm1587_vm0, %v13337_v54 }
 0x536   :  { %9109 = vmatprep.mubr.msk.f32.mxu0 %vm1587_vm0, %v12787_v4  ;;  %v10838_v4 = vadd.f32 %v12754_v34, %v12994_v19  ;;  %v10648_v34 = vpack.c.bf16 %v7488_v18, %v7487_v57  ;;  %v4401_v19 = vld [vmem:[#allocation2 + $0x48] sm:$0xff] }
 0x538   :  { %v13429_v11 = vmax.f32 %v10838_v4, 0.0  ;;  %v4646_v4 = vld [vmem:[#allocation2 + $0xb8] sm:$0xff] }
 0x539   :  { %9110 = vmatmul.mubr.msk.f32.vlgmr.msra.gmra.mrb[138].mxu0 %vm1587_vm0, %v12792_v8 }
 0x53a   :  { %10639 = vmatpush3.bf16.msra.mxu0 %v10636_v49  ;;  %9112 = vmatprep.mubr.msk.f32.mxu0 %vm1587_vm0, %v12797_v13  ;;  %v4103_v49 = vld [vmem:[#allocation2 + $0x8] sm:$0xff] }
 0x53b   :  { %10641 = vmatprep.subr.bf16.mxu0 %v10640_v44  ;;  %v10653_v1 = vpack.c.bf16 %v4103_v49, %v4102_v42 }
 0x53d   :  { %9113 = vmatmul.mubr.msk.f32.gmra.mrb[140].mxu0 %vm1587_vm0, %v12811_v24 }
 0x53e   :  { %9115 = vmatprep.mubr.msk.f32.mxu0 %vm1587_vm0, %v12816_v25  ;;  %10643 = vmatpush3.bf16.msra.mxu0 %v10640_v44  ;;  %v4106_v44 = vld [vmem:[#allocation2 + $0x20] sm:$0xff] }
 0x53f   :  { %10645 = vmatprep.subr.bf16.mxu0 %v10644_v10 }
 0x541   :  { %9116 = vmatmul.mubr.msk.f32.gmra.mrb[142].mxu0 %vm1587_vm0, %v12821_v37 }
 0x542   :  { %9118 = vmatprep.mubr.msk.f32.mxu0 %vm1587_vm0, %v12826_v41 }
 0x545   :  { %9119 = vmatmul.mubr.msk.f32.gmra.mrb[144].mxu0 %vm1587_vm0, %v12831_v9 }
 0x546   :  { %9121 = vmatprep.mubr.msk.f32.mxu0 %vm1587_vm0, %v12836_v28 }
 0x549   :  { %9122 = vmatmul.mubr.msk.f32.gmra.mrb[146].mxu0 %vm1587_vm0, %v12841_v46 }
 0x54a   :  { %9124 = vmatprep.mubr.msk.f32.mxu0 %vm1587_vm0, %v12846_v51 }
 0x54d   :  { %9125 = vmatmul.mubr.msk.f32.gmra.mrb[148].mxu0 %vm1587_vm0, %v12851_v56 }
 0x54e   :  { %9127 = vmatprep.mubr.msk.f32.mxu0 %vm1587_vm0, %v12856_v62 }
 0x551   :  { %9128 = vmatmul.mubr.msk.f32.gmra.mrb[150].mxu0 %vm1587_vm0, %v12861_v3 }
 0x552   :  { %9130 = vmatprep.mubr.msk.f32.mxu0 %vm1587_vm0, %v12866_v6 }
 0x555   :  { %9131 = vmatmul.mubr.msk.f32.gmra.mrb[152].mxu0 %vm1587_vm0, %v12871_v14 }
 0x556   :  { %9133 = vmatprep.mubr.msk.f32.mxu0 %vm1587_vm0, %v12876_v21 }
 0x559   :  { %9134 = vmatmul.mubr.msk.f32.gmra.mrb[154].mxu0 %vm1587_vm0, %v12881_v31 }
 0x55a   :  { %9136 = vmatprep.mubr.msk.f32.mxu0 %vm1587_vm0, %v12886_v39 }
 0x55d   :  { %9137 = vmatmul.mubr.msk.f32.gmra.mrb[156].mxu0 %vm1587_vm0, %v12891_v7 }
 0x55e   :  { %9139 = vmatprep.mubr.msk.f32.mxu0 %vm1587_vm0, %v12896_v36 }
 0x561   :  { %9140 = vmatmul.mubr.msk.f32.gmra.mrb[158].mxu0 %vm1587_vm0, %v12901_v48 }
 0x562   :  { %9142 = vmatprep.mubr.msk.f32.mxu0 %vm1587_vm0, %v12906_v55 }
 0x565   :  { %9143 = vmatmul.mubr.msk.f32.gmra.mrb[160].mxu0 %vm1587_vm0, %v12911_v63 }
 0x566   :  { %9145 = vmatprep.mubr.msk.f32.mxu0 %vm1587_vm0, %v12916_v32 }
 0x569   :  { %9146 = vmatmul.mubr.msk.f32.gmra.mrb[162].mxu0 %vm1587_vm0, %v12921_v12 }
 0x56a   :  { %9148 = vmatprep.mubr.msk.f32.mxu0 %vm1587_vm0, %v12926_v27 }
 0x56d   :  { %9149 = vmatmul.mubr.msk.f32.gmra.mrb[164].mxu0 %vm1587_vm0, %v12931_v35 }
 0x56e   :  { %9151 = vmatprep.mubr.msk.f32.mxu0 %vm1587_vm0, %v12936_v45 }
 0x571   :  { %9152 = vmatmul.mubr.msk.f32.gmra.mrb[166].mxu0 %vm1587_vm0, %v12941_v43 }
 0x572   :  { %9154 = vmatprep.mubr.msk.f32.mxu0 %vm1587_vm0, %v12946_v53 }
 0x575   :  { %9155 = vmatmul.mubr.msk.f32.gmra.mrb[168].mxu0 %vm1587_vm0, %v12951_v60 }
 0x576   :  { %9157 = vmatprep.mubr.msk.f32.mxu0 %vm1587_vm0, %v12956_v5 }
 0x579   :  { %9158 = vmatmul.mubr.msk.f32.gmra.mrb[170].mxu0 %vm1587_vm0, %v13061_v58 }
 0x57a   :  { %9160 = vmatprep.mubr.msk.f32.mxu0 %vm1587_vm0, %v13153_v16 }
 0x57d   :  { %9161 = vmatmul.mubr.msk.f32.gmra.mrb[172].mxu0 %vm1587_vm0, %v13245_v50 }
 0x57e   :  { %9163 = vmatprep.mubr.msk.f32.mxu0 %vm1587_vm0, %v13337_v54 }
 0x581   :  { %9164 = vmatmul.mubr.msk.f32.gmra.mrb[174].mxu0 %vm1587_vm0, %v13429_v11 }
 0x582   :  { %9174 = vmatprep.mubr.msk.f32.mxu0 %vm1587_vm0, %v12792_v8  ;;  %v4400_v8 = vld [vmem:[#allocation2 + $0x40] sm:$0xff] }
 0x583   :  { %v10665_v20 = vpack.c.bf16 %v4401_v19, %v4400_v8 }
 0x585   :  { %9175 = vmatmul.mubr.msk.f32.vlgmr.msra.gmra.mrb[138].mxu0 %vm1587_vm0, %v12797_v13  ;;  %10666 = vmatpush3.bf16.msra.mxu1 %v10665_v20 }
 0x586   :  { %10647 = vmatpush3.bf16.msra.mxu0 %v10644_v10  ;;  %9177 = vmatprep.mubr.msk.f32.mxu0 %vm1587_vm0, %v12811_v24  ;;  %v4645_v10 = vld [vmem:[#allocation2 + $0xb0] sm:$0xff] }
 0x587   :  { %10649 = vmatprep.subr.bf16.mxu0 %v10648_v34  ;;  %10667 = vmatprep.subr.bf16.mxu1 %v15237_v22 }
 0x589   :  { %9178 = vmatmul.mubr.msk.f32.gmra.mrb[140].mxu0 %vm1587_vm0, %v12816_v25  ;;  %10669 = vmatpush3.bf16.msra.mxu1 %v10668_v33 }
 0x58a   :  { %9180 = vmatprep.mubr.msk.f32.mxu0 %vm1587_vm0, %v12821_v37  ;;  %10651 = vmatpush3.bf16.msra.mxu0 %v10648_v34  ;;  %v10686_v34 = vpack.c.bf16 %v4646_v4, %v4645_v10 }
 0x58b   :  { %10652 = vmatprep.subr.bf16.mxu0 %v15237_v22  ;;  %10670 = vmatprep.subr.bf16.mxu1 %v15237_v22 }
 0x58d   :  { %9181 = vmatmul.mubr.msk.f32.gmra.mrb[142].mxu0 %vm1587_vm0, %v12826_v41  ;;  %10672 = vmatpush3.bf16.msra.mxu1 %v10671_v40 }
 0x58e   :  { %9183 = vmatprep.mubr.msk.f32.mxu0 %vm1587_vm0, %v12831_v9  ;;  %10673 = vmatprep.subr.bf16.mxu1 %v15237_v22 }
 0x591   :  { %9184 = vmatmul.mubr.msk.f32.gmra.mrb[144].mxu0 %vm1587_vm0, %v12836_v28 }
 0x592   :  { %9186 = vmatprep.mubr.msk.f32.mxu0 %vm1587_vm0, %v12841_v46 }
 0x595   :  { %9187 = vmatmul.mubr.msk.f32.gmra.mrb[146].mxu0 %vm1587_vm0, %v12846_v51 }
 0x596   :  { %9189 = vmatprep.mubr.msk.f32.mxu0 %vm1587_vm0, %v12851_v56 }
 0x599   :  { %9190 = vmatmul.mubr.msk.f32.gmra.mrb[148].mxu0 %vm1587_vm0, %v12856_v62 }
 0x59a   :  { %9192 = vmatprep.mubr.msk.f32.mxu0 %vm1587_vm0, %v12861_v3 }
 0x59d   :  { %9193 = vmatmul.mubr.msk.f32.gmra.mrb[150].mxu0 %vm1587_vm0, %v12866_v6 }
 0x59e   :  { %9195 = vmatprep.mubr.msk.f32.mxu0 %vm1587_vm0, %v12871_v14 }
 0x5a1   :  { %9196 = vmatmul.mubr.msk.f32.gmra.mrb[152].mxu0 %vm1587_vm0, %v12876_v21 }
 0x5a2   :  { %9198 = vmatprep.mubr.msk.f32.mxu0 %vm1587_vm0, %v12881_v31 }
 0x5a5   :  { %9199 = vmatmul.mubr.msk.f32.gmra.mrb[154].mxu0 %vm1587_vm0, %v12886_v39 }
 0x5a6   :  { %9201 = vmatprep.mubr.msk.f32.mxu0 %vm1587_vm0, %v12891_v7 }
 0x5a9   :  { %9202 = vmatmul.mubr.msk.f32.gmra.mrb[156].mxu0 %vm1587_vm0, %v12896_v36 }
 0x5aa   :  { %9204 = vmatprep.mubr.msk.f32.mxu0 %vm1587_vm0, %v12901_v48 }
 0x5ad   :  { %9205 = vmatmul.mubr.msk.f32.gmra.mrb[158].mxu0 %vm1587_vm0, %v12906_v55 }
 0x5ae   :  { %9207 = vmatprep.mubr.msk.f32.mxu0 %vm1587_vm0, %v12911_v63 }
 0x5b1   :  { %9208 = vmatmul.mubr.msk.f32.gmra.mrb[160].mxu0 %vm1587_vm0, %v12916_v32 }
 0x5b2   :  { %9210 = vmatprep.mubr.msk.f32.mxu0 %vm1587_vm0, %v12921_v12 }
 0x5b5   :  { %9211 = vmatmul.mubr.msk.f32.gmra.mrb[162].mxu0 %vm1587_vm0, %v12926_v27 }
 0x5b6   :  { %9213 = vmatprep.mubr.msk.f32.mxu0 %vm1587_vm0, %v12931_v35 }
 0x5b9   :  { %9214 = vmatmul.mubr.msk.f32.gmra.mrb[164].mxu0 %vm1587_vm0, %v12936_v45 }
 0x5ba   :  { %9216 = vmatprep.mubr.msk.f32.mxu0 %vm1587_vm0, %v12941_v43 }
 0x5bd   :  { %9217 = vmatmul.mubr.msk.f32.gmra.mrb[166].mxu0 %vm1587_vm0, %v12946_v53 }
 0x5be   :  { %9219 = vmatprep.mubr.msk.f32.mxu0 %vm1587_vm0, %v12951_v60 }
 0x5c1   :  { %9220 = vmatmul.mubr.msk.f32.gmra.mrb[168].mxu0 %vm1587_vm0, %v12956_v5 }
 0x5c2   :  { %9222 = vmatprep.mubr.msk.f32.mxu0 %vm1587_vm0, %v13061_v58 }
 0x5c5   :  { %9223 = vmatmul.mubr.msk.f32.gmra.mrb[170].mxu0 %vm1587_vm0, %v13153_v16 }
 0x5c6   :  { %9225 = vmatprep.mubr.msk.f32.mxu0 %vm1587_vm0, %v13245_v50 }
 0x5c9   :  { %9226 = vmatmul.mubr.msk.f32.gmra.mrb[172].mxu0 %vm1587_vm0, %v13337_v54 }
 0x5ca   :  { %9228 = vmatprep.mubr.msk.f32.mxu0 %vm1587_vm0, %v13429_v11 }
 0x5cd   :  { %9229 = vmatmul.mubr.msk.f32.gmra.mrb[174].mxu0 %vm1587_vm0, %v1574_v17 }
 0x5ce   :  { %9239 = vmatprep.mubr.msk.f32.mxu0 %vm1587_vm0, %v12797_v13  ;;  %v10659_v13 = vpack.c.bf16 %v4107_v2, %v4106_v44 }
 0x5d1   :  { %9240 = vmatmul.mubr.msk.f32.vlgmr.msra.gmra.mrb[138].mxu0 %vm1587_vm0, %v12811_v24  ;;  %v10840_v24 = vadd.f32 %v11838_v15, %v13006_v47  ;;  %v4644_v47 = vld [vmem:[#allocation2 + $0xa8] sm:$0xff] }
 0x5d2   :  { %9242 = vmatprep.mubr.msk.f32.mxu0 %vm1587_vm0, %v12816_v25  ;;  %10654 = vmatpush3.bf16.msra.mxu0 %v10653_v1 }
 0x5d3   :  { %10655 = vmatprep.subr.bf16.mxu0 %v15237_v22  ;;  %v1575_v25 = vmax.f32 %v10840_v24, 0.0 }
 0x5d5   :  { %9243 = vmatmul.mubr.msk.f32.gmra.mrb[140].mxu0 %vm1587_vm0, %v12821_v37  ;;  %v4406_v37 = vld [vmem:[#allocation2 + $0x70] sm:$0xff] }
 0x5d6   :  { %9245 = vmatprep.mubr.msk.f32.mxu0 %vm1587_vm0, %v12826_v41  ;;  %10657 = vmatpush3.bf16.msra.mxu0 %v10656_v26  ;;  %v4407_v41 = vld [vmem:[#allocation2 + $0x78] sm:$0xff] }
 0x5d7   :  { %10658 = vmatprep.subr.bf16.mxu0 %v15237_v22 }
 0x5d9   :  { %9246 = vmatmul.mubr.msk.f32.gmra.mrb[142].mxu0 %vm1587_vm0, %v12831_v9  ;;  %v10674_v9 = vpack.c.bf16 %v4407_v41, %v4406_v37 }
 0x5da   :  { %9248 = vmatprep.mubr.msk.f32.mxu0 %vm1587_vm0, %v12836_v28  ;;  %10660 = vmatpush3.bf16.msra.mxu0 %v10659_v13  ;;  %v4108_v28 = vld [vmem:[#allocation2 + $0x30] sm:$0xff] }
 0x5db   :  { %10661 = vmatprep.subr.bf16.mxu0 %v15237_v22  ;;  %10675 = vmatpush3.bf16.msra.mxu1 %v10674_v9 }
 0x5dc   :  { %10676 = vmatprep.subr.bf16.mxu1 %v15237_v22 }
 0x5dd   :  { %9249 = vmatmul.mubr.msk.f32.gmra.mrb[144].mxu0 %vm1587_vm0, %v12841_v46  ;;  %v4109_v46 = vld [vmem:[#allocation2 + $0x38] sm:$0xff] }
 0x5de   :  { %9251 = vmatprep.mubr.msk.f32.mxu0 %vm1587_vm0, %v12846_v51  ;;  %v10662_v51 = vpack.c.bf16 %v4109_v46, %v4108_v28 }
 0x5e0   :  { %10663 = vmatpush3.bf16.msra.mxu0 %v10662_v51 }
 0x5e1   :  { %9252 = vmatmul.mubr.msk.f32.gmra.mrb[146].mxu0 %vm1587_vm0, %v12851_v56  ;;  %v11894_v56 = vmov 0.0  }
 0x5e2   :  { %9254 = vmatprep.mubr.msk.f32.mxu0 %vm1587_vm0, %v12856_v62  ;;  %9409 = vmatprep.mubr.msk.f32.mxu1 %vm11893_vm1, %v11894_v56  ;;  %v13608_v62 = vld [vmem:[%s15233_s5] ss:$0 sm:$0xff] }
 0x5e5   :  { %9255 = vmatmul.mubr.msk.f32.gmra.mrb[148].mxu0 %vm1587_vm0, %v12861_v3  ;;  %v4639_v3 = vld [vmem:[#allocation2 + $0x80] sm:$0xff] }
 0x5e6   :  { %9257 = vmatprep.mubr.msk.f32.mxu0 %vm1587_vm0, %v12866_v6  ;;  %v4640_v6 = vld [vmem:[#allocation2 + $0x88] sm:$0xff] }
 0x5e9   :  { %9258 = vmatmul.mubr.msk.f32.gmra.mrb[150].mxu0 %vm1587_vm0, %v12871_v14 }
 0x5ea   :  { %9260 = vmatprep.mubr.msk.f32.mxu0 %vm1587_vm0, %v12876_v21 }
 0x5ed   :  { %9261 = vmatmul.mubr.msk.f32.gmra.mrb[152].mxu0 %vm1587_vm0, %v12881_v31 }
 0x5ee   :  { %9263 = vmatprep.mubr.msk.f32.mxu0 %vm1587_vm0, %v12886_v39 }
 0x5f1   :  { %9264 = vmatmul.mubr.msk.f32.gmra.mrb[154].mxu0 %vm1587_vm0, %v12891_v7  ;;  %v10677_v7 = vpack.c.bf16 %v4640_v6, %v4639_v3 }
 0x5f2   :  { %9266 = vmatprep.mubr.msk.f32.mxu0 %vm1587_vm0, %v12896_v36 }
 0x5f5   :  { %9267 = vmatmul.mubr.msk.f32.gmra.mrb[156].mxu0 %vm1587_vm0, %v12901_v48 }
 0x5f6   :  { %9269 = vmatprep.mubr.msk.f32.mxu0 %vm1587_vm0, %v12906_v55 }
 0x5f9   :  { %9270 = vmatmul.mubr.msk.f32.gmra.mrb[158].mxu0 %vm1587_vm0, %v12911_v63 }
 0x5fa   :  { %9272 = vmatprep.mubr.msk.f32.mxu0 %vm1587_vm0, %v12916_v32  ;;  %v4641_v32 = vld [vmem:[#allocation2 + $0x90] sm:$0xff] }
 0x5fd   :  { %9273 = vmatmul.mubr.msk.f32.gmra.mrb[160].mxu0 %vm1587_vm0, %v12921_v12  ;;  %v4642_v12 = vld [vmem:[#allocation2 + $0x98] sm:$0xff] }
 0x5fe   :  { %9275 = vmatprep.mubr.msk.f32.mxu0 %vm1587_vm0, %v12926_v27 }
 0x601   :  { %9276 = vmatmul.mubr.msk.f32.gmra.mrb[162].mxu0 %vm1587_vm0, %v12931_v35 }
 0x602   :  { %9278 = vmatprep.mubr.msk.f32.mxu0 %vm1587_vm0, %v12936_v45 }
 0x605   :  { %9279 = vmatmul.mubr.msk.f32.gmra.mrb[164].mxu0 %vm1587_vm0, %v12941_v43 }
 0x606   :  { %9281 = vmatprep.mubr.msk.f32.mxu0 %vm1587_vm0, %v12946_v53  ;;  %v10680_v53 = vpack.c.bf16 %v4642_v12, %v4641_v32 }
 0x609   :  { %9282 = vmatmul.mubr.msk.f32.gmra.mrb[166].mxu0 %vm1587_vm0, %v12951_v60 }
 0x60a   :  { %9284 = vmatprep.mubr.msk.f32.mxu0 %vm1587_vm0, %v12956_v5  ;;  %v4643_v5 = vld [vmem:[#allocation2 + $0xa0] sm:$0xff] }
 0x60d   :  { %9285 = vmatmul.mubr.msk.f32.gmra.mrb[168].mxu0 %vm1587_vm0, %v13061_v58 }
 0x60e   :  { %9287 = vmatprep.mubr.msk.f32.mxu0 %vm1587_vm0, %v13153_v16 }
 0x611   :  { %9288 = vmatmul.mubr.msk.f32.gmra.mrb[170].mxu0 %vm1587_vm0, %v13245_v50 }
 0x612   :  { %9290 = vmatprep.mubr.msk.f32.mxu0 %vm1587_vm0, %v13337_v54  ;;  %v10683_v54 = vpack.c.bf16 %v4644_v47, %v4643_v5 }
 0x615   :  { %9291 = vmatmul.mubr.msk.f32.gmra.mrb[172].mxu0 %vm1587_vm0, %v13429_v11 }
 0x616   :  { %9293 = vmatprep.mubr.msk.f32.mxu0 %vm1587_vm0, %v1574_v17 }
 0x619   :  { %9294 = vmatmul.mubr.msk.f32.gmra.mrb[174].mxu0 %vm1587_vm0, %v1575_v25 }
 0x61a   :  { %9312 = vmatprep.mubr.msk.f32.mxu0 %vm11893_vm1, %v11894_v56 }
 0x6a4   :  { %v9241_v14 = vpop.f32.mrb[138].mxu0 }
 0x6a5   :  { %v10841_v21 = vadd.f32 %v9241_v14, %v13608_v62  ;;  %v3837_v31 = vpop.f32.mrb[139].mxu0 }
 0x6a6   :  { %v10842_v39 = vadd.f32 %v13608_v62, %v3837_v31 }
 0x6a7   :  { %v4065_v36 = vmax.f32 %v10841_v21, 0.0 }
 0x6a8   :  { %v4064_v48 = vmax.f32 %v10842_v39, 0.0  ;;  %v9244_v55 = vpop.f32.mrb[140].mxu0 }
 0x6a9   :  { %v3847_v63 = vpop.f32.mrb[141].mxu0  ;;  %9410 = vmatmul.mubr.msk.f32.vlgmr.msra.gmra.mrb[0].mxu1 %vm4117_vm2, %v4065_v36  ;;  %v10843_v35 = vadd.f32 %v9244_v55, %v13608_v62 }
 0x6aa   :  { %v10844_v27 = vadd.f32 %v13608_v62, %v3847_v63  ;;  %9313 = vmatmul.mubr.msk.f32.vlgmr.msra.gmra.mrb[176].mxu0 %vm4117_vm2, %v4064_v48  ;;  %10678 = vmatpush3.bf16.msra.mxu1 %v10677_v7 }
 0x6ab   :  { %9315 = vmatprep.mubr.msk.f32.mxu0 %vm11893_vm1, %v11894_v56  ;;  %9412 = vmatprep.mubr.msk.f32.mxu1 %vm11893_vm1, %v11894_v56  ;;  %v13630_v58 = vmax.f32 %v10843_v35, 0.0 }
 0x6ac   :  { %v13620_v45 = vmax.f32 %v10844_v27, 0.0  ;;  %v9247_v43 = vpop.f32.mrb[142].mxu0  ;;  %10679 = vmatprep.subr.bf16.mxu1 %v15237_v22 }
 0x6ad   :  { %v3857_v60 = vpop.f32.mrb[143].mxu0  ;;  %v10845_v11 = vadd.f32 %v9247_v43, %v13608_v62 }
 0x6ae   :  { %9316 = vmatmul.mubr.msk.f32.gmra.mrb[178].mxu0 %vm4117_vm2, %v4065_v36  ;;  %9413 = vmatmul.mubr.msk.f32.gmra.mrb[2].mxu1 %vm4117_vm2, %v13620_v45  ;;  %v10846_v16 = vadd.f32 %v13608_v62, %v3857_v60 }
 0x6af   :  { %9318 = vmatprep.mubr.msk.f32.mxu0 %vm11893_vm1, %v11894_v56  ;;  %9415 = vmatprep.mubr.msk.f32.mxu1 %vm11893_vm1, %v11894_v56  ;;  %v13654_v19 = vmax.f32 %v10845_v11, 0.0 }
 0x6b0   :  { %v9250_v50 = vpop.f32.mrb[144].mxu0  ;;  %10681 = vmatpush3.bf16.msra.mxu1 %v10680_v53  ;;  %v13643_v57 = vmax.f32 %v10846_v16, 0.0 }
 0x6b1   :  { %v3867_v23 = vpop.f32.mrb[145].mxu0  ;;  %10682 = vmatprep.subr.bf16.mxu1 %v15237_v22  ;;  %v10847_v33 = vadd.f32 %v9250_v50, %v13608_v62 }
 0x6b2   :  { %9319 = vmatmul.mubr.msk.f32.gmra.mrb[180].mxu0 %vm4117_vm2, %v13620_v45  ;;  %9416 = vmatmul.mubr.msk.f32.gmra.mrb[4].mxu1 %vm4117_vm2, %v13630_v58  ;;  %v10848_v20 = vadd.f32 %v13608_v62, %v3867_v23 }
 0x6b3   :  { %9321 = vmatprep.mubr.msk.f32.mxu0 %vm11893_vm1, %v11894_v56  ;;  %9418 = vmatprep.mubr.msk.f32.mxu1 %vm11893_vm1, %v11894_v56  ;;  %v13677_v15 = vmax.f32 %v10847_v33, 0.0 }
 0x6b4   :  { %v9253_v18 = vpop.f32.mrb[146].mxu0  ;;  %10684 = vmatpush3.bf16.msra.mxu1 %v10683_v54  ;;  %v13667_v38 = vmax.f32 %v10848_v20, 0.0 }
 0x6b5   :  { %v3877_v8 = vpop.f32.mrb[147].mxu0  ;;  %10685 = vmatprep.subr.bf16.mxu1 %v15237_v22  ;;  %v10849_v49 = vadd.f32 %v9253_v18, %v13608_v62 }
 0x6b6   :  { %9322 = vmatmul.mubr.msk.f32.gmra.mrb[182].mxu0 %vm4117_vm2, %v13630_v58  ;;  %9419 = vmatmul.mubr.msk.f32.gmra.mrb[6].mxu1 %vm4117_vm2, %v13643_v57  ;;  %v10850_v52 = vadd.f32 %v13608_v62, %v3877_v8 }
 0x6b7   :  { %9324 = vmatprep.mubr.msk.f32.mxu0 %vm11893_vm1, %v11894_v56  ;;  %9421 = vmatprep.mubr.msk.f32.mxu1 %vm11893_vm1, %v11894_v56  ;;  %v13699_v26 = vmax.f32 %v10849_v49, 0.0 }
 0x6b8   :  { %v9256_v29 = vpop.f32.mrb[148].mxu0  ;;  %10687 = vmatpush3.bf16.msra.mxu1 %v10686_v34  ;;  %v13689_v1 = vmax.f32 %v10850_v52, 0.0 }
 0x6b9   :  { %v3887_v30 = vpop.f32.mrb[149].mxu0  ;;  %10688 = vmatprep.subr.bf16.mxu1 %v15237_v22  ;;  %v10851_v24 = vadd.f32 %v9256_v29, %v13608_v62 }
 0x6ba   :  { %9325 = vmatmul.mubr.msk.f32.gmra.mrb[184].mxu0 %vm4117_vm2, %v13643_v57  ;;  %9422 = vmatmul.mubr.msk.f32.gmra.mrb[8].mxu1 %vm4117_vm2, %v13654_v19  ;;  %v10852_v44 = vadd.f32 %v13608_v62, %v3887_v30 }
 0x6bb   :  { %9327 = vmatprep.mubr.msk.f32.mxu0 %vm11893_vm1, %v11894_v56  ;;  %9424 = vmatprep.mubr.msk.f32.mxu1 %vm11893_vm1, %v11894_v56  ;;  %v13727_v9 = vmax.f32 %v10851_v24, 0.0  ;;  %v4878_v24 = vld [vmem:[#allocation2 + $0xc0] sm:$0xff] }
 0x6bc   :  { %v9259_v61 = vpop.f32.mrb[150].mxu0  ;;  %v13713_v25 = vmax.f32 %v10852_v44, 0.0 }
 0x6bd   :  { %v3897_v40 = vpop.f32.mrb[151].mxu0  ;;  %v10853_v3 = vadd.f32 %v9259_v61, %v13608_v62 }
 0x6be   :  { %9328 = vmatmul.mubr.msk.f32.gmra.mrb[186].mxu0 %vm4117_vm2, %v13654_v19  ;;  %9425 = vmatmul.mubr.msk.f32.gmra.mrb[10].mxu1 %vm4117_vm2, %v13667_v38  ;;  %v10854_v28 = vadd.f32 %v13608_v62, %v3897_v40 }
 0x6bf   :  { %9330 = vmatprep.mubr.msk.f32.mxu0 %vm11893_vm1, %v11894_v56  ;;  %9427 = vmatprep.mubr.msk.f32.mxu1 %vm11893_vm1, %v11894_v56  ;;  %v13757_v31 = vmax.f32 %v10853_v3, 0.0  ;;  %v4882_v3 = vld [vmem:[#allocation2 + $0xe0] sm:$0xff] }
 0x6c0   :  { %v9262_v17 = vpop.f32.mrb[152].mxu0  ;;  %v13743_v6 = vmax.f32 %v10854_v28, 0.0  ;;  %v4880_v28 = vld [vmem:[#allocation2 + $0xd0] sm:$0xff] }
 0x6c1   :  { %v3907_v42 = vpop.f32.mrb[153].mxu0  ;;  %v10855_v48 = vadd.f32 %v9262_v17, %v13608_v62 }
 0x6c2   :  { %9331 = vmatmul.mubr.msk.f32.gmra.mrb[188].mxu0 %vm4117_vm2, %v13667_v38  ;;  %9428 = vmatmul.mubr.msk.f32.gmra.mrb[12].mxu1 %vm4117_vm2, %v13677_v15  ;;  %v10856_v39 = vadd.f32 %v13608_v62, %v3907_v42 }
 0x6c3   :  { %9333 = vmatprep.mubr.msk.f32.mxu0 %vm11893_vm1, %v11894_v56  ;;  %9430 = vmatprep.mubr.msk.f32.mxu1 %vm11893_vm1, %v11894_v56  ;;  %v13787_v12 = vmax.f32 %v10855_v48, 0.0 }
 0x6c4   :  { %v9265_v59 = vpop.f32.mrb[154].mxu0  ;;  %v13773_v55 = vmax.f32 %v10856_v39, 0.0  ;;  %v4885_v39 = vld [vmem:[#allocation2 + $0xf8] sm:$0xff] }
 0x6c5   :  { %v3917_v0 = vpop.f32.mrb[155].mxu0  ;;  %v10857_v53 = vadd.f32 %v9265_v59, %v13608_v62 }
 0x6c6   :  { %9334 = vmatmul.mubr.msk.f32.gmra.mrb[190].mxu0 %vm4117_vm2, %v13677_v15  ;;  %9431 = vmatmul.mubr.msk.f32.gmra.mrb[14].mxu1 %vm4117_vm2, %v13689_v1  ;;  %v10858_v27 = vadd.f32 %v13608_v62, %v3917_v0 }
 0x6c7   :  { %9336 = vmatprep.mubr.msk.f32.mxu0 %vm11893_vm1, %v11894_v56  ;;  %9433 = vmatprep.mubr.msk.f32.mxu1 %vm11893_vm1, %v11894_v56  ;;  %v13817_v16 = vmax.f32 %v10857_v53, 0.0  ;;  %v5118_v53 = vld [vmem:[#allocation2 + $0x108] sm:$0xff] }
 0x6c8   :  { %v13702_v2 = vpop.f32.mrb[156].mxu0  ;;  %v13803_v60 = vmax.f32 %v10858_v27, 0.0  ;;  %v5117_v27 = vld [vmem:[#allocation2 + $0x100] sm:$0xff] }
 0x6c9   :  { %v3927_v13 = vpop.f32.mrb[157].mxu0  ;;  %v10859_v10 = vadd.f32 %v13702_v2, %v13608_v62 }
 0x6ca   :  { %9337 = vmatmul.mubr.msk.f32.gmra.mrb[192].mxu0 %vm4117_vm2, %v13689_v1  ;;  %9434 = vmatmul.mubr.msk.f32.gmra.mrb[16].mxu1 %vm4117_vm2, %v13699_v26  ;;  %v10860_v50 = vadd.f32 %v13608_v62, %v3927_v13 }
 0x6cb   :  { %9339 = vmatprep.mubr.msk.f32.mxu0 %vm11893_vm1, %v11894_v56  ;;  %9436 = vmatprep.mubr.msk.f32.mxu1 %vm11893_vm1, %v11894_v56  ;;  %v13848_v34 = vmax.f32 %v10859_v10, 0.0 }
 0x6cc   :  { %v13715_v37 = vpop.f32.mrb[158].mxu0  ;;  %v13834_v4 = vmax.f32 %v10860_v50, 0.0 }
 0x6cd   :  { %v13717_v41 = vpop.f32.mrb[159].mxu0  ;;  %v10861_v20 = vadd.f32 %v13715_v37, %v13608_v62  ;;  %v4879_v37 = vld [vmem:[#allocation2 + $0xc8] sm:$0xff] }
 0x6ce   :  { %9340 = vmatmul.mubr.msk.f32.gmra.mrb[194].mxu0 %vm4117_vm2, %v13699_v26  ;;  %9437 = vmatmul.mubr.msk.f32.gmra.mrb[18].mxu1 %vm4117_vm2, %v13713_v25  ;;  %v10862_v8 = vadd.f32 %v13608_v62, %v13717_v41  ;;  %v10689_v41 = vpack.c.bf16 %v4879_v37, %v4878_v24  ;;  %v5123_v37 = vld [vmem:[#allocation2 + $0x130] sm:$0xff] }
 0x6cf   :  { %9342 = vmatprep.mubr.msk.f32.mxu0 %vm11893_vm1, %v11894_v56  ;;  %9439 = vmatprep.mubr.msk.f32.mxu1 %vm11893_vm1, %v11894_v56  ;;  %v13872_v30 = vmax.f32 %v10861_v20, 0.0  ;;  %v5120_v20 = vld [vmem:[#allocation2 + $0x118] sm:$0xff] }
 0x6d0   :  { %v13730_v46 = vpop.f32.mrb[160].mxu0  ;;  %v13862_v29 = vmax.f32 %v10862_v8, 0.0  ;;  %v5119_v8 = vld [vmem:[#allocation2 + $0x110] sm:$0xff] }
 0x6d1   :  { %v13732_v51 = vpop.f32.mrb[161].mxu0  ;;  %v10863_v61 = vadd.f32 %v13730_v46, %v13608_v62  ;;  %v4881_v46 = vld [vmem:[#allocation2 + $0xd8] sm:$0xff] }
 0x6d2   :  { %9343 = vmatmul.mubr.msk.f32.gmra.mrb[196].mxu0 %vm4117_vm2, %v13713_v25  ;;  %9440 = vmatmul.mubr.msk.f32.gmra.mrb[20].mxu1 %vm4117_vm2, %v13727_v9  ;;  %v10864_v33 = vadd.f32 %v13608_v62, %v13732_v51  ;;  %v10692_v51 = vpack.c.bf16 %v4881_v46, %v4880_v28 }
 0x6d3   :  { %9345 = vmatprep.mubr.msk.f32.mxu0 %vm11893_vm1, %v11894_v56  ;;  %9442 = vmatprep.mubr.msk.f32.mxu1 %vm11893_vm1, %v11894_v56  ;;  %v13896_v52 = vmax.f32 %v10863_v61, 0.0 }
 0x6d4   :  { %v13745_v14 = vpop.f32.mrb[162].mxu0  ;;  %v13886_v40 = vmax.f32 %v10864_v33, 0.0 }
 0x6d5   :  { %v13747_v21 = vpop.f32.mrb[163].mxu0  ;;  %v10865_v42 = vadd.f32 %v13745_v14, %v13608_v62  ;;  %v4883_v14 = vld [vmem:[#allocation2 + $0xe8] sm:$0xff] }
 0x6d6   :  { %9346 = vmatmul.mubr.msk.f32.gmra.mrb[198].mxu0 %vm4117_vm2, %v13727_v9  ;;  %9443 = vmatmul.mubr.msk.f32.gmra.mrb[22].mxu1 %vm4117_vm2, %v13743_v6  ;;  %v10866_v17 = vadd.f32 %v13608_v62, %v13747_v21  ;;  %v10695_v21 = vpack.c.bf16 %v4883_v14, %v4882_v3 }
 0x6d7   :  { %9348 = vmatprep.mubr.msk.f32.mxu0 %vm11893_vm1, %v11894_v56  ;;  %9445 = vmatprep.mubr.msk.f32.mxu1 %vm11893_vm1, %v11894_v56  ;;  %v13920_v59 = vmax.f32 %v10865_v42, 0.0  ;;  %v5121_v42 = vld [vmem:[#allocation2 + $0x120] sm:$0xff] }
 0x6d8   :  { %v13760_v7 = vpop.f32.mrb[164].mxu0  ;;  %v13910_v49 = vmax.f32 %v10866_v17, 0.0  ;;  %v10704_v17 = vpack.c.bf16 %v5120_v20, %v5119_v8 }
 0x6d9   :  { %v13762_v36 = vpop.f32.mrb[165].mxu0  ;;  %v10867_v44 = vadd.f32 %v13760_v7, %v13608_v62 }
 0x6da   :  { %9349 = vmatmul.mubr.msk.f32.gmra.mrb[200].mxu0 %vm4117_vm2, %v13743_v6  ;;  %9446 = vmatmul.mubr.msk.f32.gmra.mrb[24].mxu1 %vm4117_vm2, %v13757_v31  ;;  %v10868_v0 = vadd.f32 %v13608_v62, %v13762_v36 }
 0x6db   :  { %9351 = vmatprep.mubr.msk.f32.mxu0 %vm11893_vm1, %v11894_v56  ;;  %9448 = vmatprep.mubr.msk.f32.mxu1 %vm11893_vm1, %v11894_v56  ;;  %v13944_v13 = vmax.f32 %v10867_v44, 0.0 }
 0x6dc   :  { %v13775_v63 = vpop.f32.mrb[166].mxu0  ;;  %v13934_v2 = vmax.f32 %v10868_v0, 0.0  ;;  %v5122_v0 = vld [vmem:[#allocation2 + $0x128] sm:$0xff] }
 0x6dd   :  { %v13777_v32 = vpop.f32.mrb[167].mxu0 }
 0x6de   :  { %9352 = vmatmul.mubr.msk.f32.gmra.mrb[202].mxu0 %vm4117_vm2, %v13757_v31  ;;  %9449 = vmatmul.mubr.msk.f32.gmra.mrb[26].mxu1 %vm4117_vm2, %v13773_v55  ;;  %v10870_v36 = vadd.f32 %v13608_v62, %v13777_v32  ;;  %v10701_v32 = vpack.c.bf16 %v5118_v53, %v5117_v27 }
 0x6df   :  { %9354 = vmatprep.mubr.msk.f32.mxu0 %vm11893_vm1, %v11894_v56  ;;  %9451 = vmatprep.mubr.msk.f32.mxu1 %vm11893_vm1, %v11894_v56 }
 0x6e0   :  { %v13790_v35 = vpop.f32.mrb[168].mxu0  ;;  %v14062_v48 = vmax.f32 %v10870_v36, 0.0 }
 0x6e1   :  { %v13792_v43 = vpop.f32.mrb[169].mxu0 }
 0x6e2   :  { %9355 = vmatmul.mubr.msk.f32.gmra.mrb[204].mxu0 %vm4117_vm2, %v13773_v55  ;;  %9452 = vmatmul.mubr.msk.f32.gmra.mrb[28].mxu1 %vm4117_vm2, %v13787_v12 }
 0x6e3   :  { %9357 = vmatprep.mubr.msk.f32.mxu0 %vm11893_vm1, %v11894_v56  ;;  %9454 = vmatprep.mubr.msk.f32.mxu1 %vm11893_vm1, %v11894_v56 }
 0x6e4   :  { %v13805_v5 = vpop.f32.mrb[170].mxu0 }
 0x6e5   :  { %v13807_v47 = vpop.f32.mrb[171].mxu0 }
 0x6e6   :  { %9358 = vmatmul.mubr.msk.f32.gmra.mrb[206].mxu0 %vm4117_vm2, %v13787_v12  ;;  %9455 = vmatmul.mubr.msk.f32.gmra.mrb[30].mxu1 %vm4117_vm2, %v13803_v60 }
 0x6e7   :  { %9360 = vmatprep.mubr.msk.f32.mxu0 %vm11893_vm1, %v11894_v56  ;;  %9457 = vmatprep.mubr.msk.f32.mxu1 %vm11893_vm1, %v11894_v56 }
 0x6e8   :  { %v13820_v54 = vpop.f32.mrb[172].mxu0 }
 0x6e9   :  { %v13822_v23 = vpop.f32.mrb[173].mxu0 }
 0x6ea   :  { %9361 = vmatmul.mubr.msk.f32.gmra.mrb[208].mxu0 %vm4117_vm2, %v13803_v60  ;;  %9458 = vmatmul.mubr.msk.f32.gmra.mrb[32].mxu1 %vm4117_vm2, %v13817_v16 }
 0x6eb   :  { %9363 = vmatprep.mubr.msk.f32.mxu0 %vm11893_vm1, %v11894_v56  ;;  %9460 = vmatprep.mubr.msk.f32.mxu1 %vm11893_vm1, %v11894_v56 }
 0x6ec   :  { %v13836_v11 = vpop.f32.mrb[174].mxu0 }
 0x6ed   :  { %v13838_v18 = vpop.f32.mrb[175].mxu0 }
 0x6ee   :  { %9364 = vmatmul.mubr.msk.f32.gmra.mrb[210].mxu0 %vm4117_vm2, %v13817_v16  ;;  %9461 = vmatmul.mubr.msk.f32.gmra.mrb[34].mxu1 %vm4117_vm2, %v13834_v4 }
 0x6ef   :  { %9366 = vmatprep.mubr.msk.f32.mxu0 %vm11893_vm1, %v11894_v56  ;;  %9463 = vmatprep.mubr.msk.f32.mxu1 %vm11893_vm1, %v11894_v56 }
 0x6f2   :  { %9367 = vmatmul.mubr.msk.f32.gmra.mrb[212].mxu0 %vm4117_vm2, %v13834_v4  ;;  %9464 = vmatmul.mubr.msk.f32.gmra.mrb[36].mxu1 %vm4117_vm2, %v13848_v34 }
 0x6f3   :  { %9369 = vmatprep.mubr.msk.f32.mxu0 %vm11893_vm1, %v11894_v56  ;;  %9466 = vmatprep.mubr.msk.f32.mxu1 %vm11893_vm1, %v11894_v56 }
 0x6f6   :  { %9370 = vmatmul.mubr.msk.f32.gmra.mrb[214].mxu0 %vm4117_vm2, %v13848_v34  ;;  %9467 = vmatmul.mubr.msk.f32.gmra.mrb[38].mxu1 %vm4117_vm2, %v13862_v29 }
 0x6f7   :  { %9372 = vmatprep.mubr.msk.f32.mxu0 %vm11893_vm1, %v11894_v56  ;;  %9469 = vmatprep.mubr.msk.f32.mxu1 %vm11893_vm1, %v11894_v56 }
 0x6fa   :  { %9373 = vmatmul.mubr.msk.f32.gmra.mrb[216].mxu0 %vm4117_vm2, %v13862_v29  ;;  %9470 = vmatmul.mubr.msk.f32.gmra.mrb[40].mxu1 %vm4117_vm2, %v13872_v30 }
 0x6fb   :  { %9375 = vmatprep.mubr.msk.f32.mxu0 %vm11893_vm1, %v11894_v56  ;;  %9472 = vmatprep.mubr.msk.f32.mxu1 %vm11893_vm1, %v11894_v56 }
 0x6fe   :  { %9376 = vmatmul.mubr.msk.f32.gmra.mrb[218].mxu0 %vm4117_vm2, %v13872_v30  ;;  %9473 = vmatmul.mubr.msk.f32.gmra.mrb[42].mxu1 %vm4117_vm2, %v13886_v40 }
 0x6ff   :  { %9378 = vmatprep.mubr.msk.f32.mxu0 %vm11893_vm1, %v11894_v56  ;;  %9475 = vmatprep.mubr.msk.f32.mxu1 %vm11893_vm1, %v11894_v56 }
 0x702   :  { %9379 = vmatmul.mubr.msk.f32.gmra.mrb[220].mxu0 %vm4117_vm2, %v13886_v40  ;;  %9476 = vmatmul.mubr.msk.f32.gmra.mrb[44].mxu1 %vm4117_vm2, %v13896_v52 }
 0x703   :  { %9381 = vmatprep.mubr.msk.f32.mxu0 %vm11893_vm1, %v11894_v56  ;;  %9478 = vmatprep.mubr.msk.f32.mxu1 %vm11893_vm1, %v11894_v56 }
 0x706   :  { %9382 = vmatmul.mubr.msk.f32.gmra.mrb[222].mxu0 %vm4117_vm2, %v13896_v52  ;;  %9479 = vmatmul.mubr.msk.f32.gmra.mrb[46].mxu1 %vm4117_vm2, %v13910_v49 }
 0x707   :  { %9384 = vmatprep.mubr.msk.f32.mxu0 %vm11893_vm1, %v11894_v56  ;;  %9481 = vmatprep.mubr.msk.f32.mxu1 %vm11893_vm1, %v11894_v56 }
 0x70a   :  { %9385 = vmatmul.mubr.msk.f32.gmra.mrb[224].mxu0 %vm4117_vm2, %v13910_v49  ;;  %9482 = vmatmul.mubr.msk.f32.gmra.mrb[48].mxu1 %vm4117_vm2, %v13920_v59 }
 0x70b   :  { %9387 = vmatprep.mubr.msk.f32.mxu0 %vm11893_vm1, %v11894_v56  ;;  %9484 = vmatprep.mubr.msk.f32.mxu1 %vm11893_vm1, %v11894_v56 }
 0x70e   :  { %9388 = vmatmul.mubr.msk.f32.gmra.mrb[226].mxu0 %vm4117_vm2, %v13920_v59  ;;  %9485 = vmatmul.mubr.msk.f32.gmra.mrb[50].mxu1 %vm4117_vm2, %v13934_v2 }
 0x70f   :  { %9390 = vmatprep.mubr.msk.f32.mxu0 %vm11893_vm1, %v11894_v56  ;;  %9487 = vmatprep.mubr.msk.f32.mxu1 %vm11893_vm1, %v11894_v56 }
 0x712   :  { %9391 = vmatmul.mubr.msk.f32.gmra.mrb[228].mxu0 %vm4117_vm2, %v13934_v2  ;;  %9488 = vmatmul.mubr.msk.f32.gmra.mrb[52].mxu1 %vm4117_vm2, %v13944_v13 }
 0x713   :  { %9506 = vmatprep.mubr.msk.f32.mxu1 %vm11893_vm1, %v11894_v56 }
 0x716   :  { %9507 = vmatmul.mubr.msk.f32.vlgmr.msra.gmra.mrb[0].mxu1 %vm4117_vm2, %v13620_v45  ;;  %v4884_v45 = vld [vmem:[#allocation2 + $0xf0] sm:$0xff] }
 0x717   :  { %10690 = vmatpush3.bf16.msra.mxu1 %v10689_v41  ;;  %9509 = vmatprep.mubr.msk.f32.mxu1 %vm11893_vm1, %v11894_v56  ;;  %v10698_v7 = vpack.c.bf16 %v4885_v39, %v4884_v45  ;;  %v5124_v41 = vld [vmem:[#allocation2 + $0x138] sm:$0xff] }
 0x718   :  { %10691 = vmatprep.subr.bf16.mxu1 %v15237_v22 }
 0x71a   :  { %9510 = vmatmul.mubr.msk.f32.gmra.mrb[2].mxu1 %vm4117_vm2, %v13630_v58 }
 0x71b   :  { %9512 = vmatprep.mubr.msk.f32.mxu1 %vm11893_vm1, %v11894_v56  ;;  %10693 = vmatpush3.bf16.msra.mxu1 %v10692_v51  ;;  %v10710_v51 = vpack.c.bf16 %v5124_v41, %v5123_v37 }
 0x71c   :  { %10694 = vmatprep.subr.bf16.mxu1 %v15237_v22 }
 0x71e   :  { %9513 = vmatmul.mubr.msk.f32.gmra.mrb[4].mxu1 %vm4117_vm2, %v13643_v57 }
 0x71f   :  { %9515 = vmatprep.mubr.msk.f32.mxu1 %vm11893_vm1, %v11894_v56  ;;  %10696 = vmatpush3.bf16.msra.mxu1 %v10695_v21 }
 0x720   :  { %10697 = vmatprep.subr.bf16.mxu1 %v15237_v22 }
 0x722   :  { %9516 = vmatmul.mubr.msk.f32.gmra.mrb[6].mxu1 %vm4117_vm2, %v13654_v19 }
 0x723   :  { %9518 = vmatprep.mubr.msk.f32.mxu1 %vm11893_vm1, %v11894_v56  ;;  %10699 = vmatpush3.bf16.msra.mxu1 %v10698_v7 }
 0x724   :  { %10700 = vmatprep.subr.bf16.mxu1 %v15237_v22 }
 0x726   :  { %9519 = vmatmul.mubr.msk.f32.gmra.mrb[8].mxu1 %vm4117_vm2, %v13667_v38 }
 0x727   :  { %9521 = vmatprep.mubr.msk.f32.mxu1 %vm11893_vm1, %v11894_v56 }
 0x72a   :  { %9522 = vmatmul.mubr.msk.f32.gmra.mrb[10].mxu1 %vm4117_vm2, %v13677_v15 }
 0x72b   :  { %9524 = vmatprep.mubr.msk.f32.mxu1 %vm11893_vm1, %v11894_v56 }
 0x72e   :  { %9525 = vmatmul.mubr.msk.f32.gmra.mrb[12].mxu1 %vm4117_vm2, %v13689_v1 }
 0x72f   :  { %9527 = vmatprep.mubr.msk.f32.mxu1 %vm11893_vm1, %v11894_v56 }
 0x732   :  { %9528 = vmatmul.mubr.msk.f32.gmra.mrb[14].mxu1 %vm4117_vm2, %v13699_v26 }
 0x733   :  { %9530 = vmatprep.mubr.msk.f32.mxu1 %vm11893_vm1, %v11894_v56 }
 0x736   :  { %9531 = vmatmul.mubr.msk.f32.gmra.mrb[16].mxu1 %vm4117_vm2, %v13713_v25 }
 0x737   :  { %9533 = vmatprep.mubr.msk.f32.mxu1 %vm11893_vm1, %v11894_v56 }
 0x73a   :  { %9534 = vmatmul.mubr.msk.f32.gmra.mrb[18].mxu1 %vm4117_vm2, %v13727_v9 }
 0x73b   :  { %9536 = vmatprep.mubr.msk.f32.mxu1 %vm11893_vm1, %v11894_v56 }
 0x73e   :  { %9537 = vmatmul.mubr.msk.f32.gmra.mrb[20].mxu1 %vm4117_vm2, %v13743_v6 }
 0x73f   :  { %9539 = vmatprep.mubr.msk.f32.mxu1 %vm11893_vm1, %v11894_v56 }
 0x742   :  { %9540 = vmatmul.mubr.msk.f32.gmra.mrb[22].mxu1 %vm4117_vm2, %v13757_v31 }
 0x743   :  { %9542 = vmatprep.mubr.msk.f32.mxu1 %vm11893_vm1, %v11894_v56 }
 0x746   :  { %9543 = vmatmul.mubr.msk.f32.gmra.mrb[24].mxu1 %vm4117_vm2, %v13773_v55 }
 0x747   :  { %9545 = vmatprep.mubr.msk.f32.mxu1 %vm11893_vm1, %v11894_v56 }
 0x74a   :  { %9546 = vmatmul.mubr.msk.f32.gmra.mrb[26].mxu1 %vm4117_vm2, %v13787_v12 }
 0x74b   :  { %9548 = vmatprep.mubr.msk.f32.mxu1 %vm11893_vm1, %v11894_v56 }
 0x74e   :  { %9549 = vmatmul.mubr.msk.f32.gmra.mrb[28].mxu1 %vm4117_vm2, %v13803_v60 }
 0x74f   :  { %9551 = vmatprep.mubr.msk.f32.mxu1 %vm11893_vm1, %v11894_v56 }
 0x752   :  { %9552 = vmatmul.mubr.msk.f32.gmra.mrb[30].mxu1 %vm4117_vm2, %v13817_v16 }
 0x753   :  { %9554 = vmatprep.mubr.msk.f32.mxu1 %vm11893_vm1, %v11894_v56 }
 0x756   :  { %9555 = vmatmul.mubr.msk.f32.gmra.mrb[32].mxu1 %vm4117_vm2, %v13834_v4 }
 0x757   :  { %9557 = vmatprep.mubr.msk.f32.mxu1 %vm11893_vm1, %v11894_v56 }
 0x75a   :  { %9558 = vmatmul.mubr.msk.f32.gmra.mrb[34].mxu1 %vm4117_vm2, %v13848_v34 }
 0x75b   :  { %9560 = vmatprep.mubr.msk.f32.mxu1 %vm11893_vm1, %v11894_v56 }
 0x75e   :  { %9561 = vmatmul.mubr.msk.f32.gmra.mrb[36].mxu1 %vm4117_vm2, %v13862_v29 }
 0x75f   :  { %9563 = vmatprep.mubr.msk.f32.mxu1 %vm11893_vm1, %v11894_v56 }
 0x762   :  { %9564 = vmatmul.mubr.msk.f32.gmra.mrb[38].mxu1 %vm4117_vm2, %v13872_v30 }
 0x763   :  { %9566 = vmatprep.mubr.msk.f32.mxu1 %vm11893_vm1, %v11894_v56 }
 0x766   :  { %9567 = vmatmul.mubr.msk.f32.gmra.mrb[40].mxu1 %vm4117_vm2, %v13886_v40 }
 0x767   :  { %9569 = vmatprep.mubr.msk.f32.mxu1 %vm11893_vm1, %v11894_v56 }
 0x76a   :  { %9570 = vmatmul.mubr.msk.f32.gmra.mrb[42].mxu1 %vm4117_vm2, %v13896_v52 }
 0x76b   :  { %9572 = vmatprep.mubr.msk.f32.mxu1 %vm11893_vm1, %v11894_v56 }
 0x76e   :  { %9573 = vmatmul.mubr.msk.f32.gmra.mrb[44].mxu1 %vm4117_vm2, %v13910_v49 }
 0x76f   :  { %9575 = vmatprep.mubr.msk.f32.mxu1 %vm11893_vm1, %v11894_v56 }
 0x772   :  { %9576 = vmatmul.mubr.msk.f32.gmra.mrb[46].mxu1 %vm4117_vm2, %v13920_v59 }
 0x773   :  { %9578 = vmatprep.mubr.msk.f32.mxu1 %vm11893_vm1, %v11894_v56 }
 0x776   :  { %9579 = vmatmul.mubr.msk.f32.gmra.mrb[48].mxu1 %vm4117_vm2, %v13934_v2 }
 0x777   :  { %9581 = vmatprep.mubr.msk.f32.mxu1 %vm11893_vm1, %v11894_v56 }
 0x77a   :  { %9582 = vmatmul.mubr.msk.f32.gmra.mrb[50].mxu1 %vm4117_vm2, %v13944_v13 }
 0x77b   :  { %9584 = vmatprep.mubr.msk.f32.mxu1 %vm11893_vm1, %v11894_v56 }
 0x77d   :  { %v14064_v50 = vpop.f32.mrb[176].mxu0 }
 0x77e   :  { %v9314_v10 = vpop.f32.mrb[177].mxu0  ;;  %9585 = vmatmul.mubr.msk.f32.gmra.mrb[52].mxu1 %vm4117_vm2, %v14062_v48 }
 0x77f   :  { %9603 = vmatprep.mubr.msk.f32.mxu1 %vm11893_vm1, %v11894_v56 }
 0x781   :  { %v14070_v33 = vpop.f32.mrb[178].mxu0 }
 0x782   :  { %v9317_v61 = vpop.f32.mrb[179].mxu0  ;;  %9604 = vmatmul.mubr.msk.f32.vlgmr.msra.gmra.mrb[0].mxu1 %vm4117_vm2, %v13630_v58  ;;  %v10707_v58 = vpack.c.bf16 %v5122_v0, %v5121_v42 }
 0x783   :  { %10702 = vmatpush3.bf16.msra.mxu1 %v10701_v32  ;;  %9606 = vmatprep.mubr.msk.f32.mxu1 %vm11893_vm1, %v11894_v56 }
 0x784   :  { %10703 = vmatprep.subr.bf16.mxu1 %v15237_v22 }
 0x785   :  { %v14077_v44 = vpop.f32.mrb[180].mxu0 }
 0x786   :  { %v9320_v24 = vpop.f32.mrb[181].mxu0  ;;  %9607 = vmatmul.mubr.msk.f32.gmra.mrb[2].mxu1 %vm4117_vm2, %v13643_v57 }
 0x787   :  { %9609 = vmatprep.mubr.msk.f32.mxu1 %vm11893_vm1, %v11894_v56  ;;  %10705 = vmatpush3.bf16.msra.mxu1 %v10704_v17 }
 0x788   :  { %10706 = vmatprep.subr.bf16.mxu1 %v15237_v22 }
 0x789   :  { %v14084_v28 = vpop.f32.mrb[182].mxu0 }
 0x78a   :  { %v9323_v46 = vpop.f32.mrb[183].mxu0  ;;  %9610 = vmatmul.mubr.msk.f32.gmra.mrb[4].mxu1 %vm4117_vm2, %v13654_v19 }
 0x78b   :  { %9612 = vmatprep.mubr.msk.f32.mxu1 %vm11893_vm1, %v11894_v56  ;;  %10708 = vmatpush3.bf16.msra.mxu1 %v10707_v58 }
 0x78c   :  { %10709 = vmatprep.subr.bf16.mxu1 %v15237_v22 }
 0x78d   :  { %v14091_v3 = vpop.f32.mrb[184].mxu0 }
 0x78e   :  { %v9326_v14 = vpop.f32.mrb[185].mxu0  ;;  %9613 = vmatmul.mubr.msk.f32.gmra.mrb[6].mxu1 %vm4117_vm2, %v13667_v38 }
 0x78f   :  { %9615 = vmatprep.mubr.msk.f32.mxu1 %vm11893_vm1, %v11894_v56  ;;  %10711 = vmatpush3.bf16.msra.mxu1 %v10710_v51 }
 0x790   :  { %10712 = vmatprep.subr.bf16.mxu1 %v15237_v22 }
 0x791   :  { %v14098_v21 = vpop.f32.mrb[186].mxu0 }
 0x792   :  { %v9329_v45 = vpop.f32.mrb[187].mxu0  ;;  %9616 = vmatmul.mubr.msk.f32.gmra.mrb[8].mxu1 %vm4117_vm2, %v13677_v15 }
 0x793   :  { %9618 = vmatprep.mubr.msk.f32.mxu1 %vm11893_vm1, %v11894_v56 }
 0x795   :  { %v14104_v39 = vpop.f32.mrb[188].mxu0 }
 0x796   :  { %v9332_v7 = vpop.f32.mrb[189].mxu0  ;;  %9619 = vmatmul.mubr.msk.f32.gmra.mrb[10].mxu1 %vm4117_vm2, %v13689_v1 }
 0x797   :  { %9621 = vmatprep.mubr.msk.f32.mxu1 %vm11893_vm1, %v11894_v56 }
 0x799   :  { %v14110_v36 = vpop.f32.mrb[190].mxu0 }
 0x79a   :  { %v9335_v27 = vpop.f32.mrb[191].mxu0  ;;  %9622 = vmatmul.mubr.msk.f32.gmra.mrb[12].mxu1 %vm4117_vm2, %v13699_v26 }
 0x79b   :  { %9624 = vmatprep.mubr.msk.f32.mxu1 %vm11893_vm1, %v11894_v56 }
 0x79d   :  { %v14116_v53 = vpop.f32.mrb[192].mxu0 }
 0x79e   :  { %v9338_v10 = vpop.f32.mrb[193].mxu0  ;;  %9625 = vmatmul.mubr.msk.f32.gmra.mrb[14].mxu1 %vm4117_vm2, %v13713_v25 }
 0x79f   :  { %9627 = vmatprep.mubr.msk.f32.mxu1 %vm11893_vm1, %v11894_v56 }
 0x7a1   :  { %v14122_v32 = vpop.f32.mrb[194].mxu0 }
 0x7a2   :  { %v9341_v8 = vpop.f32.mrb[195].mxu0  ;;  %9628 = vmatmul.mubr.msk.f32.gmra.mrb[16].mxu1 %vm4117_vm2, %v13727_v9 }
 0x7a3   :  { %9630 = vmatprep.mubr.msk.f32.mxu1 %vm11893_vm1, %v11894_v56 }
 0x7a5   :  { %v14128_v20 = vpop.f32.mrb[196].mxu0 }
 0x7a6   :  { %v9344_v61 = vpop.f32.mrb[197].mxu0  ;;  %9631 = vmatmul.mubr.msk.f32.gmra.mrb[18].mxu1 %vm4117_vm2, %v13743_v6 }
 0x7a7   :  { %9633 = vmatprep.mubr.msk.f32.mxu1 %vm11893_vm1, %v11894_v56 }
 0x7a9   :  { %v14134_v17 = vpop.f32.mrb[198].mxu0 }
 0x7aa   :  { %v9347_v42 = vpop.f32.mrb[199].mxu0  ;;  %9634 = vmatmul.mubr.msk.f32.gmra.mrb[20].mxu1 %vm4117_vm2, %v13757_v31 }
 0x7ab   :  { %9636 = vmatprep.mubr.msk.f32.mxu1 %vm11893_vm1, %v11894_v56 }
 0x7ad   :  { %v14140_v0 = vpop.f32.mrb[200].mxu0 }
 0x7ae   :  { %v9350_v24 = vpop.f32.mrb[201].mxu0  ;;  %9637 = vmatmul.mubr.msk.f32.gmra.mrb[22].mxu1 %vm4117_vm2, %v13773_v55 }
 0x7af   :  { %9639 = vmatprep.mubr.msk.f32.mxu1 %vm11893_vm1, %v11894_v56 }
 0x7b1   :  { %v14146_v58 = vpop.f32.mrb[202].mxu0 }
 0x7b2   :  { %v9353_v37 = vpop.f32.mrb[203].mxu0  ;;  %9640 = vmatmul.mubr.msk.f32.gmra.mrb[24].mxu1 %vm4117_vm2, %v13787_v12 }
 0x7b3   :  { %9642 = vmatprep.mubr.msk.f32.mxu1 %vm11893_vm1, %v11894_v56 }
 0x7b5   :  { %v14152_v41 = vpop.f32.mrb[204].mxu0 }
 0x7b6   :  { %v9356_v46 = vpop.f32.mrb[205].mxu0  ;;  %9643 = vmatmul.mubr.msk.f32.gmra.mrb[26].mxu1 %vm4117_vm2, %v13803_v60 }
 0x7b7   :  { %9645 = vmatprep.mubr.msk.f32.mxu1 %vm11893_vm1, %v11894_v56 }
 0x7b9   :  { %v14158_v51 = vpop.f32.mrb[206].mxu0 }
 0x7ba   :  { %v9359_v14 = vpop.f32.mrb[207].mxu0  ;;  %9646 = vmatmul.mubr.msk.f32.gmra.mrb[28].mxu1 %vm4117_vm2, %v13817_v16 }
 0x7bb   :  { %9648 = vmatprep.mubr.msk.f32.mxu1 %vm11893_vm1, %v11894_v56 }
 0x7bd   :  { %v14164_v45 = vpop.f32.mrb[208].mxu0 }
 0x7be   :  { %v9362_v7 = vpop.f32.mrb[209].mxu0  ;;  %9649 = vmatmul.mubr.msk.f32.gmra.mrb[30].mxu1 %vm4117_vm2, %v13834_v4 }
 0x7bf   :  { %9651 = vmatprep.mubr.msk.f32.mxu1 %vm11893_vm1, %v11894_v56 }
 0x7c1   :  { %v14170_v27 = vpop.f32.mrb[210].mxu0 }
 0x7c2   :  { %v9365_v10 = vpop.f32.mrb[211].mxu0  ;;  %9652 = vmatmul.mubr.msk.f32.gmra.mrb[32].mxu1 %vm4117_vm2, %v13848_v34 }
 0x7c3   :  { %9654 = vmatprep.mubr.msk.f32.mxu1 %vm11893_vm1, %v11894_v56 }
 0x7c5   :  { %v14176_v8 = vpop.f32.mrb[212].mxu0 }
 0x7c6   :  { %v9368_v61 = vpop.f32.mrb[213].mxu0  ;;  %9655 = vmatmul.mubr.msk.f32.gmra.mrb[34].mxu1 %vm4117_vm2, %v13862_v29 }
 0x7c7   :  { %9657 = vmatprep.mubr.msk.f32.mxu1 %vm11893_vm1, %v11894_v56 }
 0x7c9   :  { %v14182_v42 = vpop.f32.mrb[214].mxu0 }
 0x7ca   :  { %15239 = vst [vmem:[#allocation8_spill] sm:$0xff] %v14182_v42  ;;  %v9371_v24 = vpop.f32.mrb[215].mxu0  ;;  %9658 = vmatmul.mubr.msk.f32.gmra.mrb[36].mxu1 %vm4117_vm2, %v13872_v30  ;;  %v5361_v42 = vld [vmem:[#allocation2 + $0x168] sm:$0xff] }
 0x7cb   :  { %9660 = vmatprep.mubr.msk.f32.mxu1 %vm11893_vm1, %v11894_v56 }
 0x7cd   :  { %v14188_v37 = vpop.f32.mrb[216].mxu0 }
 0x7ce   :  { %15240 = vst [vmem:[#allocation9_spill] sm:$0xff] %v14188_v37  ;;  %v9374_v46 = vpop.f32.mrb[217].mxu0  ;;  %9661 = vmatmul.mubr.msk.f32.gmra.mrb[38].mxu1 %vm4117_vm2, %v13886_v40  ;;  %v5360_v37 = vld [vmem:[#allocation2 + $0x160] sm:$0xff] }
 0x7cf   :  { %9663 = vmatprep.mubr.msk.f32.mxu1 %vm11893_vm1, %v11894_v56 }
 0x7d1   :  { %v14194_v14 = vpop.f32.mrb[218].mxu0 }
 0x7d2   :  { %15241 = vst [vmem:[#allocation10_spill] sm:$0xff] %v14194_v14  ;;  %v9377_v7 = vpop.f32.mrb[219].mxu0  ;;  %9664 = vmatmul.mubr.msk.f32.gmra.mrb[40].mxu1 %vm4117_vm2, %v13896_v52  ;;  %v5358_v14 = vld [vmem:[#allocation2 + $0x150] sm:$0xff] }
 0x7d3   :  { %9666 = vmatprep.mubr.msk.f32.mxu1 %vm11893_vm1, %v11894_v56 }
 0x7d5   :  { %v14200_v10 = vpop.f32.mrb[220].mxu0 }
 0x7d6   :  { %15242 = vst [vmem:[#allocation11_spill] sm:$0xff] %v14200_v10  ;;  %v9380_v61 = vpop.f32.mrb[221].mxu0  ;;  %9667 = vmatmul.mubr.msk.f32.gmra.mrb[42].mxu1 %vm4117_vm2, %v13910_v49 }
 0x7d7   :  { %9669 = vmatprep.mubr.msk.f32.mxu1 %vm11893_vm1, %v11894_v56 }
 0x7d9   :  { %v14206_v24 = vpop.f32.mrb[222].mxu0 }
 0x7da   :  { %15243 = vst [vmem:[#allocation12_spill] sm:$0xff] %v14206_v24  ;;  %v9383_v46 = vpop.f32.mrb[223].mxu0  ;;  %9670 = vmatmul.mubr.msk.f32.gmra.mrb[44].mxu1 %vm4117_vm2, %v13920_v59  ;;  %v5357_v24 = vld [vmem:[#allocation2 + $0x148] sm:$0xff] }
 0x7db   :  { %9672 = vmatprep.mubr.msk.f32.mxu1 %vm11893_vm1, %v11894_v56  ;;  %v10869_v46 = vadd.f32 %v13775_v63, %v13608_v62 }
 0x7dd   :  { %v14212_v7 = vpop.f32.mrb[224].mxu0 }
 0x7de   :  { %15244 = vst [vmem:[#allocation13_spill] sm:$0xff] %v14212_v7  ;;  %v9386_v22 = vpop.f32.mrb[225].mxu0  ;;  %9673 = vmatmul.mubr.msk.f32.gmra.mrb[46].mxu1 %vm4117_vm2, %v13934_v2 }
 0x7df   :  { %9675 = vmatprep.mubr.msk.f32.mxu1 %vm11893_vm1, %v11894_v56 }
 0x7e1   :  { %v14218_v61 = vpop.f32.mrb[226].mxu0 }
 0x7e2   :  { %15245 = vst [vmem:[#allocation14_spill] sm:$0xff] %v14218_v61  ;;  %v9389_v10 = vpop.f32.mrb[227].mxu0  ;;  %9676 = vmatmul.mubr.msk.f32.gmra.mrb[48].mxu1 %vm4117_vm2, %v13944_v13  ;;  %v14232_v61 = vmax.f32 %v10869_v46, 0.0 }
 0x7e3   :  { %9678 = vmatprep.mubr.msk.f32.mxu1 %vm11893_vm1, %v11894_v56  ;;  %v5356_v10 = vld [vmem:[#allocation2 + $0x140] sm:$0xff] }
 0x7e4   :  { %v10713_v63 = vpack.c.bf16 %v5357_v24, %v5356_v10  ;;  %v10719_v24 = vpack.c.bf16 %v5361_v42, %v5360_v37  ;;  %v5363_v10 = vld [vmem:[#allocation2 + $0x178] sm:$0xff]  ;;  %v10872_v42 = vadd.f32 %v13608_v62, %v13792_v43  ;;  %v5599_v43 = vld [vmem:[#allocation2 + $0x1a0] sm:$0xff] }
 0x7e5   :  { %v14226_v7 = vpop.f32.mrb[228].mxu0 }
 0x7e6   :  { %15246 = vst [vmem:[#allocation15_spill] sm:$0xff] %v14226_v7  ;;  %v9392_v22 = vpop.f32.mrb[229].mxu0  ;;  %9679 = vmatmul.mubr.msk.f32.gmra.mrb[50].mxu1 %vm4117_vm2, %v14062_v48  ;;  %v5359_v7 = vld [vmem:[#allocation2 + $0x158] sm:$0xff]  ;;  %v14348_v37 = vmax.f32 %v10872_v42, 0.0 }
 0x7e7   :  { %9681 = vmatprep.mubr.msk.f32.mxu1 %vm11893_vm1, %v11894_v56  ;;  %v10716_v46 = vpack.c.bf16 %v5359_v7, %v5358_v14  ;;  %v15247_v22 = vmov 0.0|0.0   ;;  %v5595_v7 = vld [vmem:[#allocation2 + $0x180] sm:$0xff]  ;;  %v5602_v42 = vld [vmem:[#allocation2 + $0x1b8] sm:$0xff] }
 0x7ea   :  { %9682 = vmatmul.mubr.msk.f32.gmra.mrb[52].mxu1 %vm4117_vm2, %v14232_v61 }
 0x7eb   :  { %9700 = vmatprep.mubr.msk.f32.mxu1 %vm11893_vm1, %v11894_v56 }
 0x7ee   :  { %9701 = vmatmul.mubr.msk.f32.vlgmr.msra.gmra.mrb[0].mxu1 %vm4117_vm2, %v13643_v57  ;;  %v5362_v57 = vld [vmem:[#allocation2 + $0x170] sm:$0xff] }
 0x7ef   :  { %10714 = vmatpush3.bf16.msra.mxu1 %v10713_v63  ;;  %9703 = vmatprep.mubr.msk.f32.mxu1 %vm11893_vm1, %v11894_v56  ;;  %v10722_v14 = vpack.c.bf16 %v5363_v10, %v5362_v57  ;;  %v5596_v63 = vld [vmem:[#allocation2 + $0x188] sm:$0xff]  ;;  %v5598_v57 = vld [vmem:[#allocation2 + $0x198] sm:$0xff] }
 0x7f0   :  { %10715 = vmatprep.subr.bf16.mxu1 %v15247_v22  ;;  %v5600_v10 = vld [vmem:[#allocation2 + $0x1a8] sm:$0xff] }
 0x7f2   :  { %9704 = vmatmul.mubr.msk.f32.gmra.mrb[2].mxu1 %vm4117_vm2, %v13654_v19 }
 0x7f3   :  { %9706 = vmatprep.mubr.msk.f32.mxu1 %vm11893_vm1, %v11894_v56  ;;  %10717 = vmatpush3.bf16.msra.mxu1 %v10716_v46  ;;  %v10725_v46 = vpack.c.bf16 %v5596_v63, %v5595_v7  ;;  %v14461_v63 = vld [vmem:[%s15233_s5] ss:$0 sm:$0xff] }
 0x7f4   :  { %10718 = vmatprep.subr.bf16.mxu1 %v15247_v22 }
 0x7f6   :  { %9707 = vmatmul.mubr.msk.f32.gmra.mrb[4].mxu1 %vm4117_vm2, %v13667_v38 }
 0x7f7   :  { %9709 = vmatprep.mubr.msk.f32.mxu1 %vm11893_vm1, %v11894_v56  ;;  %10720 = vmatpush3.bf16.msra.mxu1 %v10719_v24  ;;  %v5597_v24 = vld [vmem:[#allocation2 + $0x190] sm:$0xff] }
 0x7f8   :  { %10721 = vmatprep.subr.bf16.mxu1 %v15247_v22  ;;  %v10728_v62 = vpack.c.bf16 %v5598_v57, %v5597_v24  ;;  %v5834_v57 = vld [vmem:[#allocation2 + $0x1c0] sm:$0xff] }
 0x7fa   :  { %9710 = vmatmul.mubr.msk.f32.gmra.mrb[6].mxu1 %vm4117_vm2, %v13677_v15 }
 0x7fb   :  { %9712 = vmatprep.mubr.msk.f32.mxu1 %vm11893_vm1, %v11894_v56  ;;  %10723 = vmatpush3.bf16.msra.mxu1 %v10722_v14  ;;  %v10731_v14 = vpack.c.bf16 %v5600_v10, %v5599_v43  ;;  %v5836_v10 = vld [vmem:[#allocation2 + $0x1d0] sm:$0xff] }
 0x7fc   :  { %10724 = vmatprep.subr.bf16.mxu1 %v15247_v22 }
 0x7fe   :  { %9713 = vmatmul.mubr.msk.f32.gmra.mrb[8].mxu1 %vm4117_vm2, %v13689_v1 }
 0x7ff   :  { %9715 = vmatprep.mubr.msk.f32.mxu1 %vm11893_vm1, %v11894_v56 }
 0x802   :  { %9716 = vmatmul.mubr.msk.f32.gmra.mrb[10].mxu1 %vm4117_vm2, %v13699_v26 }
 0x803   :  { %9718 = vmatprep.mubr.msk.f32.mxu1 %vm11893_vm1, %v11894_v56 }
 0x806   :  { %9719 = vmatmul.mubr.msk.f32.gmra.mrb[12].mxu1 %vm4117_vm2, %v13713_v25 }
 0x807   :  { %9721 = vmatprep.mubr.msk.f32.mxu1 %vm11893_vm1, %v11894_v56 }
 0x80a   :  { %9722 = vmatmul.mubr.msk.f32.gmra.mrb[14].mxu1 %vm4117_vm2, %v13727_v9 }
 0x80b   :  { %9724 = vmatprep.mubr.msk.f32.mxu1 %vm11893_vm1, %v11894_v56 }
 0x80e   :  { %9725 = vmatmul.mubr.msk.f32.gmra.mrb[16].mxu1 %vm4117_vm2, %v13743_v6 }
 0x80f   :  { %9727 = vmatprep.mubr.msk.f32.mxu1 %vm11893_vm1, %v11894_v56 }
 0x812   :  { %9728 = vmatmul.mubr.msk.f32.gmra.mrb[18].mxu1 %vm4117_vm2, %v13757_v31 }
 0x813   :  { %9730 = vmatprep.mubr.msk.f32.mxu1 %vm11893_vm1, %v11894_v56 }
 0x816   :  { %9731 = vmatmul.mubr.msk.f32.gmra.mrb[20].mxu1 %vm4117_vm2, %v13773_v55 }
 0x817   :  { %9733 = vmatprep.mubr.msk.f32.mxu1 %vm11893_vm1, %v11894_v56 }
 0x81a   :  { %9734 = vmatmul.mubr.msk.f32.gmra.mrb[22].mxu1 %vm4117_vm2, %v13787_v12 }
 0x81b   :  { %9736 = vmatprep.mubr.msk.f32.mxu1 %vm11893_vm1, %v11894_v56 }
 0x81e   :  { %9737 = vmatmul.mubr.msk.f32.gmra.mrb[24].mxu1 %vm4117_vm2, %v13803_v60 }
 0x81f   :  { %9739 = vmatprep.mubr.msk.f32.mxu1 %vm11893_vm1, %v11894_v56 }
 0x822   :  { %9740 = vmatmul.mubr.msk.f32.gmra.mrb[26].mxu1 %vm4117_vm2, %v13817_v16 }
 0x823   :  { %9742 = vmatprep.mubr.msk.f32.mxu1 %vm11893_vm1, %v11894_v56 }
 0x826   :  { %9743 = vmatmul.mubr.msk.f32.gmra.mrb[28].mxu1 %vm4117_vm2, %v13834_v4 }
 0x827   :  { %9745 = vmatprep.mubr.msk.f32.mxu1 %vm11893_vm1, %v11894_v56 }
 0x82a   :  { %9746 = vmatmul.mubr.msk.f32.gmra.mrb[30].mxu1 %vm4117_vm2, %v13848_v34 }
 0x82b   :  { %9748 = vmatprep.mubr.msk.f32.mxu1 %vm11893_vm1, %v11894_v56 }
 0x82e   :  { %9749 = vmatmul.mubr.msk.f32.gmra.mrb[32].mxu1 %vm4117_vm2, %v13862_v29 }
 0x82f   :  { %9751 = vmatprep.mubr.msk.f32.mxu1 %vm11893_vm1, %v11894_v56 }
 0x832   :  { %9752 = vmatmul.mubr.msk.f32.gmra.mrb[34].mxu1 %vm4117_vm2, %v13872_v30 }
 0x833   :  { %9754 = vmatprep.mubr.msk.f32.mxu1 %vm11893_vm1, %v11894_v56 }
 0x836   :  { %9755 = vmatmul.mubr.msk.f32.gmra.mrb[36].mxu1 %vm4117_vm2, %v13886_v40 }
 0x837   :  { %9757 = vmatprep.mubr.msk.f32.mxu1 %vm11893_vm1, %v11894_v56 }
 0x83a   :  { %9758 = vmatmul.mubr.msk.f32.gmra.mrb[38].mxu1 %vm4117_vm2, %v13896_v52 }
 0x83b   :  { %9760 = vmatprep.mubr.msk.f32.mxu1 %vm11893_vm1, %v11894_v56 }
 0x83e   :  { %9761 = vmatmul.mubr.msk.f32.gmra.mrb[40].mxu1 %vm4117_vm2, %v13910_v49 }
 0x83f   :  { %9763 = vmatprep.mubr.msk.f32.mxu1 %vm11893_vm1, %v11894_v56 }
 0x842   :  { %9764 = vmatmul.mubr.msk.f32.gmra.mrb[42].mxu1 %vm4117_vm2, %v13920_v59 }
 0x843   :  { %9766 = vmatprep.mubr.msk.f32.mxu1 %vm11893_vm1, %v11894_v56 }
 0x846   :  { %9767 = vmatmul.mubr.msk.f32.gmra.mrb[44].mxu1 %vm4117_vm2, %v13934_v2 }
 0x847   :  { %9769 = vmatprep.mubr.msk.f32.mxu1 %vm11893_vm1, %v11894_v56 }
 0x84a   :  { %9770 = vmatmul.mubr.msk.f32.gmra.mrb[46].mxu1 %vm4117_vm2, %v13944_v13 }
 0x84b   :  { %9772 = vmatprep.mubr.msk.f32.mxu1 %vm11893_vm1, %v11894_v56 }
 0x84e   :  { %9773 = vmatmul.mubr.msk.f32.gmra.mrb[48].mxu1 %vm4117_vm2, %v14062_v48 }
 0x84f   :  { %9775 = vmatprep.mubr.msk.f32.mxu1 %vm11893_vm1, %v11894_v56 }
 0x852   :  { %9776 = vmatmul.mubr.msk.f32.gmra.mrb[50].mxu1 %vm4117_vm2, %v14232_v61 }
 0x853   :  { %9778 = vmatprep.mubr.msk.f32.mxu1 %vm11893_vm1, %v11894_v56 }
 0x856   :  { %9779 = vmatmul.mubr.msk.f32.gmra.mrb[52].mxu1 %vm4117_vm2, %v14348_v37 }
 0x857   :  { %9797 = vmatprep.mubr.msk.f32.mxu1 %vm11893_vm1, %v11894_v56 }
 0x85a   :  { %9798 = vmatmul.mubr.msk.f32.vlgmr.msra.gmra.mrb[0].mxu1 %vm4117_vm2, %v13654_v19  ;;  %v5601_v19 = vld [vmem:[#allocation2 + $0x1b0] sm:$0xff] }
 0x85b   :  { %10726 = vmatpush3.bf16.msra.mxu1 %v10725_v46  ;;  %9800 = vmatprep.mubr.msk.f32.mxu1 %vm11893_vm1, %v11894_v56  ;;  %v10734_v7 = vpack.c.bf16 %v5602_v42, %v5601_v19  ;;  %v10871_v46 = vadd.f32 %v14461_v63, %v13790_v35  ;;  %v5838_v19 = vld [vmem:[#allocation2 + $0x1e0] sm:$0xff]  ;;  %v5839_v42 = vld [vmem:[#allocation2 + $0x1e8] sm:$0xff] }
 0x85c   :  { %10727 = vmatprep.subr.bf16.mxu1 %v15247_v22 }
 0x85d   :  { %v14469_v24 = vmax.f32 %v10871_v46, 0.0  ;;  %v5841_v46 = vld [vmem:[#allocation2 + $0x1f8] sm:$0xff] }
 0x85e   :  { %9801 = vmatmul.mubr.msk.f32.gmra.mrb[2].mxu1 %vm4117_vm2, %v13667_v38 }
 0x85f   :  { %9803 = vmatprep.mubr.msk.f32.mxu1 %vm11893_vm1, %v11894_v56  ;;  %10729 = vmatpush3.bf16.msra.mxu1 %v10728_v62  ;;  %v5835_v62 = vld [vmem:[#allocation2 + $0x1c8] sm:$0xff] }
 0x860   :  { %10730 = vmatprep.subr.bf16.mxu1 %v15247_v22  ;;  %v10737_v43 = vpack.c.bf16 %v5835_v62, %v5834_v57  ;;  %v10874_v62 = vadd.f32 %v14461_v63, %v13807_v47 }
 0x862   :  { %9804 = vmatmul.mubr.msk.f32.gmra.mrb[4].mxu1 %vm4117_vm2, %v13677_v15 }
 0x863   :  { %9806 = vmatprep.mubr.msk.f32.mxu1 %vm11893_vm1, %v11894_v56  ;;  %10732 = vmatpush3.bf16.msra.mxu1 %v10731_v14  ;;  %v5837_v14 = vld [vmem:[#allocation2 + $0x1d8] sm:$0xff] }
 0x864   :  { %10733 = vmatprep.subr.bf16.mxu1 %v15247_v22  ;;  %v10740_v35 = vpack.c.bf16 %v5837_v14, %v5836_v10  ;;  %v6073_v10 = vld [vmem:[#allocation2 + $0x200] sm:$0xff]  ;;  %v6074_v14 = vld [vmem:[#allocation2 + $0x208] sm:$0xff] }
 0x866   :  { %9807 = vmatmul.mubr.msk.f32.gmra.mrb[6].mxu1 %vm4117_vm2, %v13689_v1 }
 0x867   :  { %9809 = vmatprep.mubr.msk.f32.mxu1 %vm11893_vm1, %v11894_v56  ;;  %10735 = vmatpush3.bf16.msra.mxu1 %v10734_v7  ;;  %v10743_v7 = vpack.c.bf16 %v5839_v42, %v5838_v19  ;;  %v6075_v19 = vld [vmem:[#allocation2 + $0x210] sm:$0xff]  ;;  %v6076_v42 = vld [vmem:[#allocation2 + $0x218] sm:$0xff] }
 0x868   :  { %10736 = vmatprep.subr.bf16.mxu1 %v15247_v22  ;;  %v10752_v47 = vpack.c.bf16 %v6076_v42, %v6075_v19  ;;  %v6313_v19 = vld [vmem:[#allocation2 + $0x248] sm:$0xff] }
 0x86a   :  { %9810 = vmatmul.mubr.msk.f32.gmra.mrb[8].mxu1 %vm4117_vm2, %v13699_v26 }
 0x86b   :  { %9812 = vmatprep.mubr.msk.f32.mxu1 %vm11893_vm1, %v11894_v56 }
 0x86e   :  { %9813 = vmatmul.mubr.msk.f32.gmra.mrb[10].mxu1 %vm4117_vm2, %v13713_v25 }
 0x86f   :  { %9815 = vmatprep.mubr.msk.f32.mxu1 %vm11893_vm1, %v11894_v56 }
 0x872   :  { %9816 = vmatmul.mubr.msk.f32.gmra.mrb[12].mxu1 %vm4117_vm2, %v13727_v9 }
 0x873   :  { %9818 = vmatprep.mubr.msk.f32.mxu1 %vm11893_vm1, %v11894_v56 }
 0x876   :  { %9819 = vmatmul.mubr.msk.f32.gmra.mrb[14].mxu1 %vm4117_vm2, %v13743_v6 }
 0x877   :  { %9821 = vmatprep.mubr.msk.f32.mxu1 %vm11893_vm1, %v11894_v56 }
 0x87a   :  { %9822 = vmatmul.mubr.msk.f32.gmra.mrb[16].mxu1 %vm4117_vm2, %v13757_v31 }
 0x87b   :  { %9824 = vmatprep.mubr.msk.f32.mxu1 %vm11893_vm1, %v11894_v56 }
 0x87e   :  { %9825 = vmatmul.mubr.msk.f32.gmra.mrb[18].mxu1 %vm4117_vm2, %v13773_v55 }
 0x87f   :  { %9827 = vmatprep.mubr.msk.f32.mxu1 %vm11893_vm1, %v11894_v56 }
 0x882   :  { %9828 = vmatmul.mubr.msk.f32.gmra.mrb[20].mxu1 %vm4117_vm2, %v13787_v12 }
 0x883   :  { %9830 = vmatprep.mubr.msk.f32.mxu1 %vm11893_vm1, %v11894_v56 }
 0x886   :  { %9831 = vmatmul.mubr.msk.f32.gmra.mrb[22].mxu1 %vm4117_vm2, %v13803_v60 }
 0x887   :  { %9833 = vmatprep.mubr.msk.f32.mxu1 %vm11893_vm1, %v11894_v56 }
 0x88a   :  { %9834 = vmatmul.mubr.msk.f32.gmra.mrb[24].mxu1 %vm4117_vm2, %v13817_v16 }
 0x88b   :  { %9836 = vmatprep.mubr.msk.f32.mxu1 %vm11893_vm1, %v11894_v56 }
 0x88e   :  { %9837 = vmatmul.mubr.msk.f32.gmra.mrb[26].mxu1 %vm4117_vm2, %v13834_v4 }
 0x88f   :  { %9839 = vmatprep.mubr.msk.f32.mxu1 %vm11893_vm1, %v11894_v56 }
 0x892   :  { %9840 = vmatmul.mubr.msk.f32.gmra.mrb[28].mxu1 %vm4117_vm2, %v13848_v34 }
 0x893   :  { %9842 = vmatprep.mubr.msk.f32.mxu1 %vm11893_vm1, %v11894_v56 }
 0x896   :  { %9843 = vmatmul.mubr.msk.f32.gmra.mrb[30].mxu1 %vm4117_vm2, %v13862_v29 }
 0x897   :  { %9845 = vmatprep.mubr.msk.f32.mxu1 %vm11893_vm1, %v11894_v56 }
 0x89a   :  { %9846 = vmatmul.mubr.msk.f32.gmra.mrb[32].mxu1 %vm4117_vm2, %v13872_v30 }
 0x89b   :  { %9848 = vmatprep.mubr.msk.f32.mxu1 %vm11893_vm1, %v11894_v56 }
 0x89e   :  { %9849 = vmatmul.mubr.msk.f32.gmra.mrb[34].mxu1 %vm4117_vm2, %v13886_v40 }
 0x89f   :  { %9851 = vmatprep.mubr.msk.f32.mxu1 %vm11893_vm1, %v11894_v56 }
 0x8a2   :  { %9852 = vmatmul.mubr.msk.f32.gmra.mrb[36].mxu1 %vm4117_vm2, %v13896_v52 }
 0x8a3   :  { %9854 = vmatprep.mubr.msk.f32.mxu1 %vm11893_vm1, %v11894_v56 }
 0x8a6   :  { %9855 = vmatmul.mubr.msk.f32.gmra.mrb[38].mxu1 %vm4117_vm2, %v13910_v49 }
 0x8a7   :  { %9857 = vmatprep.mubr.msk.f32.mxu1 %vm11893_vm1, %v11894_v56 }
 0x8aa   :  { %9858 = vmatmul.mubr.msk.f32.gmra.mrb[40].mxu1 %vm4117_vm2, %v13920_v59 }
 0x8ab   :  { %9860 = vmatprep.mubr.msk.f32.mxu1 %vm11893_vm1, %v11894_v56 }
 0x8ae   :  { %9861 = vmatmul.mubr.msk.f32.gmra.mrb[42].mxu1 %vm4117_vm2, %v13934_v2 }
 0x8af   :  { %9863 = vmatprep.mubr.msk.f32.mxu1 %vm11893_vm1, %v11894_v56 }
 0x8b2   :  { %9864 = vmatmul.mubr.msk.f32.gmra.mrb[44].mxu1 %vm4117_vm2, %v13944_v13 }
 0x8b3   :  { %9866 = vmatprep.mubr.msk.f32.mxu1 %vm11893_vm1, %v11894_v56 }
 0x8b6   :  { %9867 = vmatmul.mubr.msk.f32.gmra.mrb[46].mxu1 %vm4117_vm2, %v14062_v48 }
 0x8b7   :  { %9869 = vmatprep.mubr.msk.f32.mxu1 %vm11893_vm1, %v11894_v56 }
 0x8ba   :  { %9870 = vmatmul.mubr.msk.f32.gmra.mrb[48].mxu1 %vm4117_vm2, %v14232_v61 }
 0x8bb   :  { %9872 = vmatprep.mubr.msk.f32.mxu1 %vm11893_vm1, %v11894_v56 }
 0x8be   :  { %9873 = vmatmul.mubr.msk.f32.gmra.mrb[50].mxu1 %vm4117_vm2, %v14348_v37 }
 0x8bf   :  { %9875 = vmatprep.mubr.msk.f32.mxu1 %vm11893_vm1, %v11894_v56 }
 0x8c2   :  { %9876 = vmatmul.mubr.msk.f32.gmra.mrb[52].mxu1 %vm4117_vm2, %v14469_v24 }
 0x8c3   :  { %9894 = vmatprep.mubr.msk.f32.mxu1 %vm11893_vm1, %v11894_v56 }
 0x8c6   :  { %9895 = vmatmul.mubr.msk.f32.vlgmr.msra.gmra.mrb[0].mxu1 %vm4117_vm2, %v13667_v38  ;;  %v5840_v38 = vld [vmem:[#allocation2 + $0x1f0] sm:$0xff] }
 0x8c7   :  { %10738 = vmatpush3.bf16.msra.mxu1 %v10737_v43  ;;  %9897 = vmatprep.mubr.msk.f32.mxu1 %vm11893_vm1, %v11894_v56  ;;  %v10746_v57 = vpack.c.bf16 %v5841_v46, %v5840_v38  ;;  %v14585_v43 = vmax.f32 %v10874_v62, 0.0  ;;  %v6078_v38 = vld [vmem:[#allocation2 + $0x228] sm:$0xff] }
 0x8c8   :  { %10739 = vmatprep.subr.bf16.mxu1 %v15247_v22 }
 0x8ca   :  { %9898 = vmatmul.mubr.msk.f32.gmra.mrb[2].mxu1 %vm4117_vm2, %v13677_v15 }
 0x8cb   :  { %9900 = vmatprep.mubr.msk.f32.mxu1 %vm11893_vm1, %v11894_v56  ;;  %10741 = vmatpush3.bf16.msra.mxu1 %v10740_v35  ;;  %v10749_v35 = vpack.c.bf16 %v6074_v14, %v6073_v10  ;;  %v10873_v10 = vadd.f32 %v14461_v63, %v13805_v5 }
 0x8cc   :  { %10742 = vmatprep.subr.bf16.mxu1 %v15247_v22 }
 0x8cd   :  { %v14701_v14 = vmax.f32 %v10873_v10, 0.0  ;;  %v10876_v10 = vadd.f32 %v14461_v63, %v13822_v23 }
 0x8ce   :  { %9901 = vmatmul.mubr.msk.f32.gmra.mrb[4].mxu1 %vm4117_vm2, %v13689_v1 }
 0x8cf   :  { %9903 = vmatprep.mubr.msk.f32.mxu1 %vm11893_vm1, %v11894_v56  ;;  %10744 = vmatpush3.bf16.msra.mxu1 %v10743_v7  ;;  %v6077_v7 = vld [vmem:[#allocation2 + $0x220] sm:$0xff] }
 0x8d0   :  { %10745 = vmatprep.subr.bf16.mxu1 %v15247_v22  ;;  %v10755_v46 = vpack.c.bf16 %v6078_v38, %v6077_v7  ;;  %v6315_v7 = vld [vmem:[#allocation2 + $0x258] sm:$0xff]  ;;  %v6316_v38 = vld [vmem:[#allocation2 + $0x260] sm:$0xff] }
 0x8d2   :  { %9904 = vmatmul.mubr.msk.f32.gmra.mrb[6].mxu1 %vm4117_vm2, %v13699_v26 }
 0x8d3   :  { %9906 = vmatprep.mubr.msk.f32.mxu1 %vm11893_vm1, %v11894_v56  ;;  %10747 = vmatpush3.bf16.msra.mxu1 %v10746_v57  ;;  %v6080_v57 = vld [vmem:[#allocation2 + $0x238] sm:$0xff] }
 0x8d4   :  { %10748 = vmatprep.subr.bf16.mxu1 %v15247_v22 }
 0x8d6   :  { %9907 = vmatmul.mubr.msk.f32.gmra.mrb[8].mxu1 %vm4117_vm2, %v13713_v25 }
 0x8d7   :  { %9909 = vmatprep.mubr.msk.f32.mxu1 %vm11893_vm1, %v11894_v56 }
 0x8da   :  { %9910 = vmatmul.mubr.msk.f32.gmra.mrb[10].mxu1 %vm4117_vm2, %v13727_v9 }
 0x8db   :  { %9912 = vmatprep.mubr.msk.f32.mxu1 %vm11893_vm1, %v11894_v56 }
 0x8de   :  { %9913 = vmatmul.mubr.msk.f32.gmra.mrb[12].mxu1 %vm4117_vm2, %v13743_v6 }
 0x8df   :  { %9915 = vmatprep.mubr.msk.f32.mxu1 %vm11893_vm1, %v11894_v56 }
 0x8e2   :  { %9916 = vmatmul.mubr.msk.f32.gmra.mrb[14].mxu1 %vm4117_vm2, %v13757_v31 }
 0x8e3   :  { %9918 = vmatprep.mubr.msk.f32.mxu1 %vm11893_vm1, %v11894_v56 }
 0x8e6   :  { %9919 = vmatmul.mubr.msk.f32.gmra.mrb[16].mxu1 %vm4117_vm2, %v13773_v55 }
 0x8e7   :  { %9921 = vmatprep.mubr.msk.f32.mxu1 %vm11893_vm1, %v11894_v56 }
 0x8ea   :  { %9922 = vmatmul.mubr.msk.f32.gmra.mrb[18].mxu1 %vm4117_vm2, %v13787_v12 }
 0x8eb   :  { %9924 = vmatprep.mubr.msk.f32.mxu1 %vm11893_vm1, %v11894_v56 }
 0x8ee   :  { %9925 = vmatmul.mubr.msk.f32.gmra.mrb[20].mxu1 %vm4117_vm2, %v13803_v60 }
 0x8ef   :  { %9927 = vmatprep.mubr.msk.f32.mxu1 %vm11893_vm1, %v11894_v56 }
 0x8f2   :  { %9928 = vmatmul.mubr.msk.f32.gmra.mrb[22].mxu1 %vm4117_vm2, %v13817_v16 }
 0x8f3   :  { %9930 = vmatprep.mubr.msk.f32.mxu1 %vm11893_vm1, %v11894_v56 }
 0x8f6   :  { %9931 = vmatmul.mubr.msk.f32.gmra.mrb[24].mxu1 %vm4117_vm2, %v13834_v4 }
 0x8f7   :  { %9933 = vmatprep.mubr.msk.f32.mxu1 %vm11893_vm1, %v11894_v56 }
 0x8fa   :  { %9934 = vmatmul.mubr.msk.f32.gmra.mrb[26].mxu1 %vm4117_vm2, %v13848_v34 }
 0x8fb   :  { %9936 = vmatprep.mubr.msk.f32.mxu1 %vm11893_vm1, %v11894_v56 }
 0x8fe   :  { %9937 = vmatmul.mubr.msk.f32.gmra.mrb[28].mxu1 %vm4117_vm2, %v13862_v29 }
 0x8ff   :  { %9939 = vmatprep.mubr.msk.f32.mxu1 %vm11893_vm1, %v11894_v56 }
 0x902   :  { %9940 = vmatmul.mubr.msk.f32.gmra.mrb[30].mxu1 %vm4117_vm2, %v13872_v30 }
 0x903   :  { %9942 = vmatprep.mubr.msk.f32.mxu1 %vm11893_vm1, %v11894_v56 }
 0x906   :  { %9943 = vmatmul.mubr.msk.f32.gmra.mrb[32].mxu1 %vm4117_vm2, %v13886_v40 }
 0x907   :  { %9945 = vmatprep.mubr.msk.f32.mxu1 %vm11893_vm1, %v11894_v56 }
 0x90a   :  { %9946 = vmatmul.mubr.msk.f32.gmra.mrb[34].mxu1 %vm4117_vm2, %v13896_v52 }
 0x90b   :  { %9948 = vmatprep.mubr.msk.f32.mxu1 %vm11893_vm1, %v11894_v56 }
 0x90e   :  { %9949 = vmatmul.mubr.msk.f32.gmra.mrb[36].mxu1 %vm4117_vm2, %v13910_v49 }
 0x90f   :  { %9951 = vmatprep.mubr.msk.f32.mxu1 %vm11893_vm1, %v11894_v56 }
 0x912   :  { %9952 = vmatmul.mubr.msk.f32.gmra.mrb[38].mxu1 %vm4117_vm2, %v13920_v59 }
 0x913   :  { %9954 = vmatprep.mubr.msk.f32.mxu1 %vm11893_vm1, %v11894_v56 }
 0x916   :  { %9955 = vmatmul.mubr.msk.f32.gmra.mrb[40].mxu1 %vm4117_vm2, %v13934_v2 }
 0x917   :  { %9957 = vmatprep.mubr.msk.f32.mxu1 %vm11893_vm1, %v11894_v56 }
 0x91a   :  { %9958 = vmatmul.mubr.msk.f32.gmra.mrb[42].mxu1 %vm4117_vm2, %v13944_v13 }
 0x91b   :  { %9960 = vmatprep.mubr.msk.f32.mxu1 %vm11893_vm1, %v11894_v56 }
 0x91e   :  { %9961 = vmatmul.mubr.msk.f32.gmra.mrb[44].mxu1 %vm4117_vm2, %v14062_v48 }
 0x91f   :  { %9963 = vmatprep.mubr.msk.f32.mxu1 %vm11893_vm1, %v11894_v56 }
 0x922   :  { %9964 = vmatmul.mubr.msk.f32.gmra.mrb[46].mxu1 %vm4117_vm2, %v14232_v61 }
 0x923   :  { %9966 = vmatprep.mubr.msk.f32.mxu1 %vm11893_vm1, %v11894_v56 }
 0x926   :  { %9967 = vmatmul.mubr.msk.f32.gmra.mrb[48].mxu1 %vm4117_vm2, %v14348_v37 }
 0x927   :  { %9969 = vmatprep.mubr.msk.f32.mxu1 %vm11893_vm1, %v11894_v56 }
 0x92a   :  { %9970 = vmatmul.mubr.msk.f32.gmra.mrb[50].mxu1 %vm4117_vm2, %v14469_v24 }
 0x92b   :  { %9972 = vmatprep.mubr.msk.f32.mxu1 %vm11893_vm1, %v11894_v56 }
 0x92e   :  { %9973 = vmatmul.mubr.msk.f32.gmra.mrb[52].mxu1 %vm4117_vm2, %v14585_v43 }
 0x92f   :  { %9991 = vmatprep.mubr.msk.f32.mxu1 %vm11893_vm1, %v11894_v56 }
 0x932   :  { %9992 = vmatmul.mubr.msk.f32.vlgmr.msra.gmra.mrb[0].mxu1 %vm4117_vm2, %v13677_v15  ;;  %v6079_v15 = vld [vmem:[#allocation2 + $0x230] sm:$0xff] }
 0x933   :  { %10750 = vmatpush3.bf16.msra.mxu1 %v10749_v35  ;;  %9994 = vmatprep.mubr.msk.f32.mxu1 %vm11893_vm1, %v11894_v56  ;;  %v10758_v62 = vpack.c.bf16 %v6080_v57, %v6079_v15  ;;  %v6312_v35 = vld [vmem:[#allocation2 + $0x240] sm:$0xff]  ;;  %v6319_v57 = vld [vmem:[#allocation2 + $0x278] sm:$0xff] }
 0x934   :  { %10751 = vmatprep.subr.bf16.mxu1 %v15247_v22  ;;  %v10761_v42 = vpack.c.bf16 %v6313_v19, %v6312_v35  ;;  %v14817_v35 = vmax.f32 %v10876_v10, 0.0  ;;  %v6551_v19 = vld [vmem:[#allocation2 + $0x280] sm:$0xff] }
 0x936   :  { %9995 = vmatmul.mubr.msk.f32.gmra.mrb[2].mxu1 %vm4117_vm2, %v13689_v1 }
 0x937   :  { %9997 = vmatprep.mubr.msk.f32.mxu1 %vm11893_vm1, %v11894_v56  ;;  %10753 = vmatpush3.bf16.msra.mxu1 %v10752_v47  ;;  %v6314_v47 = vld [vmem:[#allocation2 + $0x250] sm:$0xff] }
 0x938   :  { %10754 = vmatprep.subr.bf16.mxu1 %v15247_v22  ;;  %v10764_v5 = vpack.c.bf16 %v6315_v7, %v6314_v47  ;;  %v6553_v7 = vld [vmem:[#allocation2 + $0x290] sm:$0xff] }
 0x93a   :  { %9998 = vmatmul.mubr.msk.f32.gmra.mrb[4].mxu1 %vm4117_vm2, %v13699_v26 }
 0x93b   :  { %10000 = vmatprep.mubr.msk.f32.mxu1 %vm11893_vm1, %v11894_v56  ;;  %10756 = vmatpush3.bf16.msra.mxu1 %v10755_v46  ;;  %v6317_v46 = vld [vmem:[#allocation2 + $0x268] sm:$0xff] }
 0x93c   :  { %10757 = vmatprep.subr.bf16.mxu1 %v15247_v22  ;;  %v10767_v15 = vpack.c.bf16 %v6317_v46, %v6316_v38  ;;  %v6555_v38 = vld [vmem:[#allocation2 + $0x2a0] sm:$0xff]  ;;  %v6556_v46 = vld [vmem:[#allocation2 + $0x2a8] sm:$0xff] }
 0x93e   :  { %10001 = vmatmul.mubr.msk.f32.gmra.mrb[6].mxu1 %vm4117_vm2, %v13713_v25 }
 0x93f   :  { %10003 = vmatprep.mubr.msk.f32.mxu1 %vm11893_vm1, %v11894_v56  ;;  %10759 = vmatpush3.bf16.msra.mxu1 %v10758_v62 }
 0x940   :  { %10760 = vmatprep.subr.bf16.mxu1 %v15247_v22 }
 0x942   :  { %10004 = vmatmul.mubr.msk.f32.gmra.mrb[8].mxu1 %vm4117_vm2, %v13727_v9 }
 0x943   :  { %10006 = vmatprep.mubr.msk.f32.mxu1 %vm11893_vm1, %v11894_v56 }
 0x946   :  { %10007 = vmatmul.mubr.msk.f32.gmra.mrb[10].mxu1 %vm4117_vm2, %v13743_v6 }
 0x947   :  { %10009 = vmatprep.mubr.msk.f32.mxu1 %vm11893_vm1, %v11894_v56 }
 0x94a   :  { %10010 = vmatmul.mubr.msk.f32.gmra.mrb[12].mxu1 %vm4117_vm2, %v13757_v31 }
 0x94b   :  { %10012 = vmatprep.mubr.msk.f32.mxu1 %vm11893_vm1, %v11894_v56 }
 0x94e   :  { %10013 = vmatmul.mubr.msk.f32.gmra.mrb[14].mxu1 %vm4117_vm2, %v13773_v55 }
 0x94f   :  { %10015 = vmatprep.mubr.msk.f32.mxu1 %vm11893_vm1, %v11894_v56 }
 0x952   :  { %10016 = vmatmul.mubr.msk.f32.gmra.mrb[16].mxu1 %vm4117_vm2, %v13787_v12 }
 0x953   :  { %10018 = vmatprep.mubr.msk.f32.mxu1 %vm11893_vm1, %v11894_v56 }
 0x956   :  { %10019 = vmatmul.mubr.msk.f32.gmra.mrb[18].mxu1 %vm4117_vm2, %v13803_v60 }
 0x957   :  { %10021 = vmatprep.mubr.msk.f32.mxu1 %vm11893_vm1, %v11894_v56 }
 0x95a   :  { %10022 = vmatmul.mubr.msk.f32.gmra.mrb[20].mxu1 %vm4117_vm2, %v13817_v16 }
 0x95b   :  { %10024 = vmatprep.mubr.msk.f32.mxu1 %vm11893_vm1, %v11894_v56 }
 0x95e   :  { %10025 = vmatmul.mubr.msk.f32.gmra.mrb[22].mxu1 %vm4117_vm2, %v13834_v4 }
 0x95f   :  { %10027 = vmatprep.mubr.msk.f32.mxu1 %vm11893_vm1, %v11894_v56 }
 0x962   :  { %10028 = vmatmul.mubr.msk.f32.gmra.mrb[24].mxu1 %vm4117_vm2, %v13848_v34 }
 0x963   :  { %10030 = vmatprep.mubr.msk.f32.mxu1 %vm11893_vm1, %v11894_v56 }
 0x966   :  { %10031 = vmatmul.mubr.msk.f32.gmra.mrb[26].mxu1 %vm4117_vm2, %v13862_v29 }
 0x967   :  { %10033 = vmatprep.mubr.msk.f32.mxu1 %vm11893_vm1, %v11894_v56 }
 0x96a   :  { %10034 = vmatmul.mubr.msk.f32.gmra.mrb[28].mxu1 %vm4117_vm2, %v13872_v30 }
 0x96b   :  { %10036 = vmatprep.mubr.msk.f32.mxu1 %vm11893_vm1, %v11894_v56 }
 0x96e   :  { %10037 = vmatmul.mubr.msk.f32.gmra.mrb[30].mxu1 %vm4117_vm2, %v13886_v40 }
 0x96f   :  { %10039 = vmatprep.mubr.msk.f32.mxu1 %vm11893_vm1, %v11894_v56 }
 0x972   :  { %10040 = vmatmul.mubr.msk.f32.gmra.mrb[32].mxu1 %vm4117_vm2, %v13896_v52 }
 0x973   :  { %10042 = vmatprep.mubr.msk.f32.mxu1 %vm11893_vm1, %v11894_v56 }
 0x976   :  { %10043 = vmatmul.mubr.msk.f32.gmra.mrb[34].mxu1 %vm4117_vm2, %v13910_v49 }
 0x977   :  { %10045 = vmatprep.mubr.msk.f32.mxu1 %vm11893_vm1, %v11894_v56 }
 0x97a   :  { %10046 = vmatmul.mubr.msk.f32.gmra.mrb[36].mxu1 %vm4117_vm2, %v13920_v59 }
 0x97b   :  { %10048 = vmatprep.mubr.msk.f32.mxu1 %vm11893_vm1, %v11894_v56 }
 0x97e   :  { %10049 = vmatmul.mubr.msk.f32.gmra.mrb[38].mxu1 %vm4117_vm2, %v13934_v2 }
 0x97f   :  { %10051 = vmatprep.mubr.msk.f32.mxu1 %vm11893_vm1, %v11894_v56 }
 0x982   :  { %10052 = vmatmul.mubr.msk.f32.gmra.mrb[40].mxu1 %vm4117_vm2, %v13944_v13 }
 0x983   :  { %10054 = vmatprep.mubr.msk.f32.mxu1 %vm11893_vm1, %v11894_v56 }
 0x986   :  { %10055 = vmatmul.mubr.msk.f32.gmra.mrb[42].mxu1 %vm4117_vm2, %v14062_v48 }
 0x987   :  { %10057 = vmatprep.mubr.msk.f32.mxu1 %vm11893_vm1, %v11894_v56 }
 0x98a   :  { %10058 = vmatmul.mubr.msk.f32.gmra.mrb[44].mxu1 %vm4117_vm2, %v14232_v61 }
 0x98b   :  { %10060 = vmatprep.mubr.msk.f32.mxu1 %vm11893_vm1, %v11894_v56 }
 0x98e   :  { %10061 = vmatmul.mubr.msk.f32.gmra.mrb[46].mxu1 %vm4117_vm2, %v14348_v37 }
 0x98f   :  { %10063 = vmatprep.mubr.msk.f32.mxu1 %vm11893_vm1, %v11894_v56 }
 0x992   :  { %10064 = vmatmul.mubr.msk.f32.gmra.mrb[48].mxu1 %vm4117_vm2, %v14469_v24 }
 0x993   :  { %10066 = vmatprep.mubr.msk.f32.mxu1 %vm11893_vm1, %v11894_v56 }
 0x996   :  { %10067 = vmatmul.mubr.msk.f32.gmra.mrb[50].mxu1 %vm4117_vm2, %v14585_v43 }
 0x997   :  { %10069 = vmatprep.mubr.msk.f32.mxu1 %vm11893_vm1, %v11894_v56 }
 0x99a   :  { %10070 = vmatmul.mubr.msk.f32.gmra.mrb[52].mxu1 %vm4117_vm2, %v14701_v14 }
 0x99b   :  { %10088 = vmatprep.mubr.msk.f32.mxu1 %vm11893_vm1, %v11894_v56 }
 0x99e   :  { %10089 = vmatmul.mubr.msk.f32.vlgmr.msra.gmra.mrb[0].mxu1 %vm4117_vm2, %v13689_v1  ;;  %v6318_v1 = vld [vmem:[#allocation2 + $0x270] sm:$0xff] }
 0x99f   :  { %10762 = vmatpush3.bf16.msra.mxu1 %v10761_v42  ;;  %10091 = vmatprep.mubr.msk.f32.mxu1 %vm11893_vm1, %v11894_v56  ;;  %v10770_v62 = vpack.c.bf16 %v6319_v57, %v6318_v1  ;;  %v6552_v42 = vld [vmem:[#allocation2 + $0x288] sm:$0xff]  ;;  %v6558_v1 = vld [vmem:[#allocation2 + $0x2b8] sm:$0xff] }
 0x9a0   :  { %10763 = vmatprep.subr.bf16.mxu1 %v15247_v22  ;;  %v10773_v47 = vpack.c.bf16 %v6552_v42, %v6551_v19  ;;  %v6790_v19 = vld [vmem:[#allocation2 + $0x2c0] sm:$0xff]  ;;  %v6791_v42 = vld [vmem:[#allocation2 + $0x2c8] sm:$0xff] }
 0x9a2   :  { %10092 = vmatmul.mubr.msk.f32.gmra.mrb[2].mxu1 %vm4117_vm2, %v13699_v26 }
 0x9a3   :  { %10094 = vmatprep.mubr.msk.f32.mxu1 %vm11893_vm1, %v11894_v56  ;;  %10765 = vmatpush3.bf16.msra.mxu1 %v10764_v5  ;;  %v6554_v5 = vld [vmem:[#allocation2 + $0x298] sm:$0xff] }
 0x9a4   :  { %10766 = vmatprep.subr.bf16.mxu1 %v15247_v22  ;;  %v10776_v23 = vpack.c.bf16 %v6554_v5, %v6553_v7  ;;  %v6792_v7 = vld [vmem:[#allocation2 + $0x2d0] sm:$0xff]  ;;  %v6793_v5 = vld [vmem:[#allocation2 + $0x2d8] sm:$0xff] }
 0x9a6   :  { %10095 = vmatmul.mubr.msk.f32.gmra.mrb[4].mxu1 %vm4117_vm2, %v13713_v25 }
 0x9a7   :  { %10097 = vmatprep.mubr.msk.f32.mxu1 %vm11893_vm1, %v11894_v56  ;;  %10768 = vmatpush3.bf16.msra.mxu1 %v10767_v15  ;;  %v10779_v15 = vpack.c.bf16 %v6556_v46, %v6555_v38  ;;  %v6795_v38 = vld [vmem:[#allocation2 + $0x2e8] sm:$0xff] }
 0x9a8   :  { %10769 = vmatprep.subr.bf16.mxu1 %v15247_v22 }
 0x9aa   :  { %10098 = vmatmul.mubr.msk.f32.gmra.mrb[6].mxu1 %vm4117_vm2, %v13727_v9 }
 0x9ab   :  { %10100 = vmatprep.mubr.msk.f32.mxu1 %vm11893_vm1, %v11894_v56  ;;  %10771 = vmatpush3.bf16.msra.mxu1 %v10770_v62  ;;  %v10875_v62 = vadd.f32 %v14461_v63, %v13820_v54  ;;  %v10788_v54 = vpack.c.bf16 %v6793_v5, %v6792_v7 }
 0x9ac   :  { %10772 = vmatprep.subr.bf16.mxu1 %v15247_v22 }
 0x9ad   :  { %v14933_v10 = vmax.f32 %v10875_v62, 0.0 }
 0x9ae   :  { %10101 = vmatmul.mubr.msk.f32.gmra.mrb[8].mxu1 %vm4117_vm2, %v13743_v6 }
 0x9af   :  { %10103 = vmatprep.mubr.msk.f32.mxu1 %vm11893_vm1, %v11894_v56 }
 0x9b2   :  { %10104 = vmatmul.mubr.msk.f32.gmra.mrb[10].mxu1 %vm4117_vm2, %v13757_v31 }
 0x9b3   :  { %10106 = vmatprep.mubr.msk.f32.mxu1 %vm11893_vm1, %v11894_v56 }
 0x9b6   :  { %10107 = vmatmul.mubr.msk.f32.gmra.mrb[12].mxu1 %vm4117_vm2, %v13773_v55 }
 0x9b7   :  { %10109 = vmatprep.mubr.msk.f32.mxu1 %vm11893_vm1, %v11894_v56 }
 0x9ba   :  { %10110 = vmatmul.mubr.msk.f32.gmra.mrb[14].mxu1 %vm4117_vm2, %v13787_v12 }
 0x9bb   :  { %10112 = vmatprep.mubr.msk.f32.mxu1 %vm11893_vm1, %v11894_v56 }
 0x9be   :  { %10113 = vmatmul.mubr.msk.f32.gmra.mrb[16].mxu1 %vm4117_vm2, %v13803_v60 }
 0x9bf   :  { %10115 = vmatprep.mubr.msk.f32.mxu1 %vm11893_vm1, %v11894_v56 }
 0x9c2   :  { %10116 = vmatmul.mubr.msk.f32.gmra.mrb[18].mxu1 %vm4117_vm2, %v13817_v16 }
 0x9c3   :  { %10118 = vmatprep.mubr.msk.f32.mxu1 %vm11893_vm1, %v11894_v56 }
 0x9c6   :  { %10119 = vmatmul.mubr.msk.f32.gmra.mrb[20].mxu1 %vm4117_vm2, %v13834_v4 }
 0x9c7   :  { %10121 = vmatprep.mubr.msk.f32.mxu1 %vm11893_vm1, %v11894_v56 }
 0x9ca   :  { %10122 = vmatmul.mubr.msk.f32.gmra.mrb[22].mxu1 %vm4117_vm2, %v13848_v34 }
 0x9cb   :  { %10124 = vmatprep.mubr.msk.f32.mxu1 %vm11893_vm1, %v11894_v56 }
 0x9ce   :  { %10125 = vmatmul.mubr.msk.f32.gmra.mrb[24].mxu1 %vm4117_vm2, %v13862_v29 }
 0x9cf   :  { %10127 = vmatprep.mubr.msk.f32.mxu1 %vm11893_vm1, %v11894_v56 }
 0x9d2   :  { %10128 = vmatmul.mubr.msk.f32.gmra.mrb[26].mxu1 %vm4117_vm2, %v13872_v30 }
 0x9d3   :  { %10130 = vmatprep.mubr.msk.f32.mxu1 %vm11893_vm1, %v11894_v56 }
 0x9d6   :  { %10131 = vmatmul.mubr.msk.f32.gmra.mrb[28].mxu1 %vm4117_vm2, %v13886_v40 }
 0x9d7   :  { %10133 = vmatprep.mubr.msk.f32.mxu1 %vm11893_vm1, %v11894_v56 }
 0x9da   :  { %10134 = vmatmul.mubr.msk.f32.gmra.mrb[30].mxu1 %vm4117_vm2, %v13896_v52 }
 0x9db   :  { %10136 = vmatprep.mubr.msk.f32.mxu1 %vm11893_vm1, %v11894_v56 }
 0x9de   :  { %10137 = vmatmul.mubr.msk.f32.gmra.mrb[32].mxu1 %vm4117_vm2, %v13910_v49 }
 0x9df   :  { %10139 = vmatprep.mubr.msk.f32.mxu1 %vm11893_vm1, %v11894_v56 }
 0x9e2   :  { %10140 = vmatmul.mubr.msk.f32.gmra.mrb[34].mxu1 %vm4117_vm2, %v13920_v59 }
 0x9e3   :  { %10142 = vmatprep.mubr.msk.f32.mxu1 %vm11893_vm1, %v11894_v56 }
 0x9e6   :  { %10143 = vmatmul.mubr.msk.f32.gmra.mrb[36].mxu1 %vm4117_vm2, %v13934_v2 }
 0x9e7   :  { %10145 = vmatprep.mubr.msk.f32.mxu1 %vm11893_vm1, %v11894_v56 }
 0x9ea   :  { %10146 = vmatmul.mubr.msk.f32.gmra.mrb[38].mxu1 %vm4117_vm2, %v13944_v13 }
 0x9eb   :  { %10148 = vmatprep.mubr.msk.f32.mxu1 %vm11893_vm1, %v11894_v56 }
 0x9ee   :  { %10149 = vmatmul.mubr.msk.f32.gmra.mrb[40].mxu1 %vm4117_vm2, %v14062_v48 }
 0x9ef   :  { %10151 = vmatprep.mubr.msk.f32.mxu1 %vm11893_vm1, %v11894_v56 }
 0x9f2   :  { %10152 = vmatmul.mubr.msk.f32.gmra.mrb[42].mxu1 %vm4117_vm2, %v14232_v61 }
 0x9f3   :  { %10154 = vmatprep.mubr.msk.f32.mxu1 %vm11893_vm1, %v11894_v56 }
 0x9f6   :  { %10155 = vmatmul.mubr.msk.f32.gmra.mrb[44].mxu1 %vm4117_vm2, %v14348_v37 }
 0x9f7   :  { %10157 = vmatprep.mubr.msk.f32.mxu1 %vm11893_vm1, %v11894_v56 }
 0x9fa   :  { %10158 = vmatmul.mubr.msk.f32.gmra.mrb[46].mxu1 %vm4117_vm2, %v14469_v24 }
 0x9fb   :  { %10160 = vmatprep.mubr.msk.f32.mxu1 %vm11893_vm1, %v11894_v56 }
 0x9fe   :  { %10161 = vmatmul.mubr.msk.f32.gmra.mrb[48].mxu1 %vm4117_vm2, %v14585_v43 }
 0x9ff   :  { %10163 = vmatprep.mubr.msk.f32.mxu1 %vm11893_vm1, %v11894_v56 }
 0xa02   :  { %10164 = vmatmul.mubr.msk.f32.gmra.mrb[50].mxu1 %vm4117_vm2, %v14701_v14 }
 0xa03   :  { %10166 = vmatprep.mubr.msk.f32.mxu1 %vm11893_vm1, %v11894_v56 }
 0xa06   :  { %10167 = vmatmul.mubr.msk.f32.gmra.mrb[52].mxu1 %vm4117_vm2, %v14817_v35 }
 0xa07   :  { %10185 = vmatprep.mubr.msk.f32.mxu1 %vm11893_vm1, %v11894_v56 }
 0xa0a   :  { %10186 = vmatmul.mubr.msk.f32.vlgmr.msra.gmra.mrb[0].mxu1 %vm4117_vm2, %v13699_v26  ;;  %v6557_v26 = vld [vmem:[#allocation2 + $0x2b0] sm:$0xff] }
 0xa0b   :  { %10774 = vmatpush3.bf16.msra.mxu1 %v10773_v47  ;;  %10188 = vmatprep.mubr.msk.f32.mxu1 %vm11893_vm1, %v11894_v56  ;;  %v10782_v57 = vpack.c.bf16 %v6558_v1, %v6557_v26  ;;  %v10785_v47 = vpack.c.bf16 %v6791_v42, %v6790_v19 }
 0xa0c   :  { %10775 = vmatprep.subr.bf16.mxu1 %v15247_v22 }
 0xa0e   :  { %10189 = vmatmul.mubr.msk.f32.gmra.mrb[2].mxu1 %vm4117_vm2, %v13713_v25 }
 0xa0f   :  { %10191 = vmatprep.mubr.msk.f32.mxu1 %vm11893_vm1, %v11894_v56  ;;  %10777 = vmatpush3.bf16.msra.mxu1 %v10776_v23  ;;  %v6794_v23 = vld [vmem:[#allocation2 + $0x2e0] sm:$0xff] }
 0xa10   :  { %10778 = vmatprep.subr.bf16.mxu1 %v15247_v22  ;;  %v10791_v46 = vpack.c.bf16 %v6795_v38, %v6794_v23 }
 0xa12   :  { %10192 = vmatmul.mubr.msk.f32.gmra.mrb[4].mxu1 %vm4117_vm2, %v13727_v9 }
 0xa13   :  { %10194 = vmatprep.mubr.msk.f32.mxu1 %vm11893_vm1, %v11894_v56  ;;  %10780 = vmatpush3.bf16.msra.mxu1 %v10779_v15  ;;  %v6797_v15 = vld [vmem:[#allocation2 + $0x2f8] sm:$0xff] }
 0xa14   :  { %10781 = vmatprep.subr.bf16.mxu1 %v15247_v22 }
 0xa16   :  { %10195 = vmatmul.mubr.msk.f32.gmra.mrb[6].mxu1 %vm4117_vm2, %v13743_v6 }
 0xa17   :  { %10197 = vmatprep.mubr.msk.f32.mxu1 %vm11893_vm1, %v11894_v56  ;;  %10783 = vmatpush3.bf16.msra.mxu1 %v10782_v57 }
 0xa18   :  { %10784 = vmatprep.subr.bf16.mxu1 %v15247_v22 }
 0xa1a   :  { %10198 = vmatmul.mubr.msk.f32.gmra.mrb[8].mxu1 %vm4117_vm2, %v13757_v31 }
 0xa1b   :  { %10200 = vmatprep.mubr.msk.f32.mxu1 %vm11893_vm1, %v11894_v56 }
 0xa1e   :  { %10201 = vmatmul.mubr.msk.f32.gmra.mrb[10].mxu1 %vm4117_vm2, %v13773_v55 }
 0xa1f   :  { %10203 = vmatprep.mubr.msk.f32.mxu1 %vm11893_vm1, %v11894_v56 }
 0xa22   :  { %10204 = vmatmul.mubr.msk.f32.gmra.mrb[12].mxu1 %vm4117_vm2, %v13787_v12 }
 0xa23   :  { %10206 = vmatprep.mubr.msk.f32.mxu1 %vm11893_vm1, %v11894_v56 }
 0xa26   :  { %10207 = vmatmul.mubr.msk.f32.gmra.mrb[14].mxu1 %vm4117_vm2, %v13803_v60 }
 0xa27   :  { %10209 = vmatprep.mubr.msk.f32.mxu1 %vm11893_vm1, %v11894_v56 }
 0xa2a   :  { %10210 = vmatmul.mubr.msk.f32.gmra.mrb[16].mxu1 %vm4117_vm2, %v13817_v16 }
 0xa2b   :  { %10212 = vmatprep.mubr.msk.f32.mxu1 %vm11893_vm1, %v11894_v56 }
 0xa2e   :  { %10213 = vmatmul.mubr.msk.f32.gmra.mrb[18].mxu1 %vm4117_vm2, %v13834_v4 }
 0xa2f   :  { %10215 = vmatprep.mubr.msk.f32.mxu1 %vm11893_vm1, %v11894_v56 }
 0xa32   :  { %10216 = vmatmul.mubr.msk.f32.gmra.mrb[20].mxu1 %vm4117_vm2, %v13848_v34 }
 0xa33   :  { %10218 = vmatprep.mubr.msk.f32.mxu1 %vm11893_vm1, %v11894_v56 }
 0xa36   :  { %10219 = vmatmul.mubr.msk.f32.gmra.mrb[22].mxu1 %vm4117_vm2, %v13862_v29 }
 0xa37   :  { %10221 = vmatprep.mubr.msk.f32.mxu1 %vm11893_vm1, %v11894_v56 }
 0xa3a   :  { %10222 = vmatmul.mubr.msk.f32.gmra.mrb[24].mxu1 %vm4117_vm2, %v13872_v30 }
 0xa3b   :  { %10224 = vmatprep.mubr.msk.f32.mxu1 %vm11893_vm1, %v11894_v56 }
 0xa3e   :  { %10225 = vmatmul.mubr.msk.f32.gmra.mrb[26].mxu1 %vm4117_vm2, %v13886_v40 }
 0xa3f   :  { %10227 = vmatprep.mubr.msk.f32.mxu1 %vm11893_vm1, %v11894_v56 }
 0xa42   :  { %10228 = vmatmul.mubr.msk.f32.gmra.mrb[28].mxu1 %vm4117_vm2, %v13896_v52 }
 0xa43   :  { %10230 = vmatprep.mubr.msk.f32.mxu1 %vm11893_vm1, %v11894_v56 }
 0xa46   :  { %10231 = vmatmul.mubr.msk.f32.gmra.mrb[30].mxu1 %vm4117_vm2, %v13910_v49 }
 0xa47   :  { %10233 = vmatprep.mubr.msk.f32.mxu1 %vm11893_vm1, %v11894_v56 }
 0xa4a   :  { %10234 = vmatmul.mubr.msk.f32.gmra.mrb[32].mxu1 %vm4117_vm2, %v13920_v59 }
 0xa4b   :  { %10236 = vmatprep.mubr.msk.f32.mxu1 %vm11893_vm1, %v11894_v56 }
 0xa4e   :  { %10237 = vmatmul.mubr.msk.f32.gmra.mrb[34].mxu1 %vm4117_vm2, %v13934_v2 }
 0xa4f   :  { %10239 = vmatprep.mubr.msk.f32.mxu1 %vm11893_vm1, %v11894_v56 }
 0xa52   :  { %10240 = vmatmul.mubr.msk.f32.gmra.mrb[36].mxu1 %vm4117_vm2, %v13944_v13 }
 0xa53   :  { %10242 = vmatprep.mubr.msk.f32.mxu1 %vm11893_vm1, %v11894_v56 }
 0xa56   :  { %10243 = vmatmul.mubr.msk.f32.gmra.mrb[38].mxu1 %vm4117_vm2, %v14062_v48 }
 0xa57   :  { %10245 = vmatprep.mubr.msk.f32.mxu1 %vm11893_vm1, %v11894_v56 }
 0xa5a   :  { %10246 = vmatmul.mubr.msk.f32.gmra.mrb[40].mxu1 %vm4117_vm2, %v14232_v61 }
 0xa5b   :  { %10248 = vmatprep.mubr.msk.f32.mxu1 %vm11893_vm1, %v11894_v56 }
 0xa5e   :  { %10249 = vmatmul.mubr.msk.f32.gmra.mrb[42].mxu1 %vm4117_vm2, %v14348_v37 }
 0xa5f   :  { %10251 = vmatprep.mubr.msk.f32.mxu1 %vm11893_vm1, %v11894_v56 }
 0xa62   :  { %10252 = vmatmul.mubr.msk.f32.gmra.mrb[44].mxu1 %vm4117_vm2, %v14469_v24 }
 0xa63   :  { %10254 = vmatprep.mubr.msk.f32.mxu1 %vm11893_vm1, %v11894_v56 }
 0xa66   :  { %10255 = vmatmul.mubr.msk.f32.gmra.mrb[46].mxu1 %vm4117_vm2, %v14585_v43 }
 0xa67   :  { %10257 = vmatprep.mubr.msk.f32.mxu1 %vm11893_vm1, %v11894_v56 }
 0xa6a   :  { %10258 = vmatmul.mubr.msk.f32.gmra.mrb[48].mxu1 %vm4117_vm2, %v14701_v14 }
 0xa6b   :  { %10260 = vmatprep.mubr.msk.f32.mxu1 %vm11893_vm1, %v11894_v56 }
 0xa6e   :  { %10261 = vmatmul.mubr.msk.f32.gmra.mrb[50].mxu1 %vm4117_vm2, %v14817_v35 }
 0xa6f   :  { %10263 = vmatprep.mubr.msk.f32.mxu1 %vm11893_vm1, %v11894_v56 }
 0xa72   :  { %10264 = vmatmul.mubr.msk.f32.gmra.mrb[52].mxu1 %vm4117_vm2, %v14933_v10 }
 0xa73   :  { %10282 = vmatprep.mubr.msk.f32.mxu1 %vm11893_vm1, %v11894_v56 }
 0xa76   :  { %10283 = vmatmul.mubr.msk.f32.vlgmr.msra.gmra.mrb[0].mxu1 %vm4117_vm2, %v13713_v25  ;;  %v6796_v25 = vld [vmem:[#allocation2 + $0x2f0] sm:$0xff] }
 0xa77   :  { %10786 = vmatpush3.bf16.msra.mxu1 %v10785_v47  ;;  %10285 = vmatprep.mubr.msk.f32.mxu1 %vm11893_vm1, %v11894_v56  ;;  %v10794_v26 = vpack.c.bf16 %v6797_v15, %v6796_v25 }
 0xa78   :  { %10787 = vmatprep.subr.bf16.mxu1 %v15247_v22 }
 0xa7a   :  { %10286 = vmatmul.mubr.msk.f32.gmra.mrb[2].mxu1 %vm4117_vm2, %v13727_v9 }
 0xa7b   :  { %10288 = vmatprep.mubr.msk.f32.mxu1 %vm11893_vm1, %v11894_v56  ;;  %10789 = vmatpush3.bf16.msra.mxu1 %v10788_v54 }
 0xa7c   :  { %10790 = vmatprep.subr.bf16.mxu1 %v15247_v22 }
 0xa7e   :  { %10289 = vmatmul.mubr.msk.f32.gmra.mrb[4].mxu1 %vm4117_vm2, %v13743_v6 }
 0xa7f   :  { %10291 = vmatprep.mubr.msk.f32.mxu1 %vm11893_vm1, %v11894_v56  ;;  %10792 = vmatpush3.bf16.msra.mxu1 %v10791_v46 }
 0xa80   :  { %10793 = vmatprep.subr.bf16.mxu1 %v15247_v22  ;;  %v10878_v22 = vadd.f32 %v14461_v63, %v13838_v18 }
 0xa82   :  { %10292 = vmatmul.mubr.msk.f32.gmra.mrb[6].mxu1 %vm4117_vm2, %v13757_v31  ;;  %v4100_v1 = vmax.f32 %v10878_v22, 0.0 }
 0xa83   :  { %10294 = vmatprep.mubr.msk.f32.mxu1 %vm11893_vm1, %v11894_v56  ;;  %10795 = vmatpush3.bf16.msra.mxu1 %v10794_v26 }
 0xa86   :  { %10295 = vmatmul.mubr.msk.f32.gmra.mrb[8].mxu1 %vm4117_vm2, %v13773_v55 }
 0xa87   :  { %10297 = vmatprep.mubr.msk.f32.mxu1 %vm11893_vm1, %v11894_v56 }
 0xa8a   :  { %10298 = vmatmul.mubr.msk.f32.gmra.mrb[10].mxu1 %vm4117_vm2, %v13787_v12 }
 0xa8b   :  { %10300 = vmatprep.mubr.msk.f32.mxu1 %vm11893_vm1, %v11894_v56 }
 0xa8e   :  { %10301 = vmatmul.mubr.msk.f32.gmra.mrb[12].mxu1 %vm4117_vm2, %v13803_v60 }
 0xa8f   :  { %10303 = vmatprep.mubr.msk.f32.mxu1 %vm11893_vm1, %v11894_v56 }
 0xa92   :  { %10304 = vmatmul.mubr.msk.f32.gmra.mrb[14].mxu1 %vm4117_vm2, %v13817_v16 }
 0xa93   :  { %10306 = vmatprep.mubr.msk.f32.mxu1 %vm11893_vm1, %v11894_v56 }
 0xa96   :  { %10307 = vmatmul.mubr.msk.f32.gmra.mrb[16].mxu1 %vm4117_vm2, %v13834_v4 }
 0xa97   :  { %10309 = vmatprep.mubr.msk.f32.mxu1 %vm11893_vm1, %v11894_v56 }
 0xa9a   :  { %10310 = vmatmul.mubr.msk.f32.gmra.mrb[18].mxu1 %vm4117_vm2, %v13848_v34 }
 0xa9b   :  { %10312 = vmatprep.mubr.msk.f32.mxu1 %vm11893_vm1, %v11894_v56 }
 0xa9e   :  { %10313 = vmatmul.mubr.msk.f32.gmra.mrb[20].mxu1 %vm4117_vm2, %v13862_v29 }
 0xa9f   :  { %10315 = vmatprep.mubr.msk.f32.mxu1 %vm11893_vm1, %v11894_v56 }
 0xaa2   :  { %10316 = vmatmul.mubr.msk.f32.gmra.mrb[22].mxu1 %vm4117_vm2, %v13872_v30 }
 0xaa3   :  { %10318 = vmatprep.mubr.msk.f32.mxu1 %vm11893_vm1, %v11894_v56 }
 0xaa6   :  { %10319 = vmatmul.mubr.msk.f32.gmra.mrb[24].mxu1 %vm4117_vm2, %v13886_v40 }
 0xaa7   :  { %10321 = vmatprep.mubr.msk.f32.mxu1 %vm11893_vm1, %v11894_v56 }
 0xaaa   :  { %10322 = vmatmul.mubr.msk.f32.gmra.mrb[26].mxu1 %vm4117_vm2, %v13896_v52 }
 0xaab   :  { %10324 = vmatprep.mubr.msk.f32.mxu1 %vm11893_vm1, %v11894_v56 }
 0xaae   :  { %10325 = vmatmul.mubr.msk.f32.gmra.mrb[28].mxu1 %vm4117_vm2, %v13910_v49 }
 0xaaf   :  { %10327 = vmatprep.mubr.msk.f32.mxu1 %vm11893_vm1, %v11894_v56 }
 0xab2   :  { %10328 = vmatmul.mubr.msk.f32.gmra.mrb[30].mxu1 %vm4117_vm2, %v13920_v59 }
 0xab3   :  { %10330 = vmatprep.mubr.msk.f32.mxu1 %vm11893_vm1, %v11894_v56 }
 0xab6   :  { %10331 = vmatmul.mubr.msk.f32.gmra.mrb[32].mxu1 %vm4117_vm2, %v13934_v2 }
 0xab7   :  { %10333 = vmatprep.mubr.msk.f32.mxu1 %vm11893_vm1, %v11894_v56 }
 0xaba   :  { %10334 = vmatmul.mubr.msk.f32.gmra.mrb[34].mxu1 %vm4117_vm2, %v13944_v13 }
 0xabb   :  { %10336 = vmatprep.mubr.msk.f32.mxu1 %vm11893_vm1, %v11894_v56 }
 0xabe   :  { %10337 = vmatmul.mubr.msk.f32.gmra.mrb[36].mxu1 %vm4117_vm2, %v14062_v48 }
 0xabf   :  { %10339 = vmatprep.mubr.msk.f32.mxu1 %vm11893_vm1, %v11894_v56 }
 0xac2   :  { %10340 = vmatmul.mubr.msk.f32.gmra.mrb[38].mxu1 %vm4117_vm2, %v14232_v61 }
 0xac3   :  { %10342 = vmatprep.mubr.msk.f32.mxu1 %vm11893_vm1, %v11894_v56 }
 0xac6   :  { %10343 = vmatmul.mubr.msk.f32.gmra.mrb[40].mxu1 %vm4117_vm2, %v14348_v37 }
 0xac7   :  { %10345 = vmatprep.mubr.msk.f32.mxu1 %vm11893_vm1, %v11894_v56 }
 0xaca   :  { %10346 = vmatmul.mubr.msk.f32.gmra.mrb[42].mxu1 %vm4117_vm2, %v14469_v24 }
 0xacb   :  { %10348 = vmatprep.mubr.msk.f32.mxu1 %vm11893_vm1, %v11894_v56 }
 0xace   :  { %10349 = vmatmul.mubr.msk.f32.gmra.mrb[44].mxu1 %vm4117_vm2, %v14585_v43 }
 0xacf   :  { %10351 = vmatprep.mubr.msk.f32.mxu1 %vm11893_vm1, %v11894_v56 }
 0xad2   :  { %10352 = vmatmul.mubr.msk.f32.gmra.mrb[46].mxu1 %vm4117_vm2, %v14701_v14 }
 0xad3   :  { %10354 = vmatprep.mubr.msk.f32.mxu1 %vm11893_vm1, %v11894_v56 }
 0xad6   :  { %10355 = vmatmul.mubr.msk.f32.gmra.mrb[48].mxu1 %vm4117_vm2, %v14817_v35 }
 0xad7   :  { %10357 = vmatprep.mubr.msk.f32.mxu1 %vm11893_vm1, %v11894_v56 }
 0xada   :  { %10358 = vmatmul.mubr.msk.f32.gmra.mrb[50].mxu1 %vm4117_vm2, %v14933_v10 }
 0xadb   :  { %10360 = vmatprep.mubr.msk.f32.mxu1 %vm11893_vm1, %v11894_v56 }
 0xade   :  { %10361 = vmatmul.mubr.msk.f32.gmra.mrb[52].mxu1 %vm4117_vm2, %v4100_v1 }
 0xadf   :  { %10379 = vmatprep.mubr.msk.f32.mxu1 %vm11893_vm1, %v11894_v56 }
 0xae2   :  { %10380 = vmatmul.mubr.msk.f32.vlgmr.msra.gmra.mrb[0].mxu1 %vm4117_vm2, %v13727_v9  ;;  %v10877_v9 = vadd.f32 %v14461_v63, %v13836_v11 }
 0xae3   :  { %10382 = vmatprep.mubr.msk.f32.mxu1 %vm11893_vm1, %v11894_v56 }
 0xae6   :  { %10383 = vmatmul.mubr.msk.f32.gmra.mrb[2].mxu1 %vm4117_vm2, %v13743_v6  ;;  %v4101_v6 = vmax.f32 %v10877_v9, 0.0 }
 0xae7   :  { %10385 = vmatprep.mubr.msk.f32.mxu1 %vm11893_vm1, %v11894_v56 }
 0xaea   :  { %10386 = vmatmul.mubr.msk.f32.gmra.mrb[4].mxu1 %vm4117_vm2, %v13757_v31  ;;  %v15160_v31 = vld [vmem:[%s15235_s7] ss:$0 sm:$0xff]  ;;  %s11895_s7 = smov [#allocation5]  }
 0xaeb   :  { %10388 = vmatprep.mubr.msk.f32.mxu1 %vm11893_vm1, %v11894_v56  ;;  %v4301_v42 = vadd.f32 %v15160_v31, %v14110_v36  ;;  %v4306_v38 = vadd.f32 %v15160_v31, %v14116_v53  ;;  %s7088_s25 = sshll.u32 %s11895_s7, 4  ;;  %s7089_s25 = int_to_ptr.vmem [resolvable:$true] %s7088_s25 }
 0xaec   :  { %s11862_s6 = scalar_lea.vmem %s7089_s25, 128  ;;  %p11867_p9 = scmp.lt.s32.totalorder %s7089_s25, %s7089_s25 }
 0xaed   :  { %p11863_p8 = scmp.ne.s32.totalorder %s7089_s25, %s11862_s6  ;;  %p11868_p10 = scmp.lt.s32.totalorder %s11862_s6, %s11862_s6 }
 0xaee   :  { %10389 = vmatmul.mubr.msk.f32.gmra.mrb[6].mxu1 %vm4117_vm2, %v13773_v55  ;;  %v4266_v55 = vadd.f32 %v15160_v31, %v14064_v50 }
 0xaef   :  { %10391 = vmatprep.mubr.msk.f32.mxu1 %vm11893_vm1, %v11894_v56  ;;  %p11869_p11 = por %p11868_p10, %p11867_p9 }
 0xaf1   :  { %p11870_p12 = pnand %p11869_p11, %p11863_p8 }
 0xaf2   :  { %10392 = vmatmul.mubr.msk.f32.gmra.mrb[8].mxu1 %vm4117_vm2, %v13787_v12 }
 0xaf3   :  { %10394 = vmatprep.mubr.msk.f32.mxu1 %vm11893_vm1, %v11894_v56 }
 0xaf6   :  { %10395 = vmatmul.mubr.msk.f32.gmra.mrb[10].mxu1 %vm4117_vm2, %v13803_v60 }
 0xaf7   :  { %10397 = vmatprep.mubr.msk.f32.mxu1 %vm11893_vm1, %v11894_v56 }
 0xafa   :  { %10398 = vmatmul.mubr.msk.f32.gmra.mrb[12].mxu1 %vm4117_vm2, %v13817_v16 }
 0xafb   :  { %10400 = vmatprep.mubr.msk.f32.mxu1 %vm11893_vm1, %v11894_v56 }
 0xafe   :  { %10401 = vmatmul.mubr.msk.f32.gmra.mrb[14].mxu1 %vm4117_vm2, %v13834_v4  ;;  %v4271_v4 = vadd.f32 %v15160_v31, %v14070_v33 }
 0xaff   :  { %10403 = vmatprep.mubr.msk.f32.mxu1 %vm11893_vm1, %v11894_v56 }
 0xb02   :  { %10404 = vmatmul.mubr.msk.f32.gmra.mrb[16].mxu1 %vm4117_vm2, %v13848_v34  ;;  %v4276_v34 = vadd.f32 %v15160_v31, %v14077_v44 }
 0xb03   :  { %10406 = vmatprep.mubr.msk.f32.mxu1 %vm11893_vm1, %v11894_v56 }
 0xb06   :  { %10407 = vmatmul.mubr.msk.f32.gmra.mrb[18].mxu1 %vm4117_vm2, %v13862_v29 }
 0xb07   :  { %10409 = vmatprep.mubr.msk.f32.mxu1 %vm11893_vm1, %v11894_v56 }
 0xb0a   :  { %10410 = vmatmul.mubr.msk.f32.gmra.mrb[20].mxu1 %vm4117_vm2, %v13872_v30 }
 0xb0b   :  { %10412 = vmatprep.mubr.msk.f32.mxu1 %vm11893_vm1, %v11894_v56 }
 0xb0e   :  { %10413 = vmatmul.mubr.msk.f32.gmra.mrb[22].mxu1 %vm4117_vm2, %v13886_v40 }
 0xb0f   :  { %10415 = vmatprep.mubr.msk.f32.mxu1 %vm11893_vm1, %v11894_v56 }
 0xb12   :  { %10416 = vmatmul.mubr.msk.f32.gmra.mrb[24].mxu1 %vm4117_vm2, %v13896_v52  ;;  %v4281_v52 = vadd.f32 %v15160_v31, %v14084_v28  ;;  %v4296_v28 = vadd.f32 %v15160_v31, %v14104_v39 }
 0xb13   :  { %10418 = vmatprep.mubr.msk.f32.mxu1 %vm11893_vm1, %v11894_v56 }
 0xb16   :  { %10419 = vmatmul.mubr.msk.f32.gmra.mrb[26].mxu1 %vm4117_vm2, %v13910_v49 }
 0xb17   :  { %10421 = vmatprep.mubr.msk.f32.mxu1 %vm11893_vm1, %v11894_v56 }
 0xb1a   :  { %10422 = vmatmul.mubr.msk.f32.gmra.mrb[28].mxu1 %vm4117_vm2, %v13920_v59 }
 0xb1b   :  { %10424 = vmatprep.mubr.msk.f32.mxu1 %vm11893_vm1, %v11894_v56 }
 0xb1e   :  { %10425 = vmatmul.mubr.msk.f32.gmra.mrb[30].mxu1 %vm4117_vm2, %v13934_v2 }
 0xb1f   :  { %10427 = vmatprep.mubr.msk.f32.mxu1 %vm11893_vm1, %v11894_v56 }
 0xb22   :  { %10428 = vmatmul.mubr.msk.f32.gmra.mrb[32].mxu1 %vm4117_vm2, %v13944_v13  ;;  %v4286_v13 = vadd.f32 %v15160_v31, %v14091_v3 }
 0xb23   :  { %10430 = vmatprep.mubr.msk.f32.mxu1 %vm11893_vm1, %v11894_v56 }
 0xb26   :  { %10431 = vmatmul.mubr.msk.f32.gmra.mrb[34].mxu1 %vm4117_vm2, %v14062_v48 }
 0xb27   :  { %10433 = vmatprep.mubr.msk.f32.mxu1 %vm11893_vm1, %v11894_v56 }
 0xb2a   :  { %10434 = vmatmul.mubr.msk.f32.gmra.mrb[36].mxu1 %vm4117_vm2, %v14232_v61  ;;  %v4291_v61 = vadd.f32 %v15160_v31, %v14098_v21 }
 0xb2b   :  { %10436 = vmatprep.mubr.msk.f32.mxu1 %vm11893_vm1, %v11894_v56 }
 0xb2e   :  { %10437 = vmatmul.mubr.msk.f32.gmra.mrb[38].mxu1 %vm4117_vm2, %v14348_v37 }
 0xb2f   :  { %10439 = vmatprep.mubr.msk.f32.mxu1 %vm11893_vm1, %v11894_v56 }
 0xb32   :  { %10440 = vmatmul.mubr.msk.f32.gmra.mrb[40].mxu1 %vm4117_vm2, %v14469_v24 }
 0xb33   :  { %10442 = vmatprep.mubr.msk.f32.mxu1 %vm11893_vm1, %v11894_v56 }
 0xb36   :  { %10443 = vmatmul.mubr.msk.f32.gmra.mrb[42].mxu1 %vm4117_vm2, %v14585_v43 }
 0xb37   :  { %10445 = vmatprep.mubr.msk.f32.mxu1 %vm11893_vm1, %v11894_v56 }
 0xb3a   :  { %10446 = vmatmul.mubr.msk.f32.gmra.mrb[44].mxu1 %vm4117_vm2, %v14701_v14 }
 0xb3b   :  { %10448 = vmatprep.mubr.msk.f32.mxu1 %vm11893_vm1, %v11894_v56 }
 0xb3e   :  { %10449 = vmatmul.mubr.msk.f32.gmra.mrb[46].mxu1 %vm4117_vm2, %v14817_v35 }
 0xb3f   :  { %10451 = vmatprep.mubr.msk.f32.mxu1 %vm11893_vm1, %v11894_v56 }
 0xb42   :  { %10452 = vmatmul.mubr.msk.f32.gmra.mrb[48].mxu1 %vm4117_vm2, %v14933_v10 }
 0xb43   :  { %10454 = vmatprep.mubr.msk.f32.mxu1 %vm11893_vm1, %v11894_v56 }
 0xb46   :  { %10455 = vmatmul.mubr.msk.f32.gmra.mrb[50].mxu1 %vm4117_vm2, %v4100_v1  ;;  %v4311_v1 = vadd.f32 %v15160_v31, %v14122_v32 }
 0xb47   :  { %10457 = vmatprep.mubr.msk.f32.mxu1 %vm11893_vm1, %v11894_v56 }
 0xb4a   :  { %10458 = vmatmul.mubr.msk.f32.gmra.mrb[52].mxu1 %vm4117_vm2, %v4101_v6 }
 0xbb5   :  { %v6867_v12 = vpop.f32.mrb[0].mxu1 }
 0xbb6   :  { %v10880_v60 = vadd.f32 %v6867_v12, %v4266_v55  ;;  %v10381_v16 = vpop.f32.mrb[1].mxu1 }
 0xbb8   :  { %v7028_v37 = vmax.f32 %v10880_v60, 0.0  ;;  %v4316_v60 = vadd.f32 %v15160_v31, %v14128_v20 }
 0xbb9   :  { %v6872_v11 = vpop.f32.mrb[2].mxu1 }
 0xbba   :  { %v10882_v18 = vadd.f32 %v6872_v11, %v4271_v4  ;;  %v10384_v56 = vpop.f32.mrb[3].mxu1 }
 0xbbb   :  { %v4321_v56 = vadd.f32 %v15160_v31, %v14134_v17 }
 0xbbc   :  { %v7029_v35 = vmax.f32 %v10882_v18, 0.0 }
 0xbbd   :  { %v6877_v29 = vpop.f32.mrb[4].mxu1 }
 0xbbe   :  { %v10884_v30 = vadd.f32 %v6877_v29, %v4276_v34  ;;  %v10387_v40 = vpop.f32.mrb[5].mxu1 }
 0xbc0   :  { %v7030_v47 = vmax.f32 %v10884_v30, 0.0 }
 0xbc1   :  { %v6882_v49 = vpop.f32.mrb[6].mxu1 }
 0xbc2   :  { %v10886_v59 = vadd.f32 %v6882_v49, %v4281_v52  ;;  %v10390_v2 = vpop.f32.mrb[7].mxu1  ;;  %v4326_v52 = vadd.f32 %v15160_v31, %v14140_v0 }
 0xbc4   :  { %v7031_v46 = vmax.f32 %v10886_v59, 0.0 }
 0xbc5   :  { %v6887_v48 = vpop.f32.mrb[8].mxu1 }
 0xbc6   :  { %v10888_v50 = vadd.f32 %v6887_v48, %v4286_v13  ;;  %v10393_v33 = vpop.f32.mrb[9].mxu1  ;;  %v4331_v48 = vadd.f32 %v15160_v31, %v14146_v58 }
 0xbc8   :  { %v7032_v44 = vmax.f32 %v10888_v50, 0.0 }
 0xbc9   :  { %v6892_v63 = vpop.f32.mrb[10].mxu1 }
 0xbca   :  { %v7055_v24 = vmax.f32 %v7028_v37, %v7032_v44  ;;  %v10890_v43 = vadd.f32 %v6892_v63, %v4291_v61  ;;  %v10396_v14 = vpop.f32.mrb[11].mxu1  ;;  %v4336_v44 = vadd.f32 %v15160_v31, %v14152_v41 }
 0xbcc   :  { %v7033_v57 = vmax.f32 %v10890_v43, 0.0 }
 0xbcd   :  { %v6897_v62 = vpop.f32.mrb[12].mxu1 }
 0xbce   :  { %v7056_v10 = vmax.f32 %v7029_v35, %v7033_v57  ;;  %v10892_v3 = vadd.f32 %v6897_v62, %v4296_v28  ;;  %v10399_v19 = vpop.f32.mrb[13].mxu1  ;;  %v4341_v28 = vadd.f32 %v15160_v31, %v14158_v51 }
 0xbd0   :  { %v7034_v21 = vmax.f32 %v10892_v3, 0.0  ;;  %v4346_v3 = vadd.f32 %v15160_v31, %v14164_v45 }
 0xbd1   :  { %v6902_v7 = vpop.f32.mrb[14].mxu1 }
 0xbd2   :  { %v7057_v5 = vmax.f32 %v7030_v47, %v7034_v21  ;;  %v10894_v54 = vadd.f32 %v6902_v7, %v4301_v42  ;;  %v10402_v23 = vpop.f32.mrb[15].mxu1  ;;  %v4351_v7 = vadd.f32 %v15160_v31, %v14170_v27 }
 0xbd4   :  { %v7035_v39 = vmax.f32 %v10894_v54, 0.0 }
 0xbd5   :  { %v6907_v25 = vpop.f32.mrb[16].mxu1 }
 0xbd6   :  { %v7058_v15 = vmax.f32 %v7031_v46, %v7035_v39  ;;  %v10896_v26 = vadd.f32 %v6907_v25, %v4306_v38  ;;  %v10405_v22 = vpop.f32.mrb[17].mxu1  ;;  %v4356_v46 = vadd.f32 %v15160_v31, %v14176_v8 }
 0xbd7   :  { %v15248_v22 = vld [vmem:[#allocation8_spill] sm:$0xff] }
 0xbd8   :  { %v7036_v9 = vmax.f32 %v10896_v26, 0.0 }
 0xbd9   :  { %v6912_v36 = vpop.f32.mrb[18].mxu1 }
 0xbda   :  { %v7059_v6 = vmax.f32 %v7055_v24, %v7036_v9  ;;  %v10898_v55 = vadd.f32 %v6912_v36, %v4311_v1  ;;  %v10408_v12 = vpop.f32.mrb[19].mxu1  ;;  %v4361_v1 = vadd.f32 %v15160_v31, %v15248_v22 }
 0xbdb   :  { %v15249_v12 = vld [vmem:[#allocation9_spill] sm:$0xff] }
 0xbdc   :  { %v7037_v16 = vmax.f32 %v10898_v55, 0.0 }
 0xbdd   :  { %v6917_v4 = vpop.f32.mrb[20].mxu1 }
 0xbde   :  { %v7060_v53 = vmax.f32 %v7056_v10, %v7037_v16  ;;  %v10900_v11 = vadd.f32 %v6917_v4, %v4316_v60  ;;  %v10411_v18 = vpop.f32.mrb[21].mxu1  ;;  %v4366_v60 = vadd.f32 %v15160_v31, %v15249_v12 }
 0xbdf   :  { %v15250_v18 = vld [vmem:[#allocation10_spill] sm:$0xff] }
 0xbe0   :  { %v7038_v34 = vmax.f32 %v10900_v11, 0.0 }
 0xbe1   :  { %v6922_v29 = vpop.f32.mrb[22].mxu1 }
 0xbe2   :  { %v7061_v30 = vmax.f32 %v7057_v5, %v7038_v34  ;;  %v10902_v32 = vadd.f32 %v6922_v29, %v4321_v56  ;;  %v10414_v40 = vpop.f32.mrb[23].mxu1  ;;  %v4371_v56 = vadd.f32 %v15160_v31, %v15250_v18 }
 0xbe4   :  { %v7039_v49 = vmax.f32 %v10902_v32, 0.0 }
 0xbe5   :  { %v6927_v59 = vpop.f32.mrb[24].mxu1 }
 0xbe6   :  { %v7062_v2 = vmax.f32 %v7058_v15, %v7039_v49  ;;  %v10904_v20 = vadd.f32 %v6927_v59, %v4326_v52  ;;  %v10417_v13 = vpop.f32.mrb[25].mxu1  ;;  %v15251_v52 = vld [vmem:[#allocation11_spill] sm:$0xff] }
 0xbe7   :  { %v4376_v49 = vadd.f32 %v15160_v31, %v15251_v52 }
 0xbe8   :  { %v7040_v50 = vmax.f32 %v10904_v20, 0.0 }
 0xbe9   :  { %v6932_v33 = vpop.f32.mrb[26].mxu1 }
 0xbea   :  { %v7063_v61 = vmax.f32 %v7059_v6, %v7040_v50  ;;  %v10906_v17 = vadd.f32 %v6932_v33, %v4331_v48  ;;  %v10420_v37 = vpop.f32.mrb[27].mxu1  ;;  %v15252_v50 = vld [vmem:[#allocation12_spill] sm:$0xff] }
 0xbeb   :  { %v4381_v33 = vadd.f32 %v15160_v31, %v15252_v50 }
 0xbec   :  { %v7041_v63 = vmax.f32 %v10906_v17, 0.0 }
 0xbed   :  { %v6937_v24 = vpop.f32.mrb[28].mxu1 }
 0xbee   :  { %v7064_v43 = vmax.f32 %v7060_v53, %v7041_v63  ;;  %v10908_v0 = vadd.f32 %v6937_v24, %v4336_v44  ;;  %v10423_v14 = vpop.f32.mrb[29].mxu1  ;;  %v15253_v24 = vld [vmem:[#allocation13_spill] sm:$0xff] }
 0xbf0   :  { %v7042_v35 = vmax.f32 %v10908_v0, 0.0 }
 0xbf1   :  { %v6942_v57 = vpop.f32.mrb[30].mxu1 }
 0xbf2   :  { %v7065_v62 = vmax.f32 %v7061_v30, %v7042_v35  ;;  %v10910_v58 = vadd.f32 %v6942_v57, %v4341_v28  ;;  %v10426_v10 = vpop.f32.mrb[31].mxu1 }
 0xbf4   :  { %v7043_v19 = vmax.f32 %v10910_v58, 0.0 }
 0xbf5   :  { %v6947_v42 = vpop.f32.mrb[32].mxu1 }
 0xbf6   :  { %v7066_v47 = vmax.f32 %v7062_v2, %v7043_v19  ;;  %v10912_v41 = vadd.f32 %v6947_v42, %v4346_v3  ;;  %v10429_v21 = vpop.f32.mrb[33].mxu1 }
 0xbf8   :  { %v7044_v5 = vmax.f32 %v10912_v41, 0.0  ;;  %v15255_v41 = vld [vmem:[#allocation15_spill] sm:$0xff] }
 0xbf9   :  { %v6952_v54 = vpop.f32.mrb[34].mxu1  ;;  %v4396_v21 = vadd.f32 %v15160_v31, %v15255_v41 }
 0xbfa   :  { %v7067_v23 = vmax.f32 %v7063_v61, %v7044_v5  ;;  %v10914_v51 = vadd.f32 %v6952_v54, %v4351_v7  ;;  %v10432_v38 = vpop.f32.mrb[35].mxu1 }
 0xbfc   :  { %v7045_v39 = vmax.f32 %v10914_v51, 0.0 }
 0xbfd   :  { %v6957_v25 = vpop.f32.mrb[36].mxu1 }
 0xbfe   :  { %v7068_v15 = vmax.f32 %v7064_v43, %v7045_v39  ;;  %v10916_v45 = vadd.f32 %v6957_v25, %v4356_v46  ;;  %v10435_v26 = vpop.f32.mrb[37].mxu1  ;;  %v4386_v43 = vadd.f32 %v15160_v31, %v15253_v24 }
 0xc00   :  { %v7046_v9 = vmax.f32 %v10916_v45, 0.0 }
 0xc01   :  { %v6962_v36 = vpop.f32.mrb[38].mxu1 }
 0xc02   :  { %v7069_v6 = vmax.f32 %v7065_v62, %v7046_v9  ;;  %v10918_v27 = vadd.f32 %v6962_v36, %v4361_v1  ;;  %v10438_v55 = vpop.f32.mrb[39].mxu1  ;;  %v15254_v62 = vld [vmem:[#allocation14_spill] sm:$0xff] }
 0xc03   :  { %v4391_v58 = vadd.f32 %v15160_v31, %v15254_v62 }
 0xc04   :  { %v7047_v16 = vmax.f32 %v10918_v27, 0.0 }
 0xc05   :  { %v6967_v4 = vpop.f32.mrb[40].mxu1 }
 0xc06   :  { %v7070_v53 = vmax.f32 %v7066_v47, %v7047_v16  ;;  %v10920_v8 = vadd.f32 %v6967_v4, %v4366_v60  ;;  %v10441_v11 = vpop.f32.mrb[41].mxu1 }
 0xc08   :  { %v7048_v34 = vmax.f32 %v10920_v8, 0.0 }
 0xc09   :  { %v6972_v29 = vpop.f32.mrb[42].mxu1 }
 0xc0a   :  { %v7071_v30 = vmax.f32 %v7067_v23, %v7048_v34  ;;  %v10922_v32 = vadd.f32 %v6972_v29, %v4371_v56  ;;  %v10444_v40 = vpop.f32.mrb[43].mxu1 }
 0xc0c   :  { %v7049_v59 = vmax.f32 %v10922_v32, 0.0 }
 0xc0d   :  { %v6977_v2 = vpop.f32.mrb[44].mxu1 }
 0xc0e   :  { %v7072_v20 = vmax.f32 %v7068_v15, %v7049_v59  ;;  %v10924_v13 = vadd.f32 %v6977_v2, %v4376_v49  ;;  %v10447_v48 = vpop.f32.mrb[45].mxu1 }
 0xc10   :  { %v7050_v61 = vmax.f32 %v10924_v13, 0.0 }
 0xc11   :  { %v6982_v17 = vpop.f32.mrb[46].mxu1 }
 0xc12   :  { %v7073_v37 = vmax.f32 %v7069_v6, %v7050_v61  ;;  %v10926_v44 = vadd.f32 %v6982_v17, %v4381_v33  ;;  %v10450_v63 = vpop.f32.mrb[47].mxu1 }
 0xc14   :  { %v7051_v0 = vmax.f32 %v10926_v44, 0.0 }
 0xc15   :  { %v6987_v14 = vpop.f32.mrb[48].mxu1 }
 0xc16   :  { %v7074_v28 = vmax.f32 %v7070_v53, %v7051_v0  ;;  %v10928_v35 = vadd.f32 %v6987_v14, %v4386_v43  ;;  %v10453_v57 = vpop.f32.mrb[49].mxu1 }
 0xc18   :  { %v7052_v10 = vmax.f32 %v10928_v35, 0.0 }
 0xc19   :  { %v6992_v3 = vpop.f32.mrb[50].mxu1 }
 0xc1a   :  { %v7075_v19 = vmax.f32 %v7071_v30, %v7052_v10  ;;  %v10930_v42 = vadd.f32 %v6992_v3, %v4391_v58  ;;  %v10456_v47 = vpop.f32.mrb[51].mxu1 }
 0xc1c   :  { %v7053_v7 = vmax.f32 %v10930_v42, 0.0 }
 0xc1d   :  { %v6997_v5 = vpop.f32.mrb[52].mxu1 }
 0xc1e   :  { %v7076_v54 = vmax.f32 %v7072_v20, %v7053_v7  ;;  %v10932_v23 = vadd.f32 %v6997_v5, %v4396_v21  ;;  %v10459_v51 = vpop.f32.mrb[53].mxu1 }
 0xc20   :  { %v7078_v38 = vmax.f32 %v7075_v19, %v7076_v54  ;;  %v7054_v46 = vmax.f32 %v10932_v23, 0.0 }
 0xc22   :  { %v7077_v39 = vmax.f32 %v7073_v37, %v7054_v46 }
 0xc24   :  { %v7079_v25 = vmax.f32 %v7077_v39, %v7074_v28 }
 0xc26   :  { %v7080_v15 = vmax.f32 %v7078_v38, %v7079_v25 }
 0xc28   :  { %7081 = vst [vmem:[#allocation5] sm:$0xff] %v7080_v15 }
 0xc29   :  { %11873 = shalt.err (!%p11870_p12)
}
 0xc2a   :  { %s11874_s1 = scalar_lea.hbm %s15236_s8, 128 }
 0xc2b   :  { %p11875_p13 = scmp.ne.s32.totalorder %s15236_s8, %s11874_s1  ;;  %p11878_p0 = scmp.lt.u32.totalorder %s11874_s1, %s15236_s8 }
 0xc2d   :  { %p11880_p1 = pnand %p11878_p0, %p11875_p13 }
 0xc2f   :  { %11883 = shalt.err (!%p11880_p1)
}
 0xc30   :  { %7091 = dma.vmem_to_hbm [thread:$0]  %s7089_s25, 128, %s15236_s8, [#allocation4]  }
 0xc31   :  { %11886 = dma.done.wait [#allocation4], 128  }
 0xc32   :  { %11887 = vsyncadd [#allocation4], 4294967168 }
 0xc33   :  { %7095 = vsyncpa [#allocation3], 1 }
 0xc34   :  { %7096 = vsyncpa [#allocation4], 1 }

</bundles_post_ra>
